<compile_context>
chip_gen: v6e
topology: v6e:2x2x1
jax: 0.10.0
libtpu: 0.0.40
codegen_flags: <defaults>
</compile_context>

<pallas_src>
import functools
import math

import jax
import jax.numpy as jnp
from jax.experimental import pallas as pl
from jax.experimental.pallas import tpu as pltpu

TM_MM = 512     # row tile for the fused matmul kernel
TM_EW = 1024    # row tile for elementwise kernels


# --------------------------------------------------------------------------
# Pallas kernels
# --------------------------------------------------------------------------
def _mm_kernel(p_ref, w_ref, sh_ref, o_ref, *, relu):
    # y = (patches @ W_scaled) + shift ; optional ReLU
    acc = jnp.dot(p_ref[...], w_ref[...], preferred_element_type=jnp.float32)
    y = acc + sh_ref[...]
    if relu:
        y = jnp.maximum(y, 0.0)
    o_ref[...] = y


def _mm_res_kernel(p_ref, w_ref, sh_ref, r_ref, o_ref, *, relu):
    # y = (patches @ W_scaled) + shift + residual ; optional ReLU
    acc = jnp.dot(p_ref[...], w_ref[...], preferred_element_type=jnp.float32)
    y = acc + sh_ref[...] + r_ref[...]
    if relu:
        y = jnp.maximum(y, 0.0)
    o_ref[...] = y


def _maxpool_bn_relu_kernel(a_ref, b_ref, c_ref, d_ref, s_ref, sh_ref, o_ref):
    m = jnp.maximum(jnp.maximum(a_ref[...], b_ref[...]),
                    jnp.maximum(c_ref[...], d_ref[...]))
    o_ref[...] = jnp.maximum(m * s_ref[...] + sh_ref[...], 0.0)


# --------------------------------------------------------------------------
# Pallas wrappers
# --------------------------------------------------------------------------
def fused_conv_matmul(patches, w_mat, shift, residual, relu):
    """(M,K)bf16 @ (K,N)bf16 -> f32, + shift(1,N) [+ residual(M,N)], ReLU."""
    M, K = patches.shape
    N = w_mat.shape[1]
    patches = patches.astype(jnp.bfloat16)
    w_mat = w_mat.astype(jnp.bfloat16)
    shift = shift.astype(jnp.float32).reshape(1, N)

    tm = M if M <= TM_MM else TM_MM
    grid = (pl.cdiv(M, tm),)

    in_specs = [
        pl.BlockSpec((tm, K), lambda i: (i, 0)),
        pl.BlockSpec((K, N), lambda i: (0, 0)),
        pl.BlockSpec((1, N), lambda i: (0, 0)),
    ]
    args = [patches, w_mat, shift]
    if residual is not None:
        in_specs.append(pl.BlockSpec((tm, N), lambda i: (i, 0)))
        args.append(residual.astype(jnp.float32))
        kernel = functools.partial(_mm_res_kernel, relu=relu)
    else:
        kernel = functools.partial(_mm_kernel, relu=relu)

    return pl.pallas_call(
        kernel,
        out_shape=jax.ShapeDtypeStruct((M, N), jnp.float32),
        grid=grid,
        in_specs=in_specs,
        out_specs=pl.BlockSpec((tm, N), lambda i: (i, 0)),
        compiler_params=pltpu.CompilerParams(dimension_semantics=("parallel",)),
    )(*args)


def maxpool_bn_relu(x, scale, shift):
    """MaxPool2d(2,2) + folded BN + ReLU on NHWC input (even H, W)."""
    Nb, H, W, C = x.shape
    OH, OW = H // 2, W // 2
    a = x[:, 0::2, 0::2, :].reshape(-1, C)
    b = x[:, 0::2, 1::2, :].reshape(-1, C)
    c = x[:, 1::2, 0::2, :].reshape(-1, C)
    d = x[:, 1::2, 1::2, :].reshape(-1, C)
    M = Nb * OH * OW
    tr = M if M <= TM_EW else TM_EW
    spec = pl.BlockSpec((tr, C), lambda i: (i, 0))
    sspec = pl.BlockSpec((1, C), lambda i: (0, 0))
    out = pl.pallas_call(
        _maxpool_bn_relu_kernel,
        out_shape=jax.ShapeDtypeStruct((M, C), jnp.float32),
        grid=(pl.cdiv(M, tr),),
        in_specs=[spec, spec, spec, spec, sspec, sspec],
        out_specs=spec,
        compiler_params=pltpu.CompilerParams(dimension_semantics=("parallel",)),
    )(a, b, c, d, scale.reshape(1, C), shift.reshape(1, C))
    return out.reshape(Nb, OH, OW, C)


# --------------------------------------------------------------------------
# Conv glue (im2col / 4-phase transposed conv: layout plumbing, not compute)
# --------------------------------------------------------------------------
def extract_patches(x, kh, kw, stride, pad_h, pad_w, dil_h, dil_w):
    Nb, H, W, C = x.shape
    xp = jnp.pad(x, ((0, 0), (pad_h, pad_h), (pad_w, pad_w), (0, 0)))
    Hp, Wp = H + 2 * pad_h, W + 2 * pad_w
    OH = (Hp - dil_h * (kh - 1) - 1) // stride + 1
    OW = (Wp - dil_w * (kw - 1) - 1) // stride + 1
    cols = []
    for i in range(kh):
        for j in range(kw):
            cols.append(xp[:, i * dil_h: i * dil_h + (OH - 1) * stride + 1: stride,
                           j * dil_w: j * dil_w + (OW - 1) * stride + 1: stride, :])
    return jnp.concatenate(cols, axis=-1), OH, OW


def conv2d(x, weight, bias, *, stride=1, padding=(0, 0), dilation=(1, 1),
           scale=None, shift=None, residual=None, relu=False):
    # weight: (Cout, Cin, kh, kw)  (PyTorch layout)
    Cout, Cin, kh, kw = weight.shape
    xb = x.astype(jnp.bfloat16)                     # halve im2col HBM bytes
    patches, OH, OW = extract_patches(xb, kh, kw, stride, padding[0], padding[1],
                                      dilation[0], dilation[1])
    Nb = x.shape[0]
    M = Nb * OH * OW
    p2 = patches.reshape(M, kh * kw * Cin)
    w_mat = jnp.transpose(weight, (2, 3, 1, 0)).reshape(kh * kw * Cin, Cout)
    if scale is not None:                           # fold BN into weights/shift
        w_mat = w_mat * scale[None, :]
        sh_total = bias * scale + shift
    else:
        sh_total = bias
    res = None if residual is None else residual.reshape(M, Cout)
    out = fused_conv_matmul(p2, w_mat, sh_total, res, relu)
    return out.reshape(Nb, OH, OW, Cout)


def conv_transpose2d(x, weight, bias, *, stride, padding, output_padding,
                     scale=None, shift=None, relu=False):
    # weight: (Cin, Cout, kh, kw)  (PyTorch ConvTranspose2d layout)
    # 4-phase (sub-pixel) decomposition: one small matmul per output parity;
    # no zero-upsampled intermediate, no matmul over structural zeros.
    Cin, Cout, kh, kw = weight.shape
    Nb, H, W, _ = x.shape
    s = stride
    OH = (H - 1) * s - 2 * padding + kh + output_padding
    OW = (W - 1) * s - 2 * padding + kw + output_padding
    assert OH == s * H and OW == s * W  # holds for ERFNet upsamplers & head

    def phase_taps(r, k):
        taps = []
        for i in range(k):
            if (i - r - padding) % s == 0:
                taps.append((i, (i - r - padding) // s))   # input h = q - delta
        return taps

    taps_h = [phase_taps(r, kh) for r in range(s)]
    taps_w = [phase_taps(r, kw) for r in range(s)]
    dh_all = [d for tl in taps_h for (_, d) in tl]
    dw_all = [d for tl in taps_w for (_, d) in tl]
    plo_h, phi_h = max(0, max(dh_all)), max(0, -min(dh_all))
    plo_w, phi_w = max(0, max(dw_all)), max(0, -min(dw_all))

    xb = x.astype(jnp.bfloat16)
    xp = jnp.pad(xb, ((0, 0), (plo_h, phi_h), (plo_w, phi_w), (0, 0)))

    if scale is not None:
        sh_total = bias * scale + shift
    else:
        sh_total = bias
    M = Nb * H * W

    phase_rows = []
    for rh in range(s):
        row = []
        for rw in range(s):
            cols, wcols = [], []
            for (ih, dh) in taps_h[rh]:
                for (iw, dw) in taps_w[rw]:
                    hs, ws = plo_h - dh, plo_w - dw
                    cols.append(xp[:, hs:hs + H, ws:ws + W, :])
                    wcols.append(weight[:, :, ih, iw])        # (Cin, Cout)
            p2 = jnp.concatenate(cols, axis=-1).reshape(M, len(cols) * Cin)
            w_mat = jnp.concatenate(wcols, axis=0)            # (taps*Cin, Cout)
            if scale is not None:
                w_mat = w_mat * scale[None, :]
            y = fused_conv_matmul(p2, w_mat, sh_total, None, relu)
            row.append(y.reshape(Nb, H, W, Cout))
        phase_rows.append(row)

    yst = jnp.stack([jnp.stack(r, axis=0) for r in phase_rows], axis=0)  # (s,s,N,H,W,C)
    out = jnp.transpose(yst, (2, 3, 0, 4, 1, 5)).reshape(Nb, s * H, s * W, Cout)
    return out


def bn_fold(bn):
    scale = bn["weight"] / jnp.sqrt(bn["var"] + 1e-3)
    shift = bn["bias"] - bn["mean"] * scale
    return scale, shift


# --------------------------------------------------------------------------
# ERFNet blocks
# --------------------------------------------------------------------------
def downsampler_block(x, p):
    # BN is per-channel -> commutes with the channel concat; fuse it (and ReLU)
    # into each branch's kernel epilogue.  torch.cat order: conv first, pool second.
    scale, shift = bn_fold(p["bn"])
    Cconv = p["conv_w"].shape[0]
    conv_out = conv2d(x, p["conv_w"], p["conv_b"], stride=2, padding=(1, 1),
                      scale=scale[:Cconv], shift=shift[:Cconv], relu=True)
    pool_out = maxpool_bn_relu(x, scale[Cconv:], shift[Cconv:])
    return jnp.concatenate([conv_out, pool_out], axis=-1)


def non_bt_1d(x, p, dil):
    bn1_s, bn1_sh = bn_fold(p["bn1"])
    bn2_s, bn2_sh = bn_fold(p["bn2"])
    out = conv2d(x, p["w1"], p["b1"], padding=(1, 0), relu=True)                 # 3x1 + relu
    out = conv2d(out, p["w2"], p["b2"], padding=(0, 1),
                 scale=bn1_s, shift=bn1_sh, relu=True)                           # 1x3 + bn1 + relu
    out = conv2d(out, p["w3"], p["b3"], padding=(dil, 0), dilation=(dil, 1),
                 relu=True)                                                      # dilated 3x1 + relu
    # dropout is identity in eval mode
    out = conv2d(out, p["w4"], p["b4"], padding=(0, dil), dilation=(1, dil),
                 scale=bn2_s, shift=bn2_sh, residual=x, relu=True)               # 1x3 + bn2 + skip + relu
    return out


def upsampler_block(x, p):
    s, sh = bn_fold(p["bn"])
    return conv_transpose2d(x, p["w"], p["b"], stride=2, padding=1,
                            output_padding=1, scale=s, shift=sh, relu=True)


def erfnet_forward(params, x_nchw):
    x = jnp.transpose(x_nchw, (0, 2, 3, 1)).astype(jnp.float32)  # NCHW -> NHWC
    # Encoder
    out = downsampler_block(x, params["encoder"]["init"])
    for lp in params["encoder"]["layers"]:
        out = downsampler_block(out, lp) if lp["type"] == "down" \
            else non_bt_1d(out, lp, lp["dil"])
    # Decoder
    for lp in params["decoder"]["layers"]:
        out = upsampler_block(out, lp) if lp["type"] == "up" \
            else non_bt_1d(out, lp, lp["dil"])
    out = conv_transpose2d(out, params["decoder"]["out_w"], params["decoder"]["out_b"],
                           stride=2, padding=0, output_padding=0)
    return jnp.transpose(out, (0, 3, 1, 2))  # NHWC -> NCHW


# --------------------------------------------------------------------------
# Deterministic parameter construction (synthetic weights, not a checkpoint)
# --------------------------------------------------------------------------
class KeyGen:
    def __init__(self, seed):
        self.key = jax.random.PRNGKey(seed)

    def __call__(self):
        self.key, k = jax.random.split(self.key)
        return k


def _init_conv(key, cout, cin, kh, kw):
    k1, k2 = jax.random.split(key)
    fan = cin * kh * kw
    w = jax.random.normal(k1, (cout, cin, kh, kw), jnp.float32) / math.sqrt(fan)
    b = 0.01 * jax.random.normal(k2, (cout,), jnp.float32)
    return w, b


def _init_bn(key, c):
    k1, k2, k3, k4 = jax.random.split(key, 4)
    return dict(weight=1.0 + 0.1 * jax.random.normal(k1, (c,), jnp.float32),
                bias=0.1 * jax.random.normal(k2, (c,), jnp.float32),
                mean=0.1 * jax.random.normal(k3, (c,), jnp.float32),
                var=1.0 + 0.1 * jax.random.uniform(k4, (c,), jnp.float32))


def _init_non_bt(kg, c):
    w1, b1 = _init_conv(kg(), c, c, 3, 1)
    w2, b2 = _init_conv(kg(), c, c, 1, 3)
    w3, b3 = _init_conv(kg(), c, c, 3, 1)
    w4, b4 = _init_conv(kg(), c, c, 1, 3)
    return dict(type="nb", w1=w1, b1=b1, w2=w2, b2=b2, w3=w3, b3=b3, w4=w4, b4=b4,
                bn1=_init_bn(kg(), c), bn2=_init_bn(kg(), c))


def _init_down(kg, cin, cout):
    w, b = _init_conv(kg(), cout - cin, cin, 3, 3)
    return dict(type="down", conv_w=w, conv_b=b, bn=_init_bn(kg(), cout))


def _init_up(kg, cin, cout, kh=3, kw=3):
    k1, k2 = jax.random.split(kg())
    w = jax.random.normal(k1, (cin, cout, kh, kw), jnp.float32) / math.sqrt(cin * kh * kw)
    b = 0.01 * jax.random.normal(k2, (cout,), jnp.float32)
    return dict(type="up", w=w, b=b, bn=_init_bn(kg(), cout))


def init_erfnet(num_classes, seed=0):
    kg = KeyGen(seed)
    init_block = _init_down(kg, 3, 16)
    enc_layers = [_init_down(kg, 16, 64)]
    enc_layers += [dict(_init_non_bt(kg, 64), dil=1) for _ in range(5)]
    enc_layers += [_init_down(kg, 64, 128)]
    for _ in range(2):
        for d in (2, 4, 8, 16):
            enc_layers.append(dict(_init_non_bt(kg, 128), dil=d))
    encoder = dict(init=init_block, layers=enc_layers)

    dec_layers = [_init_up(kg, 128, 64),
                  dict(_init_non_bt(kg, 64), dil=1),
                  dict(_init_non_bt(kg, 64), dil=1),
                  _init_up(kg, 64, 16),
                  dict(_init_non_bt(kg, 16), dil=1),
                  dict(_init_non_bt(kg, 16), dil=1)]
    k1, k2 = jax.random.split(kg())
    out_w = jax.random.normal(k1, (16, num_classes, 2, 2), jnp.float32) / math.sqrt(16 * 4)
    out_b = 0.01 * jax.random.normal(k2, (num_classes,), jnp.float32)
    decoder = dict(layers=dec_layers, out_w=out_w, out_b=out_b)
    return dict(encoder=encoder, decoder=decoder)


# --------------------------------------------------------------------------
if __name__ == "__main__":
    num_classes = 5
    N, C, H, W = 2, 3, 16, 16   # ERFNet expects 3-channel input; H,W divisible by 8

    params = init_erfnet(num_classes, seed=0)
    x = jax.random.normal(jax.random.PRNGKey(0), (N, C, H, W), jnp.float32)

    fwd = jax.jit(lambda inp: erfnet_forward(params, inp))
    out = fwd(x)
    out = jax.block_until_ready(out)

    assert out.shape == (N, num_classes, H, W), out.shape
    assert bool(jnp.all(jnp.isfinite(out)))
    print("KERNEL_OK")
</pallas_src>

<mosaic_0001>
module attributes {stable_mosaic.version = 11 : i64} {
  func.func @_maxpool_bn_relu_kernel(%arg0: i32, %arg1: memref<128x3xf32, #tpu.memory_space<vmem>>, %arg2: memref<128x3xf32, #tpu.memory_space<vmem>>, %arg3: memref<128x3xf32, #tpu.memory_space<vmem>>, %arg4: memref<128x3xf32, #tpu.memory_space<vmem>>, %arg5: memref<1x3xf32, #tpu.memory_space<vmem>>, %arg6: memref<1x3xf32, #tpu.memory_space<vmem>>, %arg7: memref<128x3xf32, #tpu.memory_space<vmem>>) attributes {dimension_semantics = [#tpu.dimension_semantics<parallel>], iteration_bounds = array<i64: 1>, scalar_prefetch = 0 : i64, scratch_operands = 0 : i64, tpu.core_type = #tpu.core_type<tc>, window_params = [{transform_indices = @transform_0, window_bounds = array<i64: 128, 3>}, {transform_indices = @transform_1, window_bounds = array<i64: 128, 3>}, {transform_indices = @transform_2, window_bounds = array<i64: 128, 3>}, {transform_indices = @transform_3, window_bounds = array<i64: 128, 3>}, {pipeline_mode = #tpu.pipeline_mode<synchronous>, transform_indices = @transform_4, window_bounds = array<i64: 1, 3>}, {pipeline_mode = #tpu.pipeline_mode<synchronous>, transform_indices = @transform_5, window_bounds = array<i64: 1, 3>}, {transform_indices = @transform_6, window_bounds = array<i64: 128, 3>}]} {
    %c0 = arith.constant 0 : index
    %c0_0 = arith.constant 0 : index
    %0 = vector.load %arg1[%c0, %c0_0] : memref<128x3xf32, #tpu.memory_space<vmem>>, vector<128x3xf32>
    %c0_1 = arith.constant 0 : index
    %c0_2 = arith.constant 0 : index
    %1 = vector.load %arg2[%c0_1, %c0_2] : memref<128x3xf32, #tpu.memory_space<vmem>>, vector<128x3xf32>
    %2 = arith.maximumf %0, %1 : vector<128x3xf32>
    %c0_3 = arith.constant 0 : index
    %c0_4 = arith.constant 0 : index
    %3 = vector.load %arg3[%c0_3, %c0_4] : memref<128x3xf32, #tpu.memory_space<vmem>>, vector<128x3xf32>
    %c0_5 = arith.constant 0 : index
    %c0_6 = arith.constant 0 : index
    %4 = vector.load %arg4[%c0_5, %c0_6] : memref<128x3xf32, #tpu.memory_space<vmem>>, vector<128x3xf32>
    %5 = arith.maximumf %3, %4 : vector<128x3xf32>
    %6 = arith.maximumf %2, %5 : vector<128x3xf32>
    %c0_7 = arith.constant 0 : index
    %c0_8 = arith.constant 0 : index
    %7 = vector.load %arg5[%c0_7, %c0_8] : memref<1x3xf32, #tpu.memory_space<vmem>>, vector<1x3xf32>
    %8 = vector.broadcast %7 : vector<1x3xf32> to vector<128x3xf32>
    %9 = arith.mulf %6, %8 : vector<128x3xf32>
    %c0_9 = arith.constant 0 : index
    %c0_10 = arith.constant 0 : index
    %10 = vector.load %arg6[%c0_9, %c0_10] : memref<1x3xf32, #tpu.memory_space<vmem>>, vector<1x3xf32>
    %11 = vector.broadcast %10 : vector<1x3xf32> to vector<128x3xf32>
    %12 = arith.addf %9, %11 : vector<128x3xf32>
    %cst = arith.constant 0.000000e+00 : f32
    %13 = vector.broadcast %cst : f32 to vector<128x3xf32>
    %14 = arith.maximumf %12, %13 : vector<128x3xf32>
    %c0_11 = arith.constant 0 : index
    %c0_12 = arith.constant 0 : index
    %15 = vector.load %arg7[%c0_11, %c0_12] : memref<128x3xf32, #tpu.memory_space<vmem>>, vector<128x3xf32>
    tpu.vector_store %arg7[%c0_11, %c0_12], %14 {strides = array<i32>} : memref<128x3xf32, #tpu.memory_space<vmem>>, vector<128x3xf32>,
    return
  }
  func.func @transform_0(%arg0: i32) -> (i32, i32) {
    %c0_i32 = arith.constant 0 : i32
    %c0_i32_0 = arith.constant 0 : i32
    return %arg0, %c0_i32 : i32, i32
  }
  func.func @transform_1(%arg0: i32) -> (i32, i32) {
    %c0_i32 = arith.constant 0 : i32
    %c0_i32_0 = arith.constant 0 : i32
    return %arg0, %c0_i32 : i32, i32
  }
  func.func @transform_2(%arg0: i32) -> (i32, i32) {
    %c0_i32 = arith.constant 0 : i32
    %c0_i32_0 = arith.constant 0 : i32
    return %arg0, %c0_i32 : i32, i32
  }
  func.func @transform_3(%arg0: i32) -> (i32, i32) {
    %c0_i32 = arith.constant 0 : i32
    %c0_i32_0 = arith.constant 0 : i32
    return %arg0, %c0_i32 : i32, i32
  }
  func.func @transform_4(%arg0: i32) -> (i32, i32) {
    %c0_i32 = arith.constant 0 : i32
    %c0_i32_0 = arith.constant 0 : i32
    %c0_i32_1 = arith.constant 0 : i32
    return %c0_i32, %c0_i32_0 : i32, i32
  }
  func.func @transform_5(%arg0: i32) -> (i32, i32) {
    %c0_i32 = arith.constant 0 : i32
    %c0_i32_0 = arith.constant 0 : i32
    %c0_i32_1 = arith.constant 0 : i32
    return %c0_i32, %c0_i32_0 : i32, i32
  }
  func.func @transform_6(%arg0: i32) -> (i32, i32) {
    %c0_i32 = arith.constant 0 : i32
    %c0_i32_0 = arith.constant 0 : i32
    return %arg0, %c0_i32 : i32, i32
  }
}

module attributes {stable_mosaic.version = 11 : i64} {
  func.func @_mm_kernel(%arg0: i32, %arg1: memref<128x27xbf16, #tpu.memory_space<vmem>>, %arg2: memref<27x13xbf16, #tpu.memory_space<vmem>>, %arg3: memref<1x13xf32, #tpu.memory_space<vmem>>, %arg4: memref<128x13xf32, #tpu.memory_space<vmem>>) attributes {dimension_semantics = [#tpu.dimension_semantics<parallel>], iteration_bounds = array<i64: 1>, scalar_prefetch = 0 : i64, scratch_operands = 0 : i64, tpu.core_type = #tpu.core_type<tc>, window_params = [{transform_indices = @transform_0, window_bounds = array<i64: 128, 27>}, {pipeline_mode = #tpu.pipeline_mode<synchronous>, transform_indices = @transform_1, window_bounds = array<i64: 27, 13>}, {pipeline_mode = #tpu.pipeline_mode<synchronous>, transform_indices = @transform_2, window_bounds = array<i64: 1, 13>}, {transform_indices = @transform_3, window_bounds = array<i64: 128, 13>}]} {
    %c0 = arith.constant 0 : index
    %c0_0 = arith.constant 0 : index
    %0 = vector.load %arg1[%c0, %c0_0] : memref<128x27xbf16, #tpu.memory_space<vmem>>, vector<128x27xbf16>
    %c0_1 = arith.constant 0 : index
    %c0_2 = arith.constant 0 : index
    %1 = vector.load %arg2[%c0_1, %c0_2] : memref<27x13xbf16, #tpu.memory_space<vmem>>, vector<27x13xbf16>
    %cst = arith.constant dense<0.000000e+00> : vector<128x13xf32>
    %2 = tpu.matmul %0, %1, %cst {dimension_numbers = #tpu.dot_dimension_numbers<[1], [0], [0], [1], [0, 0, 1, 1], [], []>} : vector<128x27xbf16>, vector<27x13xbf16>, vector<128x13xf32> -> vector<128x13xf32>
    %c0_3 = arith.constant 0 : index
    %c0_4 = arith.constant 0 : index
    %3 = vector.load %arg3[%c0_3, %c0_4] : memref<1x13xf32, #tpu.memory_space<vmem>>, vector<1x13xf32>
    %4 = vector.broadcast %3 : vector<1x13xf32> to vector<128x13xf32>
    %5 = arith.addf %2, %4 : vector<128x13xf32>
    %cst_5 = arith.constant 0.000000e+00 : f32
    %6 = vector.broadcast %cst_5 : f32 to vector<128x13xf32>
    %7 = arith.maximumf %5, %6 : vector<128x13xf32>
    %c0_6 = arith.constant 0 : index
    %c0_7 = arith.constant 0 : index
    %8 = vector.load %arg4[%c0_6, %c0_7] : memref<128x13xf32, #tpu.memory_space<vmem>>, vector<128x13xf32>
    tpu.vector_store %arg4[%c0_6, %c0_7], %7 {strides = array<i32>} : memref<128x13xf32, #tpu.memory_space<vmem>>, vector<128x13xf32>,
    return
  }
  func.func @transform_0(%arg0: i32) -> (i32, i32) {
    %c0_i32 = arith.constant 0 : i32
    %c0_i32_0 = arith.constant 0 : i32
    return %arg0, %c0_i32 : i32, i32
  }
  func.func @transform_1(%arg0: i32) -> (i32, i32) {
    %c0_i32 = arith.constant 0 : i32
    %c0_i32_0 = arith.constant 0 : i32
    %c0_i32_1 = arith.constant 0 : i32
    return %c0_i32, %c0_i32_0 : i32, i32
  }
  func.func @transform_2(%arg0: i32) -> (i32, i32) {
    %c0_i32 = arith.constant 0 : i32
    %c0_i32_0 = arith.constant 0 : i32
    %c0_i32_1 = arith.constant 0 : i32
    return %c0_i32, %c0_i32_0 : i32, i32
  }
  func.func @transform_3(%arg0: i32) -> (i32, i32) {
    %c0_i32 = arith.constant 0 : i32
    %c0_i32_0 = arith.constant 0 : i32
    return %arg0, %c0_i32 : i32, i32
  }
}

module attributes {stable_mosaic.version = 11 : i64} {
  func.func @_maxpool_bn_relu_kernel(%arg0: i32, %arg1: memref<32x16xf32, #tpu.memory_space<vmem>>, %arg2: memref<32x16xf32, #tpu.memory_space<vmem>>, %arg3: memref<32x16xf32, #tpu.memory_space<vmem>>, %arg4: memref<32x16xf32, #tpu.memory_space<vmem>>, %arg5: memref<1x16xf32, #tpu.memory_space<vmem>>, %arg6: memref<1x16xf32, #tpu.memory_space<vmem>>, %arg7: memref<32x16xf32, #tpu.memory_space<vmem>>) attributes {dimension_semantics = [#tpu.dimension_semantics<parallel>], iteration_bounds = array<i64: 1>, scalar_prefetch = 0 : i64, scratch_operands = 0 : i64, tpu.core_type = #tpu.core_type<tc>, window_params = [{transform_indices = @transform_0, window_bounds = array<i64: 32, 16>}, {transform_indices = @transform_1, window_bounds = array<i64: 32, 16>}, {transform_indices = @transform_2, window_bounds = array<i64: 32, 16>}, {transform_indices = @transform_3, window_bounds = array<i64: 32, 16>}, {pipeline_mode = #tpu.pipeline_mode<synchronous>, transform_indices = @transform_4, window_bounds = array<i64: 1, 16>}, {pipeline_mode = #tpu.pipeline_mode<synchronous>, transform_indices = @transform_5, window_bounds = array<i64: 1, 16>}, {transform_indices = @transform_6, window_bounds = array<i64: 32, 16>}]} {
    %c0 = arith.constant 0 : index
    %c0_0 = arith.constant 0 : index
    %0 = vector.load %arg1[%c0, %c0_0] : memref<32x16xf32, #tpu.memory_space<vmem>>, vector<32x16xf32>
    %c0_1 = arith.constant 0 : index
    %c0_2 = arith.constant 0 : index
    %1 = vector.load %arg2[%c0_1, %c0_2] : memref<32x16xf32, #tpu.memory_space<vmem>>, vector<32x16xf32>
    %2 = arith.maximumf %0, %1 : vector<32x16xf32>
    %c0_3 = arith.constant 0 : index
    %c0_4 = arith.constant 0 : index
    %3 = vector.load %arg3[%c0_3, %c0_4] : memref<32x16xf32, #tpu.memory_space<vmem>>, vector<32x16xf32>
    %c0_5 = arith.constant 0 : index
    %c0_6 = arith.constant 0 : index
    %4 = vector.load %arg4[%c0_5, %c0_6] : memref<32x16xf32, #tpu.memory_space<vmem>>, vector<32x16xf32>
    %5 = arith.maximumf %3, %4 : vector<32x16xf32>
    %6 = arith.maximumf %2, %5 : vector<32x16xf32>
    %c0_7 = arith.constant 0 : index
    %c0_8 = arith.constant 0 : index
    %7 = vector.load %arg5[%c0_7, %c0_8] : memref<1x16xf32, #tpu.memory_space<vmem>>, vector<1x16xf32>
    %8 = vector.broadcast %7 : vector<1x16xf32> to vector<32x16xf32>
    %9 = arith.mulf %6, %8 : vector<32x16xf32>
    %c0_9 = arith.constant 0 : index
    %c0_10 = arith.constant 0 : index
    %10 = vector.load %arg6[%c0_9, %c0_10] : memref<1x16xf32, #tpu.memory_space<vmem>>, vector<1x16xf32>
    %11 = vector.broadcast %10 : vector<1x16xf32> to vector<32x16xf32>
    %12 = arith.addf %9, %11 : vector<32x16xf32>
    %cst = arith.constant 0.000000e+00 : f32
    %13 = vector.broadcast %cst : f32 to vector<32x16xf32>
    %14 = arith.maximumf %12, %13 : vector<32x16xf32>
    %c0_11 = arith.constant 0 : index
    %c0_12 = arith.constant 0 : index
    %15 = vector.load %arg7[%c0_11, %c0_12] : memref<32x16xf32, #tpu.memory_space<vmem>>, vector<32x16xf32>
    tpu.vector_store %arg7[%c0_11, %c0_12], %14 {strides = array<i32>} : memref<32x16xf32, #tpu.memory_space<vmem>>, vector<32x16xf32>,
    return
  }
  func.func @transform_0(%arg0: i32) -> (i32, i32) {
    %c0_i32 = arith.constant 0 : i32
    %c0_i32_0 = arith.constant 0 : i32
    return %arg0, %c0_i32 : i32, i32
  }
  func.func @transform_1(%arg0: i32) -> (i32, i32) {
    %c0_i32 = arith.constant 0 : i32
    %c0_i32_0 = arith.constant 0 : i32
    return %arg0, %c0_i32 : i32, i32
  }
  func.func @transform_2(%arg0: i32) -> (i32, i32) {
    %c0_i32 = arith.constant 0 : i32
    %c0_i32_0 = arith.constant 0 : i32
    return %arg0, %c0_i32 : i32, i32
  }
  func.func @transform_3(%arg0: i32) -> (i32, i32) {
    %c0_i32 = arith.constant 0 : i32
    %c0_i32_0 = arith.constant 0 : i32
    return %arg0, %c0_i32 : i32, i32
  }
  func.func @transform_4(%arg0: i32) -> (i32, i32) {
    %c0_i32 = arith.constant 0 : i32
    %c0_i32_0 = arith.constant 0 : i32
    %c0_i32_1 = arith.constant 0 : i32
    return %c0_i32, %c0_i32_0 : i32, i32
  }
  func.func @transform_5(%arg0: i32) -> (i32, i32) {
    %c0_i32 = arith.constant 0 : i32
    %c0_i32_0 = arith.constant 0 : i32
    %c0_i32_1 = arith.constant 0 : i32
    return %c0_i32, %c0_i32_0 : i32, i32
  }
  func.func @transform_6(%arg0: i32) -> (i32, i32) {
    %c0_i32 = arith.constant 0 : i32
    %c0_i32_0 = arith.constant 0 : i32
    return %arg0, %c0_i32 : i32, i32
  }
}

module attributes {stable_mosaic.version = 11 : i64} {
  func.func @_mm_kernel(%arg0: i32, %arg1: memref<32x144xbf16, #tpu.memory_space<vmem>>, %arg2: memref<144x48xbf16, #tpu.memory_space<vmem>>, %arg3: memref<1x48xf32, #tpu.memory_space<vmem>>, %arg4: memref<32x48xf32, #tpu.memory_space<vmem>>) attributes {dimension_semantics = [#tpu.dimension_semantics<parallel>], iteration_bounds = array<i64: 1>, scalar_prefetch = 0 : i64, scratch_operands = 0 : i64, tpu.core_type = #tpu.core_type<tc>, window_params = [{transform_indices = @transform_0, window_bounds = array<i64: 32, 144>}, {pipeline_mode = #tpu.pipeline_mode<synchronous>, transform_indices = @transform_1, window_bounds = array<i64: 144, 48>}, {pipeline_mode = #tpu.pipeline_mode<synchronous>, transform_indices = @transform_2, window_bounds = array<i64: 1, 48>}, {transform_indices = @transform_3, window_bounds = array<i64: 32, 48>}]} {
    %c0 = arith.constant 0 : index
    %c0_0 = arith.constant 0 : index
    %0 = vector.load %arg1[%c0, %c0_0] : memref<32x144xbf16, #tpu.memory_space<vmem>>, vector<32x144xbf16>
    %c0_1 = arith.constant 0 : index
    %c0_2 = arith.constant 0 : index
    %1 = vector.load %arg2[%c0_1, %c0_2] : memref<144x48xbf16, #tpu.memory_space<vmem>>, vector<144x48xbf16>
    %cst = arith.constant dense<0.000000e+00> : vector<32x48xf32>
    %2 = tpu.matmul %0, %1, %cst {dimension_numbers = #tpu.dot_dimension_numbers<[1], [0], [0], [1], [0, 0, 1, 1], [], []>} : vector<32x144xbf16>, vector<144x48xbf16>, vector<32x48xf32> -> vector<32x48xf32>
    %c0_3 = arith.constant 0 : index
    %c0_4 = arith.constant 0 : index
    %3 = vector.load %arg3[%c0_3, %c0_4] : memref<1x48xf32, #tpu.memory_space<vmem>>, vector<1x48xf32>
    %4 = vector.broadcast %3 : vector<1x48xf32> to vector<32x48xf32>
    %5 = arith.addf %2, %4 : vector<32x48xf32>
    %cst_5 = arith.constant 0.000000e+00 : f32
    %6 = vector.broadcast %cst_5 : f32 to vector<32x48xf32>
    %7 = arith.maximumf %5, %6 : vector<32x48xf32>
    %c0_6 = arith.constant 0 : index
    %c0_7 = arith.constant 0 : index
    %8 = vector.load %arg4[%c0_6, %c0_7] : memref<32x48xf32, #tpu.memory_space<vmem>>, vector<32x48xf32>
    tpu.vector_store %arg4[%c0_6, %c0_7], %7 {strides = array<i32>} : memref<32x48xf32, #tpu.memory_space<vmem>>, vector<32x48xf32>,
    return
  }
  func.func @transform_0(%arg0: i32) -> (i32, i32) {
    %c0_i32 = arith.constant 0 : i32
    %c0_i32_0 = arith.constant 0 : i32
    return %arg0, %c0_i32 : i32, i32
  }
  func.func @transform_1(%arg0: i32) -> (i32, i32) {
    %c0_i32 = arith.constant 0 : i32
    %c0_i32_0 = arith.constant 0 : i32
    %c0_i32_1 = arith.constant 0 : i32
    return %c0_i32, %c0_i32_0 : i32, i32
  }
  func.func @transform_2(%arg0: i32) -> (i32, i32) {
    %c0_i32 = arith.constant 0 : i32
    %c0_i32_0 = arith.constant 0 : i32
    %c0_i32_1 = arith.constant 0 : i32
    return %c0_i32, %c0_i32_0 : i32, i32
  }
  func.func @transform_3(%arg0: i32) -> (i32, i32) {
    %c0_i32 = arith.constant 0 : i32
    %c0_i32_0 = arith.constant 0 : i32
    return %arg0, %c0_i32 : i32, i32
  }
}

module attributes {stable_mosaic.version = 11 : i64} {
  func.func @_mm_kernel(%arg0: i32, %arg1: memref<32x192xbf16, #tpu.memory_space<vmem>>, %arg2: memref<192x64xbf16, #tpu.memory_space<vmem>>, %arg3: memref<1x64xf32, #tpu.memory_space<vmem>>, %arg4: memref<32x64xf32, #tpu.memory_space<vmem>>) attributes {dimension_semantics = [#tpu.dimension_semantics<parallel>], iteration_bounds = array<i64: 1>, scalar_prefetch = 0 : i64, scratch_operands = 0 : i64, tpu.core_type = #tpu.core_type<tc>, window_params = [{transform_indices = @transform_0, window_bounds = array<i64: 32, 192>}, {pipeline_mode = #tpu.pipeline_mode<synchronous>, transform_indices = @transform_1, window_bounds = array<i64: 192, 64>}, {pipeline_mode = #tpu.pipeline_mode<synchronous>, transform_indices = @transform_2, window_bounds = array<i64: 1, 64>}, {transform_indices = @transform_3, window_bounds = array<i64: 32, 64>}]} {
    %c0 = arith.constant 0 : index
    %c0_0 = arith.constant 0 : index
    %0 = vector.load %arg1[%c0, %c0_0] : memref<32x192xbf16, #tpu.memory_space<vmem>>, vector<32x192xbf16>
    %c0_1 = arith.constant 0 : index
    %c0_2 = arith.constant 0 : index
    %1 = vector.load %arg2[%c0_1, %c0_2] : memref<192x64xbf16, #tpu.memory_space<vmem>>, vector<192x64xbf16>
    %cst = arith.constant dense<0.000000e+00> : vector<32x64xf32>
    %2 = tpu.matmul %0, %1, %cst {dimension_numbers = #tpu.dot_dimension_numbers<[1], [0], [0], [1], [0, 0, 1, 1], [], []>} : vector<32x192xbf16>, vector<192x64xbf16>, vector<32x64xf32> -> vector<32x64xf32>
    %c0_3 = arith.constant 0 : index
    %c0_4 = arith.constant 0 : index
    %3 = vector.load %arg3[%c0_3, %c0_4] : memref<1x64xf32, #tpu.memory_space<vmem>>, vector<1x64xf32>
    %4 = vector.broadcast %3 : vector<1x64xf32> to vector<32x64xf32>
    %5 = arith.addf %2, %4 : vector<32x64xf32>
    %cst_5 = arith.constant 0.000000e+00 : f32
    %6 = vector.broadcast %cst_5 : f32 to vector<32x64xf32>
    %7 = arith.maximumf %5, %6 : vector<32x64xf32>
    %c0_6 = arith.constant 0 : index
    %c0_7 = arith.constant 0 : index
    %8 = vector.load %arg4[%c0_6, %c0_7] : memref<32x64xf32, #tpu.memory_space<vmem>>, vector<32x64xf32>
    tpu.vector_store %arg4[%c0_6, %c0_7], %7 {strides = array<i32>} : memref<32x64xf32, #tpu.memory_space<vmem>>, vector<32x64xf32>,
    return
  }
  func.func @transform_0(%arg0: i32) -> (i32, i32) {
    %c0_i32 = arith.constant 0 : i32
    %c0_i32_0 = arith.constant 0 : i32
    return %arg0, %c0_i32 : i32, i32
  }
  func.func @transform_1(%arg0: i32) -> (i32, i32) {
    %c0_i32 = arith.constant 0 : i32
    %c0_i32_0 = arith.constant 0 : i32
    %c0_i32_1 = arith.constant 0 : i32
    return %c0_i32, %c0_i32_0 : i32, i32
  }
  func.func @transform_2(%arg0: i32) -> (i32, i32) {
    %c0_i32 = arith.constant 0 : i32
    %c0_i32_0 = arith.constant 0 : i32
    %c0_i32_1 = arith.constant 0 : i32
    return %c0_i32, %c0_i32_0 : i32, i32
  }
  func.func @transform_3(%arg0: i32) -> (i32, i32) {
    %c0_i32 = arith.constant 0 : i32
    %c0_i32_0 = arith.constant 0 : i32
    return %arg0, %c0_i32 : i32, i32
  }
}

module attributes {stable_mosaic.version = 11 : i64} {
  func.func @_mm_res_kernel(%arg0: i32, %arg1: memref<32x192xbf16, #tpu.memory_space<vmem>>, %arg2: memref<192x64xbf16, #tpu.memory_space<vmem>>, %arg3: memref<1x64xf32, #tpu.memory_space<vmem>>, %arg4: memref<32x64xf32, #tpu.memory_space<vmem>>, %arg5: memref<32x64xf32, #tpu.memory_space<vmem>>) attributes {dimension_semantics = [#tpu.dimension_semantics<parallel>], iteration_bounds = array<i64: 1>, scalar_prefetch = 0 : i64, scratch_operands = 0 : i64, tpu.core_type = #tpu.core_type<tc>, window_params = [{transform_indices = @transform_0, window_bounds = array<i64: 32, 192>}, {pipeline_mode = #tpu.pipeline_mode<synchronous>, transform_indices = @transform_1, window_bounds = array<i64: 192, 64>}, {pipeline_mode = #tpu.pipeline_mode<synchronous>, transform_indices = @transform_2, window_bounds = array<i64: 1, 64>}, {transform_indices = @transform_3, window_bounds = array<i64: 32, 64>}, {transform_indices = @transform_4, window_bounds = array<i64: 32, 64>}]} {
    %c0 = arith.constant 0 : index
    %c0_0 = arith.constant 0 : index
    %0 = vector.load %arg1[%c0, %c0_0] : memref<32x192xbf16, #tpu.memory_space<vmem>>, vector<32x192xbf16>
    %c0_1 = arith.constant 0 : index
    %c0_2 = arith.constant 0 : index
    %1 = vector.load %arg2[%c0_1, %c0_2] : memref<192x64xbf16, #tpu.memory_space<vmem>>, vector<192x64xbf16>
    %cst = arith.constant dense<0.000000e+00> : vector<32x64xf32>
    %2 = tpu.matmul %0, %1, %cst {dimension_numbers = #tpu.dot_dimension_numbers<[1], [0], [0], [1], [0, 0, 1, 1], [], []>} : vector<32x192xbf16>, vector<192x64xbf16>, vector<32x64xf32> -> vector<32x64xf32>
    %c0_3 = arith.constant 0 : index
    %c0_4 = arith.constant 0 : index
    %3 = vector.load %arg3[%c0_3, %c0_4] : memref<1x64xf32, #tpu.memory_space<vmem>>, vector<1x64xf32>
    %4 = vector.broadcast %3 : vector<1x64xf32> to vector<32x64xf32>
    %5 = arith.addf %2, %4 : vector<32x64xf32>
    %c0_5 = arith.constant 0 : index
    %c0_6 = arith.constant 0 : index
    %6 = vector.load %arg4[%c0_5, %c0_6] : memref<32x64xf32, #tpu.memory_space<vmem>>, vector<32x64xf32>
    %7 = arith.addf %5, %6 : vector<32x64xf32>
    %cst_7 = arith.constant 0.000000e+00 : f32
    %8 = vector.broadcast %cst_7 : f32 to vector<32x64xf32>
    %9 = arith.maximumf %7, %8 : vector<32x64xf32>
    %c0_8 = arith.constant 0 : index
    %c0_9 = arith.constant 0 : index
    %10 = vector.load %arg5[%c0_8, %c0_9] : memref<32x64xf32, #tpu.memory_space<vmem>>, vector<32x64xf32>
    tpu.vector_store %arg5[%c0_8, %c0_9], %9 {strides = array<i32>} : memref<32x64xf32, #tpu.memory_space<vmem>>, vector<32x64xf32>,
    return
  }
  func.func @transform_0(%arg0: i32) -> (i32, i32) {
    %c0_i32 = arith.constant 0 : i32
    %c0_i32_0 = arith.constant 0 : i32
    return %arg0, %c0_i32 : i32, i32
  }
  func.func @transform_1(%arg0: i32) -> (i32, i32) {
    %c0_i32 = arith.constant 0 : i32
    %c0_i32_0 = arith.constant 0 : i32
    %c0_i32_1 = arith.constant 0 : i32
    return %c0_i32, %c0_i32_0 : i32, i32
  }
  func.func @transform_2(%arg0: i32) -> (i32, i32) {
    %c0_i32 = arith.constant 0 : i32
    %c0_i32_0 = arith.constant 0 : i32
    %c0_i32_1 = arith.constant 0 : i32
    return %c0_i32, %c0_i32_0 : i32, i32
  }
  func.func @transform_3(%arg0: i32) -> (i32, i32) {
    %c0_i32 = arith.constant 0 : i32
    %c0_i32_0 = arith.constant 0 : i32
    return %arg0, %c0_i32 : i32, i32
  }
  func.func @transform_4(%arg0: i32) -> (i32, i32) {
    %c0_i32 = arith.constant 0 : i32
    %c0_i32_0 = arith.constant 0 : i32
    return %arg0, %c0_i32 : i32, i32
  }
}

module attributes {stable_mosaic.version = 11 : i64} {
  func.func @_maxpool_bn_relu_kernel(%arg0: i32, %arg1: memref<8x64xf32, #tpu.memory_space<vmem>>, %arg2: memref<8x64xf32, #tpu.memory_space<vmem>>, %arg3: memref<8x64xf32, #tpu.memory_space<vmem>>, %arg4: memref<8x64xf32, #tpu.memory_space<vmem>>, %arg5: memref<1x64xf32, #tpu.memory_space<vmem>>, %arg6: memref<1x64xf32, #tpu.memory_space<vmem>>, %arg7: memref<8x64xf32, #tpu.memory_space<vmem>>) attributes {dimension_semantics = [#tpu.dimension_semantics<parallel>], iteration_bounds = array<i64: 1>, scalar_prefetch = 0 : i64, scratch_operands = 0 : i64, tpu.core_type = #tpu.core_type<tc>, window_params = [{transform_indices = @transform_0, window_bounds = array<i64: 8, 64>}, {transform_indices = @transform_1, window_bounds = array<i64: 8, 64>}, {transform_indices = @transform_2, window_bounds = array<i64: 8, 64>}, {transform_indices = @transform_3, window_bounds = array<i64: 8, 64>}, {pipeline_mode = #tpu.pipeline_mode<synchronous>, transform_indices = @transform_4, window_bounds = array<i64: 1, 64>}, {pipeline_mode = #tpu.pipeline_mode<synchronous>, transform_indices = @transform_5, window_bounds = array<i64: 1, 64>}, {transform_indices = @transform_6, window_bounds = array<i64: 8, 64>}]} {
    %c0 = arith.constant 0 : index
    %c0_0 = arith.constant 0 : index
    %0 = vector.load %arg1[%c0, %c0_0] : memref<8x64xf32, #tpu.memory_space<vmem>>, vector<8x64xf32>
    %c0_1 = arith.constant 0 : index
    %c0_2 = arith.constant 0 : index
    %1 = vector.load %arg2[%c0_1, %c0_2] : memref<8x64xf32, #tpu.memory_space<vmem>>, vector<8x64xf32>
    %2 = arith.maximumf %0, %1 : vector<8x64xf32>
    %c0_3 = arith.constant 0 : index
    %c0_4 = arith.constant 0 : index
    %3 = vector.load %arg3[%c0_3, %c0_4] : memref<8x64xf32, #tpu.memory_space<vmem>>, vector<8x64xf32>
    %c0_5 = arith.constant 0 : index
    %c0_6 = arith.constant 0 : index
    %4 = vector.load %arg4[%c0_5, %c0_6] : memref<8x64xf32, #tpu.memory_space<vmem>>, vector<8x64xf32>
    %5 = arith.maximumf %3, %4 : vector<8x64xf32>
    %6 = arith.maximumf %2, %5 : vector<8x64xf32>
    %c0_7 = arith.constant 0 : index
    %c0_8 = arith.constant 0 : index
    %7 = vector.load %arg5[%c0_7, %c0_8] : memref<1x64xf32, #tpu.memory_space<vmem>>, vector<1x64xf32>
    %8 = vector.broadcast %7 : vector<1x64xf32> to vector<8x64xf32>
    %9 = arith.mulf %6, %8 : vector<8x64xf32>
    %c0_9 = arith.constant 0 : index
    %c0_10 = arith.constant 0 : index
    %10 = vector.load %arg6[%c0_9, %c0_10] : memref<1x64xf32, #tpu.memory_space<vmem>>, vector<1x64xf32>
    %11 = vector.broadcast %10 : vector<1x64xf32> to vector<8x64xf32>
    %12 = arith.addf %9, %11 : vector<8x64xf32>
    %cst = arith.constant 0.000000e+00 : f32
    %13 = vector.broadcast %cst : f32 to vector<8x64xf32>
    %14 = arith.maximumf %12, %13 : vector<8x64xf32>
    %c0_11 = arith.constant 0 : index
    %c0_12 = arith.constant 0 : index
    %15 = vector.load %arg7[%c0_11, %c0_12] : memref<8x64xf32, #tpu.memory_space<vmem>>, vector<8x64xf32>
    tpu.vector_store %arg7[%c0_11, %c0_12], %14 {strides = array<i32>} : memref<8x64xf32, #tpu.memory_space<vmem>>, vector<8x64xf32>,
    return
  }
  func.func @transform_0(%arg0: i32) -> (i32, i32) {
    %c0_i32 = arith.constant 0 : i32
    %c0_i32_0 = arith.constant 0 : i32
    return %arg0, %c0_i32 : i32, i32
  }
  func.func @transform_1(%arg0: i32) -> (i32, i32) {
    %c0_i32 = arith.constant 0 : i32
    %c0_i32_0 = arith.constant 0 : i32
    return %arg0, %c0_i32 : i32, i32
  }
  func.func @transform_2(%arg0: i32) -> (i32, i32) {
    %c0_i32 = arith.constant 0 : i32
    %c0_i32_0 = arith.constant 0 : i32
    return %arg0, %c0_i32 : i32, i32
  }
  func.func @transform_3(%arg0: i32) -> (i32, i32) {
    %c0_i32 = arith.constant 0 : i32
    %c0_i32_0 = arith.constant 0 : i32
    return %arg0, %c0_i32 : i32, i32
  }
  func.func @transform_4(%arg0: i32) -> (i32, i32) {
    %c0_i32 = arith.constant 0 : i32
    %c0_i32_0 = arith.constant 0 : i32
    %c0_i32_1 = arith.constant 0 : i32
    return %c0_i32, %c0_i32_0 : i32, i32
  }
  func.func @transform_5(%arg0: i32) -> (i32, i32) {
    %c0_i32 = arith.constant 0 : i32
    %c0_i32_0 = arith.constant 0 : i32
    %c0_i32_1 = arith.constant 0 : i32
    return %c0_i32, %c0_i32_0 : i32, i32
  }
  func.func @transform_6(%arg0: i32) -> (i32, i32) {
    %c0_i32 = arith.constant 0 : i32
    %c0_i32_0 = arith.constant 0 : i32
    return %arg0, %c0_i32 : i32, i32
  }
}

module attributes {stable_mosaic.version = 11 : i64} {
  func.func @_mm_kernel(%arg0: i32, %arg1: memref<8x576xbf16, #tpu.memory_space<vmem>>, %arg2: memref<576x64xbf16, #tpu.memory_space<vmem>>, %arg3: memref<1x64xf32, #tpu.memory_space<vmem>>, %arg4: memref<8x64xf32, #tpu.memory_space<vmem>>) attributes {dimension_semantics = [#tpu.dimension_semantics<parallel>], iteration_bounds = array<i64: 1>, scalar_prefetch = 0 : i64, scratch_operands = 0 : i64, tpu.core_type = #tpu.core_type<tc>, window_params = [{transform_indices = @transform_0, window_bounds = array<i64: 8, 576>}, {pipeline_mode = #tpu.pipeline_mode<synchronous>, transform_indices = @transform_1, window_bounds = array<i64: 576, 64>}, {pipeline_mode = #tpu.pipeline_mode<synchronous>, transform_indices = @transform_2, window_bounds = array<i64: 1, 64>}, {transform_indices = @transform_3, window_bounds = array<i64: 8, 64>}]} {
    %c0 = arith.constant 0 : index
    %c0_0 = arith.constant 0 : index
    %0 = vector.load %arg1[%c0, %c0_0] : memref<8x576xbf16, #tpu.memory_space<vmem>>, vector<8x576xbf16>
    %c0_1 = arith.constant 0 : index
    %c0_2 = arith.constant 0 : index
    %1 = vector.load %arg2[%c0_1, %c0_2] : memref<576x64xbf16, #tpu.memory_space<vmem>>, vector<576x64xbf16>
    %cst = arith.constant dense<0.000000e+00> : vector<8x64xf32>
    %2 = tpu.matmul %0, %1, %cst {dimension_numbers = #tpu.dot_dimension_numbers<[1], [0], [0], [1], [0, 0, 1, 1], [], []>} : vector<8x576xbf16>, vector<576x64xbf16>, vector<8x64xf32> -> vector<8x64xf32>
    %c0_3 = arith.constant 0 : index
    %c0_4 = arith.constant 0 : index
    %3 = vector.load %arg3[%c0_3, %c0_4] : memref<1x64xf32, #tpu.memory_space<vmem>>, vector<1x64xf32>
    %4 = vector.broadcast %3 : vector<1x64xf32> to vector<8x64xf32>
    %5 = arith.addf %2, %4 : vector<8x64xf32>
    %cst_5 = arith.constant 0.000000e+00 : f32
    %6 = vector.broadcast %cst_5 : f32 to vector<8x64xf32>
    %7 = arith.maximumf %5, %6 : vector<8x64xf32>
    %c0_6 = arith.constant 0 : index
    %c0_7 = arith.constant 0 : index
    %8 = vector.load %arg4[%c0_6, %c0_7] : memref<8x64xf32, #tpu.memory_space<vmem>>, vector<8x64xf32>
    tpu.vector_store %arg4[%c0_6, %c0_7], %7 {strides = array<i32>} : memref<8x64xf32, #tpu.memory_space<vmem>>, vector<8x64xf32>,
    return
  }
  func.func @transform_0(%arg0: i32) -> (i32, i32) {
    %c0_i32 = arith.constant 0 : i32
    %c0_i32_0 = arith.constant 0 : i32
    return %arg0, %c0_i32 : i32, i32
  }
  func.func @transform_1(%arg0: i32) -> (i32, i32) {
    %c0_i32 = arith.constant 0 : i32
    %c0_i32_0 = arith.constant 0 : i32
    %c0_i32_1 = arith.constant 0 : i32
    return %c0_i32, %c0_i32_0 : i32, i32
  }
  func.func @transform_2(%arg0: i32) -> (i32, i32) {
    %c0_i32 = arith.constant 0 : i32
    %c0_i32_0 = arith.constant 0 : i32
    %c0_i32_1 = arith.constant 0 : i32
    return %c0_i32, %c0_i32_0 : i32, i32
  }
  func.func @transform_3(%arg0: i32) -> (i32, i32) {
    %c0_i32 = arith.constant 0 : i32
    %c0_i32_0 = arith.constant 0 : i32
    return %arg0, %c0_i32 : i32, i32
  }
}

module attributes {stable_mosaic.version = 11 : i64} {
  func.func @_mm_kernel(%arg0: i32, %arg1: memref<8x384xbf16, #tpu.memory_space<vmem>>, %arg2: memref<384x128xbf16, #tpu.memory_space<vmem>>, %arg3: memref<1x128xf32, #tpu.memory_space<vmem>>, %arg4: memref<8x128xf32, #tpu.memory_space<vmem>>) attributes {dimension_semantics = [#tpu.dimension_semantics<parallel>], iteration_bounds = array<i64: 1>, scalar_prefetch = 0 : i64, scratch_operands = 0 : i64, tpu.core_type = #tpu.core_type<tc>, window_params = [{transform_indices = @transform_0, window_bounds = array<i64: 8, 384>}, {pipeline_mode = #tpu.pipeline_mode<synchronous>, transform_indices = @transform_1, window_bounds = array<i64: 384, 128>}, {pipeline_mode = #tpu.pipeline_mode<synchronous>, transform_indices = @transform_2, window_bounds = array<i64: 1, 128>}, {transform_indices = @transform_3, window_bounds = array<i64: 8, 128>}]} {
    %c0 = arith.constant 0 : index
    %c0_0 = arith.constant 0 : index
    %0 = vector.load %arg1[%c0, %c0_0] : memref<8x384xbf16, #tpu.memory_space<vmem>>, vector<8x384xbf16>
    %c0_1 = arith.constant 0 : index
    %c0_2 = arith.constant 0 : index
    %1 = vector.load %arg2[%c0_1, %c0_2] : memref<384x128xbf16, #tpu.memory_space<vmem>>, vector<384x128xbf16>
    %cst = arith.constant dense<0.000000e+00> : vector<8x128xf32>
    %2 = tpu.matmul %0, %1, %cst {dimension_numbers = #tpu.dot_dimension_numbers<[1], [0], [0], [1], [0, 0, 1, 1], [], []>} : vector<8x384xbf16>, vector<384x128xbf16>, vector<8x128xf32> -> vector<8x128xf32>
    %c0_3 = arith.constant 0 : index
    %c0_4 = arith.constant 0 : index
    %3 = vector.load %arg3[%c0_3, %c0_4] : memref<1x128xf32, #tpu.memory_space<vmem>>, vector<1x128xf32>
    %4 = vector.broadcast %3 : vector<1x128xf32> to vector<8x128xf32>
    %5 = arith.addf %2, %4 : vector<8x128xf32>
    %cst_5 = arith.constant 0.000000e+00 : f32
    %6 = vector.broadcast %cst_5 : f32 to vector<8x128xf32>
    %7 = arith.maximumf %5, %6 : vector<8x128xf32>
    %c0_6 = arith.constant 0 : index
    %c0_7 = arith.constant 0 : index
    %8 = vector.load %arg4[%c0_6, %c0_7] : memref<8x128xf32, #tpu.memory_space<vmem>>, vector<8x128xf32>
    tpu.vector_store %arg4[%c0_6, %c0_7], %7 {strides = array<i32>} : memref<8x128xf32, #tpu.memory_space<vmem>>, vector<8x128xf32>,
    return
  }
  func.func @transform_0(%arg0: i32) -> (i32, i32) {
    %c0_i32 = arith.constant 0 : i32
    %c0_i32_0 = arith.constant 0 : i32
    return %arg0, %c0_i32 : i32, i32
  }
  func.func @transform_1(%arg0: i32) -> (i32, i32) {
    %c0_i32 = arith.constant 0 : i32
    %c0_i32_0 = arith.constant 0 : i32
    %c0_i32_1 = arith.constant 0 : i32
    return %c0_i32, %c0_i32_0 : i32, i32
  }
  func.func @transform_2(%arg0: i32) -> (i32, i32) {
    %c0_i32 = arith.constant 0 : i32
    %c0_i32_0 = arith.constant 0 : i32
    %c0_i32_1 = arith.constant 0 : i32
    return %c0_i32, %c0_i32_0 : i32, i32
  }
  func.func @transform_3(%arg0: i32) -> (i32, i32) {
    %c0_i32 = arith.constant 0 : i32
    %c0_i32_0 = arith.constant 0 : i32
    return %arg0, %c0_i32 : i32, i32
  }
}

module attributes {stable_mosaic.version = 11 : i64} {
  func.func @_mm_res_kernel(%arg0: i32, %arg1: memref<8x384xbf16, #tpu.memory_space<vmem>>, %arg2: memref<384x128xbf16, #tpu.memory_space<vmem>>, %arg3: memref<1x128xf32, #tpu.memory_space<vmem>>, %arg4: memref<8x128xf32, #tpu.memory_space<vmem>>, %arg5: memref<8x128xf32, #tpu.memory_space<vmem>>) attributes {dimension_semantics = [#tpu.dimension_semantics<parallel>], iteration_bounds = array<i64: 1>, scalar_prefetch = 0 : i64, scratch_operands = 0 : i64, tpu.core_type = #tpu.core_type<tc>, window_params = [{transform_indices = @transform_0, window_bounds = array<i64: 8, 384>}, {pipeline_mode = #tpu.pipeline_mode<synchronous>, transform_indices = @transform_1, window_bounds = array<i64: 384, 128>}, {pipeline_mode = #tpu.pipeline_mode<synchronous>, transform_indices = @transform_2, window_bounds = array<i64: 1, 128>}, {transform_indices = @transform_3, window_bounds = array<i64: 8, 128>}, {transform_indices = @transform_4, window_bounds = array<i64: 8, 128>}]} {
    %c0 = arith.constant 0 : index
    %c0_0 = arith.constant 0 : index
    %0 = vector.load %arg1[%c0, %c0_0] : memref<8x384xbf16, #tpu.memory_space<vmem>>, vector<8x384xbf16>
    %c0_1 = arith.constant 0 : index
    %c0_2 = arith.constant 0 : index
    %1 = vector.load %arg2[%c0_1, %c0_2] : memref<384x128xbf16, #tpu.memory_space<vmem>>, vector<384x128xbf16>
    %cst = arith.constant dense<0.000000e+00> : vector<8x128xf32>
    %2 = tpu.matmul %0, %1, %cst {dimension_numbers = #tpu.dot_dimension_numbers<[1], [0], [0], [1], [0, 0, 1, 1], [], []>} : vector<8x384xbf16>, vector<384x128xbf16>, vector<8x128xf32> -> vector<8x128xf32>
    %c0_3 = arith.constant 0 : index
    %c0_4 = arith.constant 0 : index
    %3 = vector.load %arg3[%c0_3, %c0_4] : memref<1x128xf32, #tpu.memory_space<vmem>>, vector<1x128xf32>
    %4 = vector.broadcast %3 : vector<1x128xf32> to vector<8x128xf32>
    %5 = arith.addf %2, %4 : vector<8x128xf32>
    %c0_5 = arith.constant 0 : index
    %c0_6 = arith.constant 0 : index
    %6 = vector.load %arg4[%c0_5, %c0_6] : memref<8x128xf32, #tpu.memory_space<vmem>>, vector<8x128xf32>
    %7 = arith.addf %5, %6 : vector<8x128xf32>
    %cst_7 = arith.constant 0.000000e+00 : f32
    %8 = vector.broadcast %cst_7 : f32 to vector<8x128xf32>
    %9 = arith.maximumf %7, %8 : vector<8x128xf32>
    %c0_8 = arith.constant 0 : index
    %c0_9 = arith.constant 0 : index
    %10 = vector.load %arg5[%c0_8, %c0_9] : memref<8x128xf32, #tpu.memory_space<vmem>>, vector<8x128xf32>
    tpu.vector_store %arg5[%c0_8, %c0_9], %9 {strides = array<i32>} : memref<8x128xf32, #tpu.memory_space<vmem>>, vector<8x128xf32>,
    return
  }
  func.func @transform_0(%arg0: i32) -> (i32, i32) {
    %c0_i32 = arith.constant 0 : i32
    %c0_i32_0 = arith.constant 0 : i32
    return %arg0, %c0_i32 : i32, i32
  }
  func.func @transform_1(%arg0: i32) -> (i32, i32) {
    %c0_i32 = arith.constant 0 : i32
    %c0_i32_0 = arith.constant 0 : i32
    %c0_i32_1 = arith.constant 0 : i32
    return %c0_i32, %c0_i32_0 : i32, i32
  }
  func.func @transform_2(%arg0: i32) -> (i32, i32) {
    %c0_i32 = arith.constant 0 : i32
    %c0_i32_0 = arith.constant 0 : i32
    %c0_i32_1 = arith.constant 0 : i32
    return %c0_i32, %c0_i32_0 : i32, i32
  }
  func.func @transform_3(%arg0: i32) -> (i32, i32) {
    %c0_i32 = arith.constant 0 : i32
    %c0_i32_0 = arith.constant 0 : i32
    return %arg0, %c0_i32 : i32, i32
  }
  func.func @transform_4(%arg0: i32) -> (i32, i32) {
    %c0_i32 = arith.constant 0 : i32
    %c0_i32_0 = arith.constant 0 : i32
    return %arg0, %c0_i32 : i32, i32
  }
}

module attributes {stable_mosaic.version = 11 : i64} {
  func.func @_mm_kernel(%arg0: i32, %arg1: memref<8x128xbf16, #tpu.memory_space<vmem>>, %arg2: memref<128x64xbf16, #tpu.memory_space<vmem>>, %arg3: memref<1x64xf32, #tpu.memory_space<vmem>>, %arg4: memref<8x64xf32, #tpu.memory_space<vmem>>) attributes {dimension_semantics = [#tpu.dimension_semantics<parallel>], iteration_bounds = array<i64: 1>, scalar_prefetch = 0 : i64, scratch_operands = 0 : i64, tpu.core_type = #tpu.core_type<tc>, window_params = [{transform_indices = @transform_0, window_bounds = array<i64: 8, 128>}, {pipeline_mode = #tpu.pipeline_mode<synchronous>, transform_indices = @transform_1, window_bounds = array<i64: 128, 64>}, {pipeline_mode = #tpu.pipeline_mode<synchronous>, transform_indices = @transform_2, window_bounds = array<i64: 1, 64>}, {transform_indices = @transform_3, window_bounds = array<i64: 8, 64>}]} {
    %c0 = arith.constant 0 : index
    %c0_0 = arith.constant 0 : index
    %0 = vector.load %arg1[%c0, %c0_0] : memref<8x128xbf16, #tpu.memory_space<vmem>>, vector<8x128xbf16>
    %c0_1 = arith.constant 0 : index
    %c0_2 = arith.constant 0 : index
    %1 = vector.load %arg2[%c0_1, %c0_2] : memref<128x64xbf16, #tpu.memory_space<vmem>>, vector<128x64xbf16>
    %cst = arith.constant dense<0.000000e+00> : vector<8x64xf32>
    %2 = tpu.matmul %0, %1, %cst {dimension_numbers = #tpu.dot_dimension_numbers<[1], [0], [0], [1], [0, 0, 1, 1], [], []>} : vector<8x128xbf16>, vector<128x64xbf16>, vector<8x64xf32> -> vector<8x64xf32>
    %c0_3 = arith.constant 0 : index
    %c0_4 = arith.constant 0 : index
    %3 = vector.load %arg3[%c0_3, %c0_4] : memref<1x64xf32, #tpu.memory_space<vmem>>, vector<1x64xf32>
    %4 = vector.broadcast %3 : vector<1x64xf32> to vector<8x64xf32>
    %5 = arith.addf %2, %4 : vector<8x64xf32>
    %cst_5 = arith.constant 0.000000e+00 : f32
    %6 = vector.broadcast %cst_5 : f32 to vector<8x64xf32>
    %7 = arith.maximumf %5, %6 : vector<8x64xf32>
    %c0_6 = arith.constant 0 : index
    %c0_7 = arith.constant 0 : index
    %8 = vector.load %arg4[%c0_6, %c0_7] : memref<8x64xf32, #tpu.memory_space<vmem>>, vector<8x64xf32>
    tpu.vector_store %arg4[%c0_6, %c0_7], %7 {strides = array<i32>} : memref<8x64xf32, #tpu.memory_space<vmem>>, vector<8x64xf32>,
    return
  }
  func.func @transform_0(%arg0: i32) -> (i32, i32) {
    %c0_i32 = arith.constant 0 : i32
    %c0_i32_0 = arith.constant 0 : i32
    return %arg0, %c0_i32 : i32, i32
  }
  func.func @transform_1(%arg0: i32) -> (i32, i32) {
    %c0_i32 = arith.constant 0 : i32
    %c0_i32_0 = arith.constant 0 : i32
    %c0_i32_1 = arith.constant 0 : i32
    return %c0_i32, %c0_i32_0 : i32, i32
  }
  func.func @transform_2(%arg0: i32) -> (i32, i32) {
    %c0_i32 = arith.constant 0 : i32
    %c0_i32_0 = arith.constant 0 : i32
    %c0_i32_1 = arith.constant 0 : i32
    return %c0_i32, %c0_i32_0 : i32, i32
  }
  func.func @transform_3(%arg0: i32) -> (i32, i32) {
    %c0_i32 = arith.constant 0 : i32
    %c0_i32_0 = arith.constant 0 : i32
    return %arg0, %c0_i32 : i32, i32
  }
}

module attributes {stable_mosaic.version = 11 : i64} {
  func.func @_mm_kernel(%arg0: i32, %arg1: memref<8x512xbf16, #tpu.memory_space<vmem>>, %arg2: memref<512x64xbf16, #tpu.memory_space<vmem>>, %arg3: memref<1x64xf32, #tpu.memory_space<vmem>>, %arg4: memref<8x64xf32, #tpu.memory_space<vmem>>) attributes {dimension_semantics = [#tpu.dimension_semantics<parallel>], iteration_bounds = array<i64: 1>, scalar_prefetch = 0 : i64, scratch_operands = 0 : i64, tpu.core_type = #tpu.core_type<tc>, window_params = [{transform_indices = @transform_0, window_bounds = array<i64: 8, 512>}, {pipeline_mode = #tpu.pipeline_mode<synchronous>, transform_indices = @transform_1, window_bounds = array<i64: 512, 64>}, {pipeline_mode = #tpu.pipeline_mode<synchronous>, transform_indices = @transform_2, window_bounds = array<i64: 1, 64>}, {transform_indices = @transform_3, window_bounds = array<i64: 8, 64>}]} {
    %c0 = arith.constant 0 : index
    %c0_0 = arith.constant 0 : index
    %0 = vector.load %arg1[%c0, %c0_0] : memref<8x512xbf16, #tpu.memory_space<vmem>>, vector<8x512xbf16>
    %c0_1 = arith.constant 0 : index
    %c0_2 = arith.constant 0 : index
    %1 = vector.load %arg2[%c0_1, %c0_2] : memref<512x64xbf16, #tpu.memory_space<vmem>>, vector<512x64xbf16>
    %cst = arith.constant dense<0.000000e+00> : vector<8x64xf32>
    %2 = tpu.matmul %0, %1, %cst {dimension_numbers = #tpu.dot_dimension_numbers<[1], [0], [0], [1], [0, 0, 1, 1], [], []>} : vector<8x512xbf16>, vector<512x64xbf16>, vector<8x64xf32> -> vector<8x64xf32>
    %c0_3 = arith.constant 0 : index
    %c0_4 = arith.constant 0 : index
    %3 = vector.load %arg3[%c0_3, %c0_4] : memref<1x64xf32, #tpu.memory_space<vmem>>, vector<1x64xf32>
    %4 = vector.broadcast %3 : vector<1x64xf32> to vector<8x64xf32>
    %5 = arith.addf %2, %4 : vector<8x64xf32>
    %cst_5 = arith.constant 0.000000e+00 : f32
    %6 = vector.broadcast %cst_5 : f32 to vector<8x64xf32>
    %7 = arith.maximumf %5, %6 : vector<8x64xf32>
    %c0_6 = arith.constant 0 : index
    %c0_7 = arith.constant 0 : index
    %8 = vector.load %arg4[%c0_6, %c0_7] : memref<8x64xf32, #tpu.memory_space<vmem>>, vector<8x64xf32>
    tpu.vector_store %arg4[%c0_6, %c0_7], %7 {strides = array<i32>} : memref<8x64xf32, #tpu.memory_space<vmem>>, vector<8x64xf32>,
    return
  }
  func.func @transform_0(%arg0: i32) -> (i32, i32) {
    %c0_i32 = arith.constant 0 : i32
    %c0_i32_0 = arith.constant 0 : i32
    return %arg0, %c0_i32 : i32, i32
  }
  func.func @transform_1(%arg0: i32) -> (i32, i32) {
    %c0_i32 = arith.constant 0 : i32
    %c0_i32_0 = arith.constant 0 : i32
    %c0_i32_1 = arith.constant 0 : i32
    return %c0_i32, %c0_i32_0 : i32, i32
  }
  func.func @transform_2(%arg0: i32) -> (i32, i32) {
    %c0_i32 = arith.constant 0 : i32
    %c0_i32_0 = arith.constant 0 : i32
    %c0_i32_1 = arith.constant 0 : i32
    return %c0_i32, %c0_i32_0 : i32, i32
  }
  func.func @transform_3(%arg0: i32) -> (i32, i32) {
    %c0_i32 = arith.constant 0 : i32
    %c0_i32_0 = arith.constant 0 : i32
    return %arg0, %c0_i32 : i32, i32
  }
}

module attributes {stable_mosaic.version = 11 : i64} {
  func.func @_mm_kernel(%arg0: i32, %arg1: memref<8x256xbf16, #tpu.memory_space<vmem>>, %arg2: memref<256x64xbf16, #tpu.memory_space<vmem>>, %arg3: memref<1x64xf32, #tpu.memory_space<vmem>>, %arg4: memref<8x64xf32, #tpu.memory_space<vmem>>) attributes {dimension_semantics = [#tpu.dimension_semantics<parallel>], iteration_bounds = array<i64: 1>, scalar_prefetch = 0 : i64, scratch_operands = 0 : i64, tpu.core_type = #tpu.core_type<tc>, window_params = [{transform_indices = @transform_0, window_bounds = array<i64: 8, 256>}, {pipeline_mode = #tpu.pipeline_mode<synchronous>, transform_indices = @transform_1, window_bounds = array<i64: 256, 64>}, {pipeline_mode = #tpu.pipeline_mode<synchronous>, transform_indices = @transform_2, window_bounds = array<i64: 1, 64>}, {transform_indices = @transform_3, window_bounds = array<i64: 8, 64>}]} {
    %c0 = arith.constant 0 : index
    %c0_0 = arith.constant 0 : index
    %0 = vector.load %arg1[%c0, %c0_0] : memref<8x256xbf16, #tpu.memory_space<vmem>>, vector<8x256xbf16>
    %c0_1 = arith.constant 0 : index
    %c0_2 = arith.constant 0 : index
    %1 = vector.load %arg2[%c0_1, %c0_2] : memref<256x64xbf16, #tpu.memory_space<vmem>>, vector<256x64xbf16>
    %cst = arith.constant dense<0.000000e+00> : vector<8x64xf32>
    %2 = tpu.matmul %0, %1, %cst {dimension_numbers = #tpu.dot_dimension_numbers<[1], [0], [0], [1], [0, 0, 1, 1], [], []>} : vector<8x256xbf16>, vector<256x64xbf16>, vector<8x64xf32> -> vector<8x64xf32>
    %c0_3 = arith.constant 0 : index
    %c0_4 = arith.constant 0 : index
    %3 = vector.load %arg3[%c0_3, %c0_4] : memref<1x64xf32, #tpu.memory_space<vmem>>, vector<1x64xf32>
    %4 = vector.broadcast %3 : vector<1x64xf32> to vector<8x64xf32>
    %5 = arith.addf %2, %4 : vector<8x64xf32>
    %cst_5 = arith.constant 0.000000e+00 : f32
    %6 = vector.broadcast %cst_5 : f32 to vector<8x64xf32>
    %7 = arith.maximumf %5, %6 : vector<8x64xf32>
    %c0_6 = arith.constant 0 : index
    %c0_7 = arith.constant 0 : index
    %8 = vector.load %arg4[%c0_6, %c0_7] : memref<8x64xf32, #tpu.memory_space<vmem>>, vector<8x64xf32>
    tpu.vector_store %arg4[%c0_6, %c0_7], %7 {strides = array<i32>} : memref<8x64xf32, #tpu.memory_space<vmem>>, vector<8x64xf32>,
    return
  }
  func.func @transform_0(%arg0: i32) -> (i32, i32) {
    %c0_i32 = arith.constant 0 : i32
    %c0_i32_0 = arith.constant 0 : i32
    return %arg0, %c0_i32 : i32, i32
  }
  func.func @transform_1(%arg0: i32) -> (i32, i32) {
    %c0_i32 = arith.constant 0 : i32
    %c0_i32_0 = arith.constant 0 : i32
    %c0_i32_1 = arith.constant 0 : i32
    return %c0_i32, %c0_i32_0 : i32, i32
  }
  func.func @transform_2(%arg0: i32) -> (i32, i32) {
    %c0_i32 = arith.constant 0 : i32
    %c0_i32_0 = arith.constant 0 : i32
    %c0_i32_1 = arith.constant 0 : i32
    return %c0_i32, %c0_i32_0 : i32, i32
  }
  func.func @transform_3(%arg0: i32) -> (i32, i32) {
    %c0_i32 = arith.constant 0 : i32
    %c0_i32_0 = arith.constant 0 : i32
    return %arg0, %c0_i32 : i32, i32
  }
}

module attributes {stable_mosaic.version = 11 : i64} {
  func.func @_mm_kernel(%arg0: i32, %arg1: memref<32x64xbf16, #tpu.memory_space<vmem>>, %arg2: memref<64x16xbf16, #tpu.memory_space<vmem>>, %arg3: memref<1x16xf32, #tpu.memory_space<vmem>>, %arg4: memref<32x16xf32, #tpu.memory_space<vmem>>) attributes {dimension_semantics = [#tpu.dimension_semantics<parallel>], iteration_bounds = array<i64: 1>, scalar_prefetch = 0 : i64, scratch_operands = 0 : i64, tpu.core_type = #tpu.core_type<tc>, window_params = [{transform_indices = @transform_0, window_bounds = array<i64: 32, 64>}, {pipeline_mode = #tpu.pipeline_mode<synchronous>, transform_indices = @transform_1, window_bounds = array<i64: 64, 16>}, {pipeline_mode = #tpu.pipeline_mode<synchronous>, transform_indices = @transform_2, window_bounds = array<i64: 1, 16>}, {transform_indices = @transform_3, window_bounds = array<i64: 32, 16>}]} {
    %c0 = arith.constant 0 : index
    %c0_0 = arith.constant 0 : index
    %0 = vector.load %arg1[%c0, %c0_0] : memref<32x64xbf16, #tpu.memory_space<vmem>>, vector<32x64xbf16>
    %c0_1 = arith.constant 0 : index
    %c0_2 = arith.constant 0 : index
    %1 = vector.load %arg2[%c0_1, %c0_2] : memref<64x16xbf16, #tpu.memory_space<vmem>>, vector<64x16xbf16>
    %cst = arith.constant dense<0.000000e+00> : vector<32x16xf32>
    %2 = tpu.matmul %0, %1, %cst {dimension_numbers = #tpu.dot_dimension_numbers<[1], [0], [0], [1], [0, 0, 1, 1], [], []>} : vector<32x64xbf16>, vector<64x16xbf16>, vector<32x16xf32> -> vector<32x16xf32>
    %c0_3 = arith.constant 0 : index
    %c0_4 = arith.constant 0 : index
    %3 = vector.load %arg3[%c0_3, %c0_4] : memref<1x16xf32, #tpu.memory_space<vmem>>, vector<1x16xf32>
    %4 = vector.broadcast %3 : vector<1x16xf32> to vector<32x16xf32>
    %5 = arith.addf %2, %4 : vector<32x16xf32>
    %cst_5 = arith.constant 0.000000e+00 : f32
    %6 = vector.broadcast %cst_5 : f32 to vector<32x16xf32>
    %7 = arith.maximumf %5, %6 : vector<32x16xf32>
    %c0_6 = arith.constant 0 : index
    %c0_7 = arith.constant 0 : index
    %8 = vector.load %arg4[%c0_6, %c0_7] : memref<32x16xf32, #tpu.memory_space<vmem>>, vector<32x16xf32>
    tpu.vector_store %arg4[%c0_6, %c0_7], %7 {strides = array<i32>} : memref<32x16xf32, #tpu.memory_space<vmem>>, vector<32x16xf32>,
    return
  }
  func.func @transform_0(%arg0: i32) -> (i32, i32) {
    %c0_i32 = arith.constant 0 : i32
    %c0_i32_0 = arith.constant 0 : i32
    return %arg0, %c0_i32 : i32, i32
  }
  func.func @transform_1(%arg0: i32) -> (i32, i32) {
    %c0_i32 = arith.constant 0 : i32
    %c0_i32_0 = arith.constant 0 : i32
    %c0_i32_1 = arith.constant 0 : i32
    return %c0_i32, %c0_i32_0 : i32, i32
  }
  func.func @transform_2(%arg0: i32) -> (i32, i32) {
    %c0_i32 = arith.constant 0 : i32
    %c0_i32_0 = arith.constant 0 : i32
    %c0_i32_1 = arith.constant 0 : i32
    return %c0_i32, %c0_i32_0 : i32, i32
  }
  func.func @transform_3(%arg0: i32) -> (i32, i32) {
    %c0_i32 = arith.constant 0 : i32
    %c0_i32_0 = arith.constant 0 : i32
    return %arg0, %c0_i32 : i32, i32
  }
}

module attributes {stable_mosaic.version = 11 : i64} {
  func.func @_mm_kernel(%arg0: i32, %arg1: memref<32x256xbf16, #tpu.memory_space<vmem>>, %arg2: memref<256x16xbf16, #tpu.memory_space<vmem>>, %arg3: memref<1x16xf32, #tpu.memory_space<vmem>>, %arg4: memref<32x16xf32, #tpu.memory_space<vmem>>) attributes {dimension_semantics = [#tpu.dimension_semantics<parallel>], iteration_bounds = array<i64: 1>, scalar_prefetch = 0 : i64, scratch_operands = 0 : i64, tpu.core_type = #tpu.core_type<tc>, window_params = [{transform_indices = @transform_0, window_bounds = array<i64: 32, 256>}, {pipeline_mode = #tpu.pipeline_mode<synchronous>, transform_indices = @transform_1, window_bounds = array<i64: 256, 16>}, {pipeline_mode = #tpu.pipeline_mode<synchronous>, transform_indices = @transform_2, window_bounds = array<i64: 1, 16>}, {transform_indices = @transform_3, window_bounds = array<i64: 32, 16>}]} {
    %c0 = arith.constant 0 : index
    %c0_0 = arith.constant 0 : index
    %0 = vector.load %arg1[%c0, %c0_0] : memref<32x256xbf16, #tpu.memory_space<vmem>>, vector<32x256xbf16>
    %c0_1 = arith.constant 0 : index
    %c0_2 = arith.constant 0 : index
    %1 = vector.load %arg2[%c0_1, %c0_2] : memref<256x16xbf16, #tpu.memory_space<vmem>>, vector<256x16xbf16>
    %cst = arith.constant dense<0.000000e+00> : vector<32x16xf32>
    %2 = tpu.matmul %0, %1, %cst {dimension_numbers = #tpu.dot_dimension_numbers<[1], [0], [0], [1], [0, 0, 1, 1], [], []>} : vector<32x256xbf16>, vector<256x16xbf16>, vector<32x16xf32> -> vector<32x16xf32>
    %c0_3 = arith.constant 0 : index
    %c0_4 = arith.constant 0 : index
    %3 = vector.load %arg3[%c0_3, %c0_4] : memref<1x16xf32, #tpu.memory_space<vmem>>, vector<1x16xf32>
    %4 = vector.broadcast %3 : vector<1x16xf32> to vector<32x16xf32>
    %5 = arith.addf %2, %4 : vector<32x16xf32>
    %cst_5 = arith.constant 0.000000e+00 : f32
    %6 = vector.broadcast %cst_5 : f32 to vector<32x16xf32>
    %7 = arith.maximumf %5, %6 : vector<32x16xf32>
    %c0_6 = arith.constant 0 : index
    %c0_7 = arith.constant 0 : index
    %8 = vector.load %arg4[%c0_6, %c0_7] : memref<32x16xf32, #tpu.memory_space<vmem>>, vector<32x16xf32>
    tpu.vector_store %arg4[%c0_6, %c0_7], %7 {strides = array<i32>} : memref<32x16xf32, #tpu.memory_space<vmem>>, vector<32x16xf32>,
    return
  }
  func.func @transform_0(%arg0: i32) -> (i32, i32) {
    %c0_i32 = arith.constant 0 : i32
    %c0_i32_0 = arith.constant 0 : i32
    return %arg0, %c0_i32 : i32, i32
  }
  func.func @transform_1(%arg0: i32) -> (i32, i32) {
    %c0_i32 = arith.constant 0 : i32
    %c0_i32_0 = arith.constant 0 : i32
    %c0_i32_1 = arith.constant 0 : i32
    return %c0_i32, %c0_i32_0 : i32, i32
  }
  func.func @transform_2(%arg0: i32) -> (i32, i32) {
    %c0_i32 = arith.constant 0 : i32
    %c0_i32_0 = arith.constant 0 : i32
    %c0_i32_1 = arith.constant 0 : i32
    return %c0_i32, %c0_i32_0 : i32, i32
  }
  func.func @transform_3(%arg0: i32) -> (i32, i32) {
    %c0_i32 = arith.constant 0 : i32
    %c0_i32_0 = arith.constant 0 : i32
    return %arg0, %c0_i32 : i32, i32
  }
}

module attributes {stable_mosaic.version = 11 : i64} {
  func.func @_mm_kernel(%arg0: i32, %arg1: memref<32x128xbf16, #tpu.memory_space<vmem>>, %arg2: memref<128x16xbf16, #tpu.memory_space<vmem>>, %arg3: memref<1x16xf32, #tpu.memory_space<vmem>>, %arg4: memref<32x16xf32, #tpu.memory_space<vmem>>) attributes {dimension_semantics = [#tpu.dimension_semantics<parallel>], iteration_bounds = array<i64: 1>, scalar_prefetch = 0 : i64, scratch_operands = 0 : i64, tpu.core_type = #tpu.core_type<tc>, window_params = [{transform_indices = @transform_0, window_bounds = array<i64: 32, 128>}, {pipeline_mode = #tpu.pipeline_mode<synchronous>, transform_indices = @transform_1, window_bounds = array<i64: 128, 16>}, {pipeline_mode = #tpu.pipeline_mode<synchronous>, transform_indices = @transform_2, window_bounds = array<i64: 1, 16>}, {transform_indices = @transform_3, window_bounds = array<i64: 32, 16>}]} {
    %c0 = arith.constant 0 : index
    %c0_0 = arith.constant 0 : index
    %0 = vector.load %arg1[%c0, %c0_0] : memref<32x128xbf16, #tpu.memory_space<vmem>>, vector<32x128xbf16>
    %c0_1 = arith.constant 0 : index
    %c0_2 = arith.constant 0 : index
    %1 = vector.load %arg2[%c0_1, %c0_2] : memref<128x16xbf16, #tpu.memory_space<vmem>>, vector<128x16xbf16>
    %cst = arith.constant dense<0.000000e+00> : vector<32x16xf32>
    %2 = tpu.matmul %0, %1, %cst {dimension_numbers = #tpu.dot_dimension_numbers<[1], [0], [0], [1], [0, 0, 1, 1], [], []>} : vector<32x128xbf16>, vector<128x16xbf16>, vector<32x16xf32> -> vector<32x16xf32>
    %c0_3 = arith.constant 0 : index
    %c0_4 = arith.constant 0 : index
    %3 = vector.load %arg3[%c0_3, %c0_4] : memref<1x16xf32, #tpu.memory_space<vmem>>, vector<1x16xf32>
    %4 = vector.broadcast %3 : vector<1x16xf32> to vector<32x16xf32>
    %5 = arith.addf %2, %4 : vector<32x16xf32>
    %cst_5 = arith.constant 0.000000e+00 : f32
    %6 = vector.broadcast %cst_5 : f32 to vector<32x16xf32>
    %7 = arith.maximumf %5, %6 : vector<32x16xf32>
    %c0_6 = arith.constant 0 : index
    %c0_7 = arith.constant 0 : index
    %8 = vector.load %arg4[%c0_6, %c0_7] : memref<32x16xf32, #tpu.memory_space<vmem>>, vector<32x16xf32>
    tpu.vector_store %arg4[%c0_6, %c0_7], %7 {strides = array<i32>} : memref<32x16xf32, #tpu.memory_space<vmem>>, vector<32x16xf32>,
    return
  }
  func.func @transform_0(%arg0: i32) -> (i32, i32) {
    %c0_i32 = arith.constant 0 : i32
    %c0_i32_0 = arith.constant 0 : i32
    return %arg0, %c0_i32 : i32, i32
  }
  func.func @transform_1(%arg0: i32) -> (i32, i32) {
    %c0_i32 = arith.constant 0 : i32
    %c0_i32_0 = arith.constant 0 : i32
    %c0_i32_1 = arith.constant 0 : i32
    return %c0_i32, %c0_i32_0 : i32, i32
  }
  func.func @transform_2(%arg0: i32) -> (i32, i32) {
    %c0_i32 = arith.constant 0 : i32
    %c0_i32_0 = arith.constant 0 : i32
    %c0_i32_1 = arith.constant 0 : i32
    return %c0_i32, %c0_i32_0 : i32, i32
  }
  func.func @transform_3(%arg0: i32) -> (i32, i32) {
    %c0_i32 = arith.constant 0 : i32
    %c0_i32_0 = arith.constant 0 : i32
    return %arg0, %c0_i32 : i32, i32
  }
}

module attributes {stable_mosaic.version = 11 : i64} {
  func.func @_mm_kernel(%arg0: i32, %arg1: memref<128x48xbf16, #tpu.memory_space<vmem>>, %arg2: memref<48x16xbf16, #tpu.memory_space<vmem>>, %arg3: memref<1x16xf32, #tpu.memory_space<vmem>>, %arg4: memref<128x16xf32, #tpu.memory_space<vmem>>) attributes {dimension_semantics = [#tpu.dimension_semantics<parallel>], iteration_bounds = array<i64: 1>, scalar_prefetch = 0 : i64, scratch_operands = 0 : i64, tpu.core_type = #tpu.core_type<tc>, window_params = [{transform_indices = @transform_0, window_bounds = array<i64: 128, 48>}, {pipeline_mode = #tpu.pipeline_mode<synchronous>, transform_indices = @transform_1, window_bounds = array<i64: 48, 16>}, {pipeline_mode = #tpu.pipeline_mode<synchronous>, transform_indices = @transform_2, window_bounds = array<i64: 1, 16>}, {transform_indices = @transform_3, window_bounds = array<i64: 128, 16>}]} {
    %c0 = arith.constant 0 : index
    %c0_0 = arith.constant 0 : index
    %0 = vector.load %arg1[%c0, %c0_0] : memref<128x48xbf16, #tpu.memory_space<vmem>>, vector<128x48xbf16>
    %c0_1 = arith.constant 0 : index
    %c0_2 = arith.constant 0 : index
    %1 = vector.load %arg2[%c0_1, %c0_2] : memref<48x16xbf16, #tpu.memory_space<vmem>>, vector<48x16xbf16>
    %cst = arith.constant dense<0.000000e+00> : vector<128x16xf32>
    %2 = tpu.matmul %0, %1, %cst {dimension_numbers = #tpu.dot_dimension_numbers<[1], [0], [0], [1], [0, 0, 1, 1], [], []>} : vector<128x48xbf16>, vector<48x16xbf16>, vector<128x16xf32> -> vector<128x16xf32>
    %c0_3 = arith.constant 0 : index
    %c0_4 = arith.constant 0 : index
    %3 = vector.load %arg3[%c0_3, %c0_4] : memref<1x16xf32, #tpu.memory_space<vmem>>, vector<1x16xf32>
    %4 = vector.broadcast %3 : vector<1x16xf32> to vector<128x16xf32>
    %5 = arith.addf %2, %4 : vector<128x16xf32>
    %cst_5 = arith.constant 0.000000e+00 : f32
    %6 = vector.broadcast %cst_5 : f32 to vector<128x16xf32>
    %7 = arith.maximumf %5, %6 : vector<128x16xf32>
    %c0_6 = arith.constant 0 : index
    %c0_7 = arith.constant 0 : index
    %8 = vector.load %arg4[%c0_6, %c0_7] : memref<128x16xf32, #tpu.memory_space<vmem>>, vector<128x16xf32>
    tpu.vector_store %arg4[%c0_6, %c0_7], %7 {strides = array<i32>} : memref<128x16xf32, #tpu.memory_space<vmem>>, vector<128x16xf32>,
    return
  }
  func.func @transform_0(%arg0: i32) -> (i32, i32) {
    %c0_i32 = arith.constant 0 : i32
    %c0_i32_0 = arith.constant 0 : i32
    return %arg0, %c0_i32 : i32, i32
  }
  func.func @transform_1(%arg0: i32) -> (i32, i32) {
    %c0_i32 = arith.constant 0 : i32
    %c0_i32_0 = arith.constant 0 : i32
    %c0_i32_1 = arith.constant 0 : i32
    return %c0_i32, %c0_i32_0 : i32, i32
  }
  func.func @transform_2(%arg0: i32) -> (i32, i32) {
    %c0_i32 = arith.constant 0 : i32
    %c0_i32_0 = arith.constant 0 : i32
    %c0_i32_1 = arith.constant 0 : i32
    return %c0_i32, %c0_i32_0 : i32, i32
  }
  func.func @transform_3(%arg0: i32) -> (i32, i32) {
    %c0_i32 = arith.constant 0 : i32
    %c0_i32_0 = arith.constant 0 : i32
    return %arg0, %c0_i32 : i32, i32
  }
}

module attributes {stable_mosaic.version = 11 : i64} {
  func.func @_mm_kernel(%arg0: i32, %arg1: memref<128x16xbf16, #tpu.memory_space<vmem>>, %arg2: memref<16x5xbf16, #tpu.memory_space<vmem>>, %arg3: memref<1x5xf32, #tpu.memory_space<vmem>>, %arg4: memref<128x5xf32, #tpu.memory_space<vmem>>) attributes {dimension_semantics = [#tpu.dimension_semantics<parallel>], iteration_bounds = array<i64: 1>, scalar_prefetch = 0 : i64, scratch_operands = 0 : i64, tpu.core_type = #tpu.core_type<tc>, window_params = [{transform_indices = @transform_0, window_bounds = array<i64: 128, 16>}, {pipeline_mode = #tpu.pipeline_mode<synchronous>, transform_indices = @transform_1, window_bounds = array<i64: 16, 5>}, {pipeline_mode = #tpu.pipeline_mode<synchronous>, transform_indices = @transform_2, window_bounds = array<i64: 1, 5>}, {transform_indices = @transform_3, window_bounds = array<i64: 128, 5>}]} {
    %c0 = arith.constant 0 : index
    %c0_0 = arith.constant 0 : index
    %0 = vector.load %arg1[%c0, %c0_0] : memref<128x16xbf16, #tpu.memory_space<vmem>>, vector<128x16xbf16>
    %c0_1 = arith.constant 0 : index
    %c0_2 = arith.constant 0 : index
    %1 = vector.load %arg2[%c0_1, %c0_2] : memref<16x5xbf16, #tpu.memory_space<vmem>>, vector<16x5xbf16>
    %cst = arith.constant dense<0.000000e+00> : vector<128x5xf32>
    %2 = tpu.matmul %0, %1, %cst {dimension_numbers = #tpu.dot_dimension_numbers<[1], [0], [0], [1], [0, 0, 1, 1], [], []>} : vector<128x16xbf16>, vector<16x5xbf16>, vector<128x5xf32> -> vector<128x5xf32>
    %c0_3 = arith.constant 0 : index
    %c0_4 = arith.constant 0 : index
    %3 = vector.load %arg3[%c0_3, %c0_4] : memref<1x5xf32, #tpu.memory_space<vmem>>, vector<1x5xf32>
    %4 = vector.broadcast %3 : vector<1x5xf32> to vector<128x5xf32>
    %5 = arith.addf %2, %4 : vector<128x5xf32>
    %c0_5 = arith.constant 0 : index
    %c0_6 = arith.constant 0 : index
    %6 = vector.load %arg4[%c0_5, %c0_6] : memref<128x5xf32, #tpu.memory_space<vmem>>, vector<128x5xf32>
    tpu.vector_store %arg4[%c0_5, %c0_6], %5 {strides = array<i32>} : memref<128x5xf32, #tpu.memory_space<vmem>>, vector<128x5xf32>,
    return
  }
  func.func @transform_0(%arg0: i32) -> (i32, i32) {
    %c0_i32 = arith.constant 0 : i32
    %c0_i32_0 = arith.constant 0 : i32
    return %arg0, %c0_i32 : i32, i32
  }
  func.func @transform_1(%arg0: i32) -> (i32, i32) {
    %c0_i32 = arith.constant 0 : i32
    %c0_i32_0 = arith.constant 0 : i32
    %c0_i32_1 = arith.constant 0 : i32
    return %c0_i32, %c0_i32_0 : i32, i32
  }
  func.func @transform_2(%arg0: i32) -> (i32, i32) {
    %c0_i32 = arith.constant 0 : i32
    %c0_i32_0 = arith.constant 0 : i32
    %c0_i32_1 = arith.constant 0 : i32
    return %c0_i32, %c0_i32_0 : i32, i32
  }
  func.func @transform_3(%arg0: i32) -> (i32, i32) {
    %c0_i32 = arith.constant 0 : i32
    %c0_i32_0 = arith.constant 0 : i32
    return %arg0, %c0_i32 : i32, i32
  }
}

module attributes {stable_mosaic.version = 11 : i64} {
  func.func @_mm_res_kernel(%arg0: i32, %arg1: memref<128x48xbf16, #tpu.memory_space<vmem>>, %arg2: memref<48x16xbf16, #tpu.memory_space<vmem>>, %arg3: memref<1x16xf32, #tpu.memory_space<vmem>>, %arg4: memref<128x16xf32, #tpu.memory_space<vmem>>, %arg5: memref<128x16xf32, #tpu.memory_space<vmem>>) attributes {dimension_semantics = [#tpu.dimension_semantics<parallel>], iteration_bounds = array<i64: 1>, scalar_prefetch = 0 : i64, scratch_operands = 0 : i64, tpu.core_type = #tpu.core_type<tc>, window_params = [{transform_indices = @transform_0, window_bounds = array<i64: 128, 48>}, {pipeline_mode = #tpu.pipeline_mode<synchronous>, transform_indices = @transform_1, window_bounds = array<i64: 48, 16>}, {pipeline_mode = #tpu.pipeline_mode<synchronous>, transform_indices = @transform_2, window_bounds = array<i64: 1, 16>}, {transform_indices = @transform_3, window_bounds = array<i64: 128, 16>}, {transform_indices = @transform_4, window_bounds = array<i64: 128, 16>}]} {
    %c0 = arith.constant 0 : index
    %c0_0 = arith.constant 0 : index
    %0 = vector.load %arg1[%c0, %c0_0] : memref<128x48xbf16, #tpu.memory_space<vmem>>, vector<128x48xbf16>
    %c0_1 = arith.constant 0 : index
    %c0_2 = arith.constant 0 : index
    %1 = vector.load %arg2[%c0_1, %c0_2] : memref<48x16xbf16, #tpu.memory_space<vmem>>, vector<48x16xbf16>
    %cst = arith.constant dense<0.000000e+00> : vector<128x16xf32>
    %2 = tpu.matmul %0, %1, %cst {dimension_numbers = #tpu.dot_dimension_numbers<[1], [0], [0], [1], [0, 0, 1, 1], [], []>} : vector<128x48xbf16>, vector<48x16xbf16>, vector<128x16xf32> -> vector<128x16xf32>
    %c0_3 = arith.constant 0 : index
    %c0_4 = arith.constant 0 : index
    %3 = vector.load %arg3[%c0_3, %c0_4] : memref<1x16xf32, #tpu.memory_space<vmem>>, vector<1x16xf32>
    %4 = vector.broadcast %3 : vector<1x16xf32> to vector<128x16xf32>
    %5 = arith.addf %2, %4 : vector<128x16xf32>
    %c0_5 = arith.constant 0 : index
    %c0_6 = arith.constant 0 : index
    %6 = vector.load %arg4[%c0_5, %c0_6] : memref<128x16xf32, #tpu.memory_space<vmem>>, vector<128x16xf32>
    %7 = arith.addf %5, %6 : vector<128x16xf32>
    %cst_7 = arith.constant 0.000000e+00 : f32
    %8 = vector.broadcast %cst_7 : f32 to vector<128x16xf32>
    %9 = arith.maximumf %7, %8 : vector<128x16xf32>
    %c0_8 = arith.constant 0 : index
    %c0_9 = arith.constant 0 : index
    %10 = vector.load %arg5[%c0_8, %c0_9] : memref<128x16xf32, #tpu.memory_space<vmem>>, vector<128x16xf32>
    tpu.vector_store %arg5[%c0_8, %c0_9], %9 {strides = array<i32>} : memref<128x16xf32, #tpu.memory_space<vmem>>, vector<128x16xf32>,
    return
  }
  func.func @transform_0(%arg0: i32) -> (i32, i32) {
    %c0_i32 = arith.constant 0 : i32
    %c0_i32_0 = arith.constant 0 : i32
    return %arg0, %c0_i32 : i32, i32
  }
  func.func @transform_1(%arg0: i32) -> (i32, i32) {
    %c0_i32 = arith.constant 0 : i32
    %c0_i32_0 = arith.constant 0 : i32
    %c0_i32_1 = arith.constant 0 : i32
    return %c0_i32, %c0_i32_0 : i32, i32
  }
  func.func @transform_2(%arg0: i32) -> (i32, i32) {
    %c0_i32 = arith.constant 0 : i32
    %c0_i32_0 = arith.constant 0 : i32
    %c0_i32_1 = arith.constant 0 : i32
    return %c0_i32, %c0_i32_0 : i32, i32
  }
  func.func @transform_3(%arg0: i32) -> (i32, i32) {
    %c0_i32 = arith.constant 0 : i32
    %c0_i32_0 = arith.constant 0 : i32
    return %arg0, %c0_i32 : i32, i32
  }
  func.func @transform_4(%arg0: i32) -> (i32, i32) {
    %c0_i32 = arith.constant 0 : i32
    %c0_i32_0 = arith.constant 0 : i32
    return %arg0, %c0_i32 : i32, i32
  }
}

</mosaic_0001>

<bundles_post_ra>
// kernel: _lambda_.87
= control target key start
LH: loop header
LB: loop body
LE: loop exit
PB: predicated region body
PF: predicated region fallthrough
CT: control target
= control target key end

     0   :  { %vm197_vm0 = vcmask 23552   ;;  %s553_s0 = inlined_call_operand.vmem [shape: f32[128,3], index: 0, kind: input, shape index: {}]   ;;  %s554_s1 = inlined_call_operand.vmem [shape: f32[128,3], index: 1, kind: input, shape index: {}]   ;;  %s555_s2 = inlined_call_operand.vmem [shape: f32[128,3], index: 2, kind: input, shape index: {}]   ;;  %s556_s3 = inlined_call_operand.vmem [shape: f32[128,3], index: 3, kind: input, shape index: {}]   ;;  %s557_s4 = inlined_call_operand.vmem [shape: f32[1,3], index: 4, kind: input, shape index: {}]   ;;  %s558_s5 = inlined_call_operand.vmem [shape: f32[1,3], index: 5, kind: input, shape index: {}]   ;;  %s559_s6 = inlined_call_operand.vmem [shape: f32[128,3], index: 6, kind: output, shape index: {}]  }
   0x1   :  { %v23_v0 = vld [vmem:[%s553_s0] sm:$0xff]  ;;  %v24_v7 = vld [vmem:[%s553_s0 + $0x8] sm:$0xff]  ;;  %v25_v13 = vld [vmem:[%s553_s0 + $0x10] sm:$0xff] }
   0x2   :  { %v39_v1 = vld [vmem:[%s554_s1] sm:$0xff]  ;;  %v40_v8 = vld [vmem:[%s554_s1 + $0x8] sm:$0xff]  ;;  %v41_v14 = vld [vmem:[%s554_s1 + $0x10] sm:$0xff] }
   0x3   :  { %v71_v2 = vld [vmem:[%s555_s2] sm:$0xff]  ;;  %v55_v3 = vmax.f32 %v23_v0, %v39_v1  ;;  %v72_v9 = vld [vmem:[%s555_s2 + $0x8] sm:$0xff]  ;;  %v56_v11 = vmax.f32 %v24_v7, %v40_v8  ;;  %v57_v17 = vmax.f32 %v25_v13, %v41_v14  ;;  %v73_v18 = vld [vmem:[%s555_s2 + $0x10] sm:$0xff] }
   0x4   :  { %v87_v4 = vld [vmem:[%s556_s3] sm:$0xff]  ;;  %v88_v12 = vld [vmem:[%s556_s3 + $0x8] sm:$0xff]  ;;  %v89_v19 = vld [vmem:[%s556_s3 + $0x10] sm:$0xff] }
   0x5   :  { %v270_v5 = vld [vmem:[%s557_s4] ss:$0 sm:$0xff]  ;;  %v103_v6 = vmax.f32 %v71_v2, %v87_v4  ;;  %v104_v16 = vmax.f32 %v72_v9, %v88_v12  ;;  %v26_v20 = vld [vmem:[%s553_s0 + $0x18] sm:$0xff]  ;;  %v105_v21 = vmax.f32 %v73_v18, %v89_v19  ;;  %v28_v35 = vld [vmem:[%s553_s0 + $0x28] sm:$0xff] }
   0x6   :  { %v284_v10 = vld [vmem:[%s558_s5] ss:$0 sm:$0xff]  ;;  %v42_v22 = vld [vmem:[%s554_s1 + $0x18] sm:$0xff]  ;;  %v44_v36 = vld [vmem:[%s554_s1 + $0x28] sm:$0xff] }
   0x7   :  { %v119_v15 = vmax.f32 %v55_v3, %v103_v6  ;;  %v74_v23 = vld [vmem:[%s555_s2 + $0x18] sm:$0xff]  ;;  %v120_v26 = vmax.f32 %v56_v11, %v104_v16  ;;  %v58_v27 = vmax.f32 %v26_v20, %v42_v22  ;;  %v27_v29 = vld [vmem:[%s553_s0 + $0x20] sm:$0xff]  ;;  %v121_v32 = vmax.f32 %v57_v17, %v105_v21  ;;  %v76_v41 = vld [vmem:[%s555_s2 + $0x28] sm:$0xff] }
   0x8   :  { %v90_v24 = vld [vmem:[%s556_s3 + $0x18] sm:$0xff]  ;;  %v43_v30 = vld [vmem:[%s554_s1 + $0x20] sm:$0xff]  ;;  %v92_v42 = vld [vmem:[%s556_s3 + $0x28] sm:$0xff]  ;;  %v60_v45 = vmax.f32 %v28_v35, %v44_v36 }
   0x9   :  { %v142_v25 = vmul.f32 %v270_v5, %v119_v15  ;;  %v106_v28 = vmax.f32 %v74_v23, %v90_v24  ;;  %v75_v31 = vld [vmem:[%s555_s2 + $0x20] sm:$0xff]  ;;  %v59_v33 = vmax.f32 %v27_v29, %v43_v30  ;;  %v143_v38 = vmul.f32 %v270_v5, %v120_v26  ;;  %v29_v43 = vld [vmem:[%s553_s0 + $0x30] sm:$0xff]  ;;  %v30_v54 = vld [vmem:[%s553_s0 + $0x38] sm:$0xff] }
   0xa   :  { %v91_v34 = vld [vmem:[%s556_s3 + $0x20] sm:$0xff]  ;;  %v144_v44 = vmul.f32 %v270_v5, %v121_v32  ;;  %v108_v46 = vmax.f32 %v76_v41, %v92_v42  ;;  %v45_v47 = vld [vmem:[%s554_s1 + $0x30] sm:$0xff]  ;;  %v46_v55 = vld [vmem:[%s554_s1 + $0x38] sm:$0xff] }
   0xb   :  { %v165_v37 = vadd.f32 %v284_v10, %v142_v25  ;;  %v122_v39 = vmax.f32 %v58_v27, %v106_v28  ;;  %v107_v40 = vmax.f32 %v75_v31, %v91_v34  ;;  %v77_v48 = vld [vmem:[%s555_s2 + $0x30] sm:$0xff]  ;;  %v166_v51 = vadd.f32 %v284_v10, %v143_v38  ;;  %v78_v56 = vld [vmem:[%s555_s2 + $0x38] sm:$0xff]  ;;  %v31_v62 = vld [vmem:[%s553_s0 + $0x40] sm:$0xff] }
   0xc   :  { %v93_v49 = vld [vmem:[%s556_s3 + $0x30] sm:$0xff]  ;;  %v167_v57 = vadd.f32 %v284_v10, %v144_v44  ;;  %v124_v58 = vmax.f32 %v60_v45, %v108_v46  ;;  %v61_v59 = vmax.f32 %v29_v43, %v45_v47  ;;  %v94_v61 = vld [vmem:[%s556_s3 + $0x38] sm:$0xff]  ;;  %v47_v63 = vld [vmem:[%s554_s1 + $0x40] sm:$0xff]  ;;  %v62_v3 = vmax.f32 %v30_v54, %v46_v55 }
   0xd   :  { %v181_v50 = vmax.f32 %v165_v37, 0.0  ;;  %v145_v52 = vmul.f32 %v270_v5, %v122_v39  ;;  %v123_v53 = vmax.f32 %v59_v33, %v107_v40  ;;  %v109_v60 = vmax.f32 %v77_v48, %v93_v49  ;;  %v79_v4 = vld [vmem:[%s555_s2 + $0x40] sm:$0xff]  ;;  %v32_v7 = vld [vmem:[%s553_s0 + $0x48] sm:$0xff]  ;;  %v33_v20 = vld [vmem:[%s553_s0 + $0x50] sm:$0xff] }
   0xe   :  { %v182_v0 = vmax.f32 %v166_v51, 0.0  ;;  %v95_v6 = vld [vmem:[%s556_s3 + $0x40] sm:$0xff]  ;;  %v183_v8 = vmax.f32 %v167_v57, 0.0  ;;  %v147_v9 = vmul.f32 %v270_v5, %v124_v58  ;;  %v110_v12 = vmax.f32 %v78_v56, %v94_v61  ;;  %v48_v13 = vld [vmem:[%s554_s1 + $0x48] sm:$0xff]  ;;  %v49_v21 = vld [vmem:[%s554_s1 + $0x50] sm:$0xff] }
   0xf   :  { %198 = vst.msk [vmem:[%s559_s6] sm:$0xff] %vm197_vm0, %v181_v50  ;;  %v168_v1 = vadd.f32 %v284_v10, %v145_v52  ;;  %v146_v2 = vmul.f32 %v270_v5, %v123_v53  ;;  %v125_v11 = vmax.f32 %v61_v59, %v109_v60  ;;  %v80_v14 = vld [vmem:[%s555_s2 + $0x48] sm:$0xff]  ;;  %v63_v18 = vmax.f32 %v31_v62, %v47_v63  ;;  %v81_v22 = vld [vmem:[%s555_s2 + $0x50] sm:$0xff]  ;;  %v34_v28 = vld [vmem:[%s553_s0 + $0x58] sm:$0xff] }
  0x10   :  { %v96_v15 = vld [vmem:[%s556_s3 + $0x48] sm:$0xff]  ;;  %199 = vst.msk [vmem:[%s559_s6 + $0x8] sm:$0xff] %vm197_vm0, %v182_v0  ;;  %v111_v19 = vmax.f32 %v79_v4, %v95_v6  ;;  %200 = vst.msk [vmem:[%s559_s6 + $0x10] sm:$0xff] %vm197_vm0, %v183_v8  ;;  %v170_v23 = vadd.f32 %v284_v10, %v147_v9  ;;  %v126_v25 = vmax.f32 %v62_v3, %v110_v12  ;;  %v97_v27 = vld [vmem:[%s556_s3 + $0x50] sm:$0xff] }
  0x11   :  { %v184_v16 = vmax.f32 %v168_v1, 0.0  ;;  %v169_v17 = vadd.f32 %v284_v10, %v146_v2  ;;  %v148_v24 = vmul.f32 %v270_v5, %v125_v11  ;;  %v64_v26 = vmax.f32 %v32_v7, %v48_v13  ;;  %v50_v29 = vld [vmem:[%s554_s1 + $0x58] sm:$0xff]  ;;  %v35_v36 = vld [vmem:[%s553_s0 + $0x60] sm:$0xff]  ;;  %v36_v48 = vld [vmem:[%s553_s0 + $0x68] sm:$0xff] }
  0x12   :  { %v127_v31 = vmax.f32 %v63_v18, %v111_v19  ;;  %v112_v32 = vmax.f32 %v80_v14, %v96_v15  ;;  %v65_v33 = vmax.f32 %v33_v20, %v49_v21  ;;  %v82_v34 = vld [vmem:[%s555_s2 + $0x58] sm:$0xff]  ;;  %v186_v37 = vmax.f32 %v170_v23, 0.0  ;;  %v51_v41 = vld [vmem:[%s554_s1 + $0x60] sm:$0xff]  ;;  %v52_v49 = vld [vmem:[%s554_s1 + $0x68] sm:$0xff] }
  0x13   :  { %201 = vst.msk [vmem:[%s559_s6 + $0x18] sm:$0xff] %vm197_vm0, %v184_v16  ;;  %v185_v30 = vmax.f32 %v169_v17, 0.0  ;;  %v98_v35 = vld [vmem:[%s556_s3 + $0x58] sm:$0xff]  ;;  %v171_v38 = vadd.f32 %v284_v10, %v148_v24  ;;  %v149_v39 = vmul.f32 %v270_v5, %v126_v25  ;;  %v113_v40 = vmax.f32 %v81_v22, %v97_v27  ;;  %v83_v42 = vld [vmem:[%s555_s2 + $0x60] sm:$0xff]  ;;  %v84_v50 = vld [vmem:[%s555_s2 + $0x68] sm:$0xff] }
  0x14   :  { %v99_v43 = vld [vmem:[%s556_s3 + $0x60] sm:$0xff]  ;;  %v150_v44 = vmul.f32 %v270_v5, %v127_v31  ;;  %v128_v45 = vmax.f32 %v64_v26, %v112_v32  ;;  %v66_v46 = vmax.f32 %v34_v28, %v50_v29  ;;  %v114_v47 = vmax.f32 %v82_v34, %v98_v35  ;;  %203 = vst.msk [vmem:[%s559_s6 + $0x28] sm:$0xff] %vm197_vm0, %v186_v37  ;;  %v100_v55 = vld [vmem:[%s556_s3 + $0x68] sm:$0xff]  ;;  %v37_v56 = vld [vmem:[%s553_s0 + $0x70] sm:$0xff] }
  0x15   :  { %202 = vst.msk [vmem:[%s559_s6 + $0x20] sm:$0xff] %vm197_vm0, %v185_v30  ;;  %v187_v51 = vmax.f32 %v171_v38, 0.0  ;;  %v172_v52 = vadd.f32 %v284_v10, %v149_v39  ;;  %v129_v53 = vmax.f32 %v65_v33, %v113_v40  ;;  %v67_v54 = vmax.f32 %v35_v36, %v51_v41  ;;  %v53_v61 = vld [vmem:[%s554_s1 + $0x70] sm:$0xff]  ;;  %v38_v4 = vld [vmem:[%s553_s0 + $0x78] sm:$0xff] }
  0x16   :  { %v173_v57 = vadd.f32 %v284_v10, %v150_v44  ;;  %v151_v58 = vmul.f32 %v270_v5, %v128_v45  ;;  %v130_v59 = vmax.f32 %v66_v46, %v114_v47  ;;  %v115_v60 = vmax.f32 %v83_v42, %v99_v43  ;;  %v85_v62 = vld [vmem:[%s555_s2 + $0x70] sm:$0xff]  ;;  %v54_v6 = vld [vmem:[%s554_s1 + $0x78] sm:$0xff] }
  0x17   :  { %v101_v63 = vld [vmem:[%s556_s3 + $0x70] sm:$0xff]  ;;  %204 = vst.msk [vmem:[%s559_s6 + $0x30] sm:$0xff] %vm197_vm0, %v187_v51  ;;  %v188_v0 = vmax.f32 %v172_v52, 0.0  ;;  %v152_v1 = vmul.f32 %v270_v5, %v129_v53  ;;  %v68_v2 = vmax.f32 %v36_v48, %v52_v49  ;;  %v116_v3 = vmax.f32 %v84_v50, %v100_v55  ;;  %v86_v12 = vld [vmem:[%s555_s2 + $0x78] sm:$0xff] }
  0x18   :  { %v189_v7 = vmax.f32 %v173_v57, 0.0  ;;  %v174_v8 = vadd.f32 %v284_v10, %v151_v58  ;;  %v153_v9 = vmul.f32 %v270_v5, %v130_v59  ;;  %v131_v11 = vmax.f32 %v67_v54, %v115_v60  ;;  %v102_v13 = vld [vmem:[%s556_s3 + $0x78] sm:$0xff] }
  0x19   :  { %205 = vst.msk [vmem:[%s559_s6 + $0x38] sm:$0xff] %vm197_vm0, %v188_v0  ;;  %v175_v14 = vadd.f32 %v284_v10, %v152_v1  ;;  %v132_v15 = vmax.f32 %v68_v2, %v116_v3  ;;  %v69_v16 = vmax.f32 %v37_v56, %v53_v61  ;;  %v117_v17 = vmax.f32 %v85_v62, %v101_v63 }
  0x1a   :  { %206 = vst.msk [vmem:[%s559_s6 + $0x40] sm:$0xff] %vm197_vm0, %v189_v7  ;;  %v190_v18 = vmax.f32 %v174_v8, 0.0  ;;  %v176_v19 = vadd.f32 %v284_v10, %v153_v9  ;;  %v154_v20 = vmul.f32 %v270_v5, %v131_v11  ;;  %v70_v21 = vmax.f32 %v38_v4, %v54_v6 }
  0x1b   :  { %v191_v22 = vmax.f32 %v175_v14, 0.0  ;;  %v155_v23 = vmul.f32 %v270_v5, %v132_v15  ;;  %v133_v24 = vmax.f32 %v69_v16, %v117_v17  ;;  %v118_v25 = vmax.f32 %v86_v12, %v102_v13 }
  0x1c   :  { %207 = vst.msk [vmem:[%s559_s6 + $0x48] sm:$0xff] %vm197_vm0, %v190_v18  ;;  %v192_v26 = vmax.f32 %v176_v19, 0.0  ;;  %v177_v27 = vadd.f32 %v284_v10, %v154_v20 }
  0x1d   :  { %208 = vst.msk [vmem:[%s559_s6 + $0x50] sm:$0xff] %vm197_vm0, %v191_v22  ;;  %v178_v28 = vadd.f32 %v284_v10, %v155_v23  ;;  %v156_v29 = vmul.f32 %v270_v5, %v133_v24  ;;  %v134_v30 = vmax.f32 %v70_v21, %v118_v25 }
  0x1e   :  { %209 = vst.msk [vmem:[%s559_s6 + $0x58] sm:$0xff] %vm197_vm0, %v192_v26  ;;  %v193_v31 = vmax.f32 %v177_v27, 0.0 }
  0x1f   :  { %v194_v32 = vmax.f32 %v178_v28, 0.0  ;;  %v179_v33 = vadd.f32 %v284_v10, %v156_v29  ;;  %v157_v34 = vmul.f32 %v270_v5, %v134_v30 }
  0x20   :  { %210 = vst.msk [vmem:[%s559_s6 + $0x60] sm:$0xff] %vm197_vm0, %v193_v31 }
  0x21   :  { %211 = vst.msk [vmem:[%s559_s6 + $0x68] sm:$0xff] %vm197_vm0, %v194_v32  ;;  %v195_v35 = vmax.f32 %v179_v33, 0.0  ;;  %v180_v36 = vadd.f32 %v284_v10, %v157_v34 }
  0x23   :  { %212 = vst.msk [vmem:[%s559_s6 + $0x70] sm:$0xff] %vm197_vm0, %v195_v35  ;;  %v196_v37 = vmax.f32 %v180_v36, 0.0 }
  0x25   :  { %213 = vst.msk [vmem:[%s559_s6 + $0x78] sm:$0xff] %vm197_vm0, %v196_v37 }

// kernel: _lambda_.86
= control target key start
LH: loop header
LB: loop body
LE: loop exit
PB: predicated region body
PF: predicated region fallthrough
CT: control target
= control target key end

     0   :  { %vm118_vm0 = vcmask 1044480   ;;  %vm119_vm1 = vcmask 1045504   ;;  %v323_v1 = vmov 65535   ;;  %vm93_vm2 = vcmask 220160   ;;  %s449_s1 = inlined_call_operand.vmem [shape: bf16[27,13], index: 1, kind: input, shape index: {}]   ;;  %s450_s0 = inlined_call_operand.vmem [shape: bf16[128,27], index: 0, kind: input, shape index: {}]   ;;  %s451_s2 = inlined_call_operand.vmem [shape: f32[1,13], index: 2, kind: input, shape index: {}]   ;;  %s452_s3 = inlined_call_operand.vmem [shape: f32[128,13], index: 3, kind: output, shape index: {}]  }
   0x1   :  { %v313_v0 = vld [vmem:[%s449_s1 + $0x8] sm:$0x3f]   ;;  %v120_v2 = vsel %vm118_vm0, 4294967295, %v323_v1  ;;  %v315_v4 = vld [vmem:[%s450_s0] sm:$0xff]   ;;  %v319_v10 = vld [vmem:[%s450_s0 + $0x10] sm:$0xff]   ;;  %vm238_vm3 = vcmask 105472  }
   0x2   :  { %v121_v3 = vsel %vm119_vm1, %v120_v2, 0  ;;  %v314_v6 = vld [vmem:[%s449_s1] sm:$0xff]   ;;  %292 = vmatprep.mubr.msk.bf16.mxu0 %vm93_vm2, %v315_v4  ;;  %v317_v8 = vld [vmem:[%s450_s0 + $0x8] sm:$0xff]   ;;  %v320_v11 = vld [vmem:[%s450_s0 + $0x30] sm:$0xff]  }
   0x3   :  { %v123_v5 = vand.u32 %v313_v0, %v121_v3  ;;  %v316_v7 = vld [vmem:[%s450_s0 + $0x20] sm:$0xff]   ;;  %v318_v9 = vld [vmem:[%s450_s0 + $0x28] sm:$0xff]   ;;  %v321_v12 = vld [vmem:[%s450_s0 + $0x18] sm:$0xff]  }
   0x4   :  { %300 = vmatprep.mubr.msk.bf16.mxu1 %vm93_vm2, %v316_v7  ;;  %v322_v13 = vld [vmem:[%s450_s0 + $0x38] sm:$0xff]   ;;  %v259_v14 = vld [vmem:[%s451_s2] ss:$0 sm:$0xff] }
   0x5   :  { %288 = vmatprep.subr.bf16.mxu0 %v123_v5  ;;  %308 = vmatprep.subr.bf16.mxu1 %v123_v5 }
   0x6   :  { %289 = vmatpush3.bf16.msra.mxu0 %v123_v5  ;;  %310 = vmatpush3.bf16.msra.mxu1 %v123_v5 }
   0x7   :  { %290 = vmatprep.subr.bf16.mxu0 %v314_v6  ;;  %309 = vmatprep.subr.bf16.mxu1 %v314_v6 }
   0xa   :  { %291 = vmatpush3.bf16.msra.mxu0 %v314_v6  ;;  %311 = vmatpush3.bf16.msra.mxu1 %v314_v6 }
   0xd   :  { %293 = vmatmul.mubr.msk.bf16.vlgmr.msra.gmra.mxu0 %vm93_vm2, %v317_v8  ;;  %301 = vmatmul.mubr.msk.bf16.vlgmr.msra.gmra.mxu1 %vm93_vm2, %v318_v9 }
   0xe   :  { %296 = vmatprep.mubr.msk.bf16.mxu0 %vm93_vm2, %v319_v10  ;;  %304 = vmatprep.mubr.msk.bf16.mxu1 %vm93_vm2, %v320_v11 }
  0x15   :  { %297 = vmatmul.mubr.msk.bf16.gmra.mxu0 %vm93_vm2, %v321_v12  ;;  %305 = vmatmul.mubr.msk.bf16.gmra.mxu1 %vm93_vm2, %v322_v13 }
  0xcd   :  { %v294_v15 = vpop.f32.mrf.mxu0  ;;  %v302_v16 = vpop.f32.mrf.mxu1 }
  0xce   :  { %v168_v17 = vadd.f32 %v294_v15, %v259_v14  ;;  %v200_v18 = vadd.f32 %v302_v16, %v259_v14 }
  0xcf   :  { %v159_v19 = vpop.f32.mrf.mxu0  ;;  %v191_v20 = vpop.f32.mrf.mxu1 }
  0xd0   :  { %v224_v21 = vmax.f32 %v168_v17, 0.0  ;;  %v232_v22 = vmax.f32 %v200_v18, 0.0  ;;  %v160_v23 = vadd.f32 %v259_v14, %v159_v19  ;;  %v192_v24 = vadd.f32 %v259_v14, %v191_v20 }
  0xd1   :  { %v295_v25 = vpop.f32.mrf.mxu0  ;;  %v303_v26 = vpop.f32.mrf.mxu1 }
  0xd2   :  { %241 = vst.msk [vmem:[%s452_s3 + $0x10] sm:$0xff] %vm238_vm3, %v224_v21  ;;  %249 = vst.msk [vmem:[%s452_s3 + $0x50] sm:$0xff] %vm238_vm3, %v232_v22  ;;  %v222_v27 = vmax.f32 %v160_v23, 0.0  ;;  %v230_v28 = vmax.f32 %v192_v24, 0.0  ;;  %v171_v29 = vadd.f32 %v295_v25, %v259_v14  ;;  %v203_v30 = vadd.f32 %v303_v26, %v259_v14 }
  0xd3   :  { %v162_v31 = vpop.f32.mrf.mxu0  ;;  %v194_v32 = vpop.f32.mrf.mxu1 }
  0xd4   :  { %239 = vst.msk [vmem:[%s452_s3] sm:$0xff] %vm238_vm3, %v222_v27  ;;  %247 = vst.msk [vmem:[%s452_s3 + $0x40] sm:$0xff] %vm238_vm3, %v230_v28  ;;  %v225_v33 = vmax.f32 %v171_v29, 0.0  ;;  %v233_v34 = vmax.f32 %v203_v30, 0.0  ;;  %v163_v35 = vadd.f32 %v259_v14, %v162_v31  ;;  %v195_v36 = vadd.f32 %v259_v14, %v194_v32 }
  0xd5   :  { %v298_v37 = vpop.f32.mrf.mxu0  ;;  %v306_v38 = vpop.f32.mrf.mxu1 }
  0xd6   :  { %242 = vst.msk [vmem:[%s452_s3 + $0x18] sm:$0xff] %vm238_vm3, %v225_v33  ;;  %250 = vst.msk [vmem:[%s452_s3 + $0x58] sm:$0xff] %vm238_vm3, %v233_v34  ;;  %v223_v39 = vmax.f32 %v163_v35, 0.0  ;;  %v231_v40 = vmax.f32 %v195_v36, 0.0  ;;  %v184_v41 = vadd.f32 %v298_v37, %v259_v14  ;;  %v216_v42 = vadd.f32 %v306_v38, %v259_v14 }
  0xd7   :  { %v175_v43 = vpop.f32.mrf.mxu0  ;;  %v207_v44 = vpop.f32.mrf.mxu1 }
  0xd8   :  { %240 = vst.msk [vmem:[%s452_s3 + $0x8] sm:$0xff] %vm238_vm3, %v223_v39  ;;  %248 = vst.msk [vmem:[%s452_s3 + $0x48] sm:$0xff] %vm238_vm3, %v231_v40  ;;  %v228_v45 = vmax.f32 %v184_v41, 0.0  ;;  %v236_v46 = vmax.f32 %v216_v42, 0.0  ;;  %v176_v47 = vadd.f32 %v259_v14, %v175_v43  ;;  %v208_v48 = vadd.f32 %v259_v14, %v207_v44 }
  0xd9   :  { %v299_v49 = vpop.f32.mrf.mxu0  ;;  %v307_v50 = vpop.f32.mrf.mxu1 }
  0xda   :  { %245 = vst.msk [vmem:[%s452_s3 + $0x30] sm:$0xff] %vm238_vm3, %v228_v45  ;;  %253 = vst.msk [vmem:[%s452_s3 + $0x70] sm:$0xff] %vm238_vm3, %v236_v46  ;;  %v226_v51 = vmax.f32 %v176_v47, 0.0  ;;  %v234_v52 = vmax.f32 %v208_v48, 0.0  ;;  %v187_v53 = vadd.f32 %v299_v49, %v259_v14  ;;  %v219_v54 = vadd.f32 %v307_v50, %v259_v14 }
  0xdb   :  { %v178_v55 = vpop.f32.mrf.mxu0  ;;  %v210_v56 = vpop.f32.mrf.mxu1 }
  0xdc   :  { %243 = vst.msk [vmem:[%s452_s3 + $0x20] sm:$0xff] %vm238_vm3, %v226_v51  ;;  %251 = vst.msk [vmem:[%s452_s3 + $0x60] sm:$0xff] %vm238_vm3, %v234_v52  ;;  %v229_v57 = vmax.f32 %v187_v53, 0.0  ;;  %v237_v58 = vmax.f32 %v219_v54, 0.0  ;;  %v179_v59 = vadd.f32 %v259_v14, %v178_v55  ;;  %v211_v60 = vadd.f32 %v259_v14, %v210_v56 }
  0xde   :  { %246 = vst.msk [vmem:[%s452_s3 + $0x38] sm:$0xff] %vm238_vm3, %v229_v57  ;;  %254 = vst.msk [vmem:[%s452_s3 + $0x78] sm:$0xff] %vm238_vm3, %v237_v58  ;;  %v227_v61 = vmax.f32 %v179_v59, 0.0  ;;  %v235_v62 = vmax.f32 %v211_v60, 0.0 }
  0xe0   :  { %244 = vst.msk [vmem:[%s452_s3 + $0x28] sm:$0xff] %vm238_vm3, %v227_v61  ;;  %252 = vst.msk [vmem:[%s452_s3 + $0x68] sm:$0xff] %vm238_vm3, %v235_v62 }

// kernel: _lambda_.89
= control target key start
LH: loop header
LB: loop body
LE: loop exit
PB: predicated region body
PF: predicated region fallthrough
CT: control target
= control target key end

     0   :  { %vm77_vm0 = vcmask 130048   ;;  %s189_s0 = inlined_call_operand.vmem [shape: f32[32,16], index: 0, kind: input, shape index: {}]   ;;  %s190_s1 = inlined_call_operand.vmem [shape: f32[32,16], index: 1, kind: input, shape index: {}]   ;;  %s191_s2 = inlined_call_operand.vmem [shape: f32[32,16], index: 2, kind: input, shape index: {}]   ;;  %s192_s3 = inlined_call_operand.vmem [shape: f32[32,16], index: 3, kind: input, shape index: {}]   ;;  %s193_s4 = inlined_call_operand.vmem [shape: f32[1,16], index: 4, kind: input, shape index: {}]   ;;  %s194_s5 = inlined_call_operand.vmem [shape: f32[1,16], index: 5, kind: input, shape index: {}]   ;;  %s195_s6 = inlined_call_operand.vmem [shape: f32[32,16], index: 6, kind: output, shape index: {}]  }
   0x1   :  { %v23_v0 = vld [vmem:[%s189_s0] sm:$0xff]  ;;  %v24_v7 = vld [vmem:[%s189_s0 + $0x8] sm:$0xff]  ;;  %v25_v13 = vld [vmem:[%s189_s0 + $0x10] sm:$0xff] }
   0x2   :  { %v27_v1 = vld [vmem:[%s190_s1] sm:$0xff]  ;;  %v28_v8 = vld [vmem:[%s190_s1 + $0x8] sm:$0xff]  ;;  %v29_v14 = vld [vmem:[%s190_s1 + $0x10] sm:$0xff] }
   0x3   :  { %v35_v2 = vld [vmem:[%s191_s2] sm:$0xff]  ;;  %v31_v3 = vmax.f32 %v23_v0, %v27_v1  ;;  %v36_v9 = vld [vmem:[%s191_s2 + $0x8] sm:$0xff]  ;;  %v32_v11 = vmax.f32 %v24_v7, %v28_v8  ;;  %v33_v17 = vmax.f32 %v25_v13, %v29_v14  ;;  %v37_v18 = vld [vmem:[%s191_s2 + $0x10] sm:$0xff] }
   0x4   :  { %v39_v4 = vld [vmem:[%s192_s3] sm:$0xff]  ;;  %v40_v12 = vld [vmem:[%s192_s3 + $0x8] sm:$0xff]  ;;  %v41_v19 = vld [vmem:[%s192_s3 + $0x10] sm:$0xff] }
   0x5   :  { %v86_v5 = vld [vmem:[%s193_s4] ss:$0 sm:$0xff]  ;;  %v43_v6 = vmax.f32 %v35_v2, %v39_v4  ;;  %v44_v16 = vmax.f32 %v36_v9, %v40_v12  ;;  %v26_v20 = vld [vmem:[%s189_s0 + $0x18] sm:$0xff]  ;;  %v45_v21 = vmax.f32 %v37_v18, %v41_v19 }
   0x6   :  { %v87_v10 = vld [vmem:[%s194_s5] ss:$0 sm:$0xff]  ;;  %v30_v22 = vld [vmem:[%s190_s1 + $0x18] sm:$0xff] }
   0x7   :  { %v47_v15 = vmax.f32 %v31_v3, %v43_v6  ;;  %v38_v23 = vld [vmem:[%s191_s2 + $0x18] sm:$0xff]  ;;  %v48_v26 = vmax.f32 %v32_v11, %v44_v16  ;;  %v34_v27 = vmax.f32 %v26_v20, %v30_v22  ;;  %v49_v29 = vmax.f32 %v33_v17, %v45_v21 }
   0x8   :  { %v42_v24 = vld [vmem:[%s192_s3 + $0x18] sm:$0xff] }
   0x9   :  { %v58_v25 = vmul.f32 %v86_v5, %v47_v15  ;;  %v46_v28 = vmax.f32 %v38_v23, %v42_v24  ;;  %v59_v31 = vmul.f32 %v86_v5, %v48_v26  ;;  %v60_v33 = vmul.f32 %v86_v5, %v49_v29 }
   0xb   :  { %v69_v30 = vadd.f32 %v87_v10, %v58_v25  ;;  %v50_v32 = vmax.f32 %v34_v27, %v46_v28  ;;  %v70_v35 = vadd.f32 %v87_v10, %v59_v31  ;;  %v71_v37 = vadd.f32 %v87_v10, %v60_v33 }
   0xd   :  { %v73_v34 = vmax.f32 %v69_v30, 0.0  ;;  %v61_v36 = vmul.f32 %v86_v5, %v50_v32  ;;  %v74_v38 = vmax.f32 %v70_v35, 0.0  ;;  %v75_v40 = vmax.f32 %v71_v37, 0.0 }
   0xf   :  { %78 = vst.msk [vmem:[%s195_s6] sm:$0xff] %vm77_vm0, %v73_v34  ;;  %v72_v39 = vadd.f32 %v87_v10, %v61_v36  ;;  %79 = vst.msk [vmem:[%s195_s6 + $0x8] sm:$0xff] %vm77_vm0, %v74_v38 }
  0x10   :  { %80 = vst.msk [vmem:[%s195_s6 + $0x10] sm:$0xff] %vm77_vm0, %v75_v40 }
  0x11   :  { %v76_v41 = vmax.f32 %v72_v39, 0.0 }
  0x13   :  { %81 = vst.msk [vmem:[%s195_s6 + $0x18] sm:$0xff] %vm77_vm0, %v76_v41 }

// kernel: _lambda_.88
= control target key start
LH: loop header
LB: loop body
LE: loop exit
PB: predicated region body
PF: predicated region fallthrough
CT: control target
= control target key end

     0   :  { %v235_v0 = vmov 0   ;;  %vm116_vm0 = vcmask 130048   ;;  %vm176_vm1 = vcmask 392192   ;;  %s314_s1 = inlined_call_operand.vmem [shape: bf16[144,48], index: 1, kind: input, shape index: {}]   ;;  %s315_s0 = inlined_call_operand.vmem [shape: bf16[32,144], index: 0, kind: input, shape index: {}]   ;;  %s316_s2 = inlined_call_operand.vmem [shape: f32[1,48], index: 2, kind: input, shape index: {}]   ;;  %s317_s3 = inlined_call_operand.vmem [shape: f32[32,48], index: 3, kind: output, shape index: {}]  }
   0x1   :  { %123 = vmatprep.subr.bf16.mxu0 %v235_v0  ;;  %201 = vmatprep.subr.bf16.mxu1 %v235_v0  ;;  %v220_v1 = vld [vmem:[%s314_s1 + $0x38] sm:$0xff]   ;;  %v221_v2 = vld [vmem:[%s314_s1 + $0x30] sm:$0xff]   ;;  %v222_v3 = vld [vmem:[%s314_s1 + $0x28] sm:$0xff]  }
   0x2   :  { %124 = vmatpush1.bf16.msra.mxu0 %v220_v1  ;;  %210 = vmatpush1.bf16.msra.mxu1 %v220_v1  ;;  %v223_v4 = vld [vmem:[%s314_s1 + $0x20] sm:$0xff]   ;;  %v234_v6 = vld [vmem:[%s315_s0 + $0x14] ss:$8 sps:$4 sm:$0xff]   ;;  %v226_v9 = vld [vmem:[%s314_s1 + $0x8] sm:$0xff]  }
   0x3   :  { %125 = vmatprep.subr.bf16.mxu0 %v235_v0  ;;  %202 = vmatprep.subr.bf16.mxu1 %v235_v0  ;;  %v231_v5 = vld [vmem:[%s315_s0 + $0x4] ss:$8 sps:$4 sm:$0xff]   ;;  %v224_v7 = vld [vmem:[%s314_s1 + $0x18] sm:$0xff]   ;;  %v225_v8 = vld [vmem:[%s314_s1 + $0x10] sm:$0xff]  }
   0x4   :  { %199 = vmatprep.mubr.msk.bf16.mxu0 %vm116_vm0, %v231_v5  ;;  %200 = vmatprep.mubr.msk.bf16.mxu1 %vm116_vm0, %v234_v6  ;;  %v227_v10 = vld [vmem:[%s314_s1] sm:$0xff]   ;;  %v232_v13 = vld [vmem:[%s315_s0 + $0x10] ss:$8 sps:$4 sm:$0xff]  }
   0x5   :  { %v228_v11 = vld [vmem:[%s314_s1 + $0x40] sm:$0xff]  }
   0x6   :  { %126 = vmatpush1.bf16.msra.mxu0 %v221_v2  ;;  %211 = vmatpush1.bf16.msra.mxu1 %v221_v2  ;;  %v229_v12 = vld [vmem:[%s315_s0] ss:$8 sps:$4 sm:$0xff]  }
   0x7   :  { %127 = vmatprep.subr.bf16.mxu0 %v235_v0  ;;  %203 = vmatprep.subr.bf16.mxu1 %v235_v0  ;;  %v185_v14 = vld [vmem:[%s316_s2] ss:$0 sm:$0xff] }
   0xa   :  { %128 = vmatpush1.bf16.msra.mxu0 %v222_v3  ;;  %212 = vmatpush1.bf16.msra.mxu1 %v222_v3 }
   0xb   :  { %129 = vmatprep.subr.bf16.mxu0 %v235_v0  ;;  %204 = vmatprep.subr.bf16.mxu1 %v235_v0 }
   0xe   :  { %130 = vmatpush1.bf16.msra.mxu0 %v223_v4  ;;  %213 = vmatpush1.bf16.msra.mxu1 %v223_v4 }
   0xf   :  { %131 = vmatprep.subr.bf16.mxu0 %v235_v0  ;;  %205 = vmatprep.subr.bf16.mxu1 %v235_v0 }
  0x12   :  { %132 = vmatpush1.bf16.msra.mxu0 %v224_v7  ;;  %214 = vmatpush1.bf16.msra.mxu1 %v224_v7 }
  0x13   :  { %133 = vmatprep.subr.bf16.mxu0 %v235_v0  ;;  %206 = vmatprep.subr.bf16.mxu1 %v235_v0 }
  0x16   :  { %134 = vmatpush1.bf16.msra.mxu0 %v225_v8  ;;  %215 = vmatpush1.bf16.msra.mxu1 %v225_v8 }
  0x17   :  { %135 = vmatprep.subr.bf16.mxu0 %v235_v0  ;;  %207 = vmatprep.subr.bf16.mxu1 %v235_v0 }
  0x1a   :  { %136 = vmatpush1.bf16.msra.mxu0 %v226_v9  ;;  %216 = vmatpush1.bf16.msra.mxu1 %v226_v9 }
  0x1b   :  { %137 = vmatprep.subr.bf16.mxu0 %v235_v0  ;;  %208 = vmatprep.subr.bf16.mxu1 %v235_v0 }
  0x1e   :  { %138 = vmatpush1.bf16.msra.mxu0 %v227_v10  ;;  %217 = vmatpush1.bf16.msra.mxu1 %v227_v10 }
  0x1f   :  { %153 = vmatprep.subr.bf16.mxu0 %v235_v0  ;;  %209 = vmatprep.subr.bf16.mxu1 %v235_v0 }
  0x22   :  { %154 = vmatpush2.bf16.msra.mxu0 %v228_v11  ;;  %218 = vmatpush2.bf16.msra.mxu1 %v228_v11 }
  0x25   :  { %156 = vmatmul.mubr.bf16.vlgmr.msra.gmra.mxu0 %v229_v12  ;;  %164 = vmatmul.mubr.bf16.vlgmr.msra.gmra.mxu1 %v232_v13 }
  0xe5   :  { %v157_v15 = vpop.f32.mrf.mxu0  ;;  %v165_v16 = vpop.f32.mrf.mxu1 }
  0xe6   :  { %v158_v17 = vadd.f32 %v185_v14, %v157_v15  ;;  %v166_v18 = vadd.f32 %v185_v14, %v165_v16 }
  0xe7   :  { %v159_v19 = vpop.f32.mrf.mxu0  ;;  %v167_v20 = vpop.f32.mrf.mxu1 }
  0xe8   :  { %v172_v21 = vmax.f32 %v158_v17, 0.0  ;;  %v174_v22 = vmax.f32 %v166_v18, 0.0 }
  0xe9   :  { %v160_v23 = vpop.f32.mrf.mxu0  ;;  %v168_v24 = vpop.f32.mrf.mxu1 }
  0xea   :  { %177 = vst.msk [vmem:[%s317_s3] sm:$0xff] %vm176_vm1, %v172_v21  ;;  %179 = vst.msk [vmem:[%s317_s3 + $0x10] sm:$0xff] %vm176_vm1, %v174_v22  ;;  %v161_v25 = vadd.f32 %v185_v14, %v160_v23  ;;  %v169_v26 = vadd.f32 %v185_v14, %v168_v24 }
  0xeb   :  { %v162_v27 = vpop.f32.mrf.mxu0  ;;  %v170_v28 = vpop.f32.mrf.mxu1 }
  0xec   :  { %v173_v29 = vmax.f32 %v161_v25, 0.0  ;;  %v175_v30 = vmax.f32 %v169_v26, 0.0 }
  0xee   :  { %178 = vst.msk [vmem:[%s317_s3 + $0x8] sm:$0xff] %vm176_vm1, %v173_v29  ;;  %180 = vst.msk [vmem:[%s317_s3 + $0x18] sm:$0xff] %vm176_vm1, %v175_v30 }

// kernel: _lambda_.90
= control target key start
LH: loop header
LB: loop body
LE: loop exit
PB: predicated region body
PF: predicated region fallthrough
CT: control target
= control target key end

     0   :  { %v270_v0 = vmov 0   ;;  %vm140_vm0 = vcmask 523264   ;;  %s384_s1 = inlined_call_operand.vmem [shape: bf16[192,64], index: 1, kind: input, shape index: {}]   ;;  %s385_s0 = inlined_call_operand.vmem [shape: bf16[32,192], index: 0, kind: input, shape index: {}]   ;;  %s386_s2 = inlined_call_operand.vmem [shape: f32[1,64], index: 2, kind: input, shape index: {}]   ;;  %s387_s3 = inlined_call_operand.vmem [shape: f32[32,64], index: 3, kind: output, shape index: {}]  }
   0x1   :  { %147 = vmatprep.subr.bf16.mxu0 %v270_v0  ;;  %227 = vmatprep.subr.bf16.mxu1 %v270_v0  ;;  %v252_v1 = vld [vmem:[%s384_s1 + $0x38] sm:$0xff]   ;;  %v253_v2 = vld [vmem:[%s384_s1 + $0x30] sm:$0xff]   ;;  %v254_v3 = vld [vmem:[%s384_s1 + $0x28] sm:$0xff]  }
   0x2   :  { %148 = vmatpush1.bf16.msra.mxu0 %v252_v1  ;;  %239 = vmatpush1.bf16.msra.mxu1 %v252_v1  ;;  %v255_v4 = vld [vmem:[%s384_s1 + $0x20] sm:$0xff]   ;;  %v256_v6 = vld [vmem:[%s384_s1 + $0x18] sm:$0xff]   ;;  %v257_v8 = vld [vmem:[%s384_s1 + $0x10] sm:$0xff]  }
   0x3   :  { %149 = vmatprep.subr.bf16.mxu0 %v270_v0  ;;  %228 = vmatprep.subr.bf16.mxu1 %v270_v0  ;;  %v266_v5 = vld [vmem:[%s385_s0 + $0x4] ss:$8 sps:$4 sm:$0xff]   ;;  %v269_v7 = vld [vmem:[%s385_s0 + $0x14] ss:$8 sps:$4 sm:$0xff]   ;;  %v264_v15 = vld [vmem:[%s385_s0] ss:$8 sps:$4 sm:$0xff]  }
   0x4   :  { %225 = vmatprep.mubr.msk.bf16.mxu0 %vm140_vm0, %v266_v5  ;;  %226 = vmatprep.mubr.msk.bf16.mxu1 %vm140_vm0, %v269_v7  ;;  %v258_v9 = vld [vmem:[%s384_s1 + $0x8] sm:$0xff]   ;;  %v259_v10 = vld [vmem:[%s384_s1] sm:$0xff]   ;;  %v260_v11 = vld [vmem:[%s384_s1 + $0x58] sm:$0xff]  }
   0x5   :  { %v261_v12 = vld [vmem:[%s384_s1 + $0x50] sm:$0xff]   ;;  %v262_v13 = vld [vmem:[%s384_s1 + $0x48] sm:$0xff]   ;;  %v263_v14 = vld [vmem:[%s384_s1 + $0x40] sm:$0xff]  }
   0x6   :  { %150 = vmatpush1.bf16.msra.mxu0 %v253_v2  ;;  %240 = vmatpush1.bf16.msra.mxu1 %v253_v2  ;;  %v267_v16 = vld [vmem:[%s385_s0 + $0x10] ss:$8 sps:$4 sm:$0xff]   ;;  %v208_v17 = vld [vmem:[%s386_s2] ss:$0 sm:$0xff] }
   0x7   :  { %151 = vmatprep.subr.bf16.mxu0 %v270_v0  ;;  %229 = vmatprep.subr.bf16.mxu1 %v270_v0 }
   0xa   :  { %152 = vmatpush1.bf16.msra.mxu0 %v254_v3  ;;  %241 = vmatpush1.bf16.msra.mxu1 %v254_v3 }
   0xb   :  { %153 = vmatprep.subr.bf16.mxu0 %v270_v0  ;;  %230 = vmatprep.subr.bf16.mxu1 %v270_v0 }
   0xe   :  { %154 = vmatpush1.bf16.msra.mxu0 %v255_v4  ;;  %242 = vmatpush1.bf16.msra.mxu1 %v255_v4 }
   0xf   :  { %155 = vmatprep.subr.bf16.mxu0 %v270_v0  ;;  %231 = vmatprep.subr.bf16.mxu1 %v270_v0 }
  0x12   :  { %156 = vmatpush1.bf16.msra.mxu0 %v256_v6  ;;  %243 = vmatpush1.bf16.msra.mxu1 %v256_v6 }
  0x13   :  { %157 = vmatprep.subr.bf16.mxu0 %v270_v0  ;;  %232 = vmatprep.subr.bf16.mxu1 %v270_v0 }
  0x16   :  { %158 = vmatpush1.bf16.msra.mxu0 %v257_v8  ;;  %244 = vmatpush1.bf16.msra.mxu1 %v257_v8 }
  0x17   :  { %159 = vmatprep.subr.bf16.mxu0 %v270_v0  ;;  %233 = vmatprep.subr.bf16.mxu1 %v270_v0 }
  0x1a   :  { %160 = vmatpush1.bf16.msra.mxu0 %v258_v9  ;;  %245 = vmatpush1.bf16.msra.mxu1 %v258_v9 }
  0x1b   :  { %161 = vmatprep.subr.bf16.mxu0 %v270_v0  ;;  %234 = vmatprep.subr.bf16.mxu1 %v270_v0 }
  0x1e   :  { %162 = vmatpush1.bf16.msra.mxu0 %v259_v10  ;;  %246 = vmatpush1.bf16.msra.mxu1 %v259_v10 }
  0x1f   :  { %171 = vmatprep.subr.bf16.mxu0 %v270_v0  ;;  %235 = vmatprep.subr.bf16.mxu1 %v270_v0 }
  0x22   :  { %172 = vmatpush2.bf16.msra.mxu0 %v260_v11  ;;  %247 = vmatpush2.bf16.msra.mxu1 %v260_v11 }
  0x23   :  { %173 = vmatprep.subr.bf16.mxu0 %v270_v0  ;;  %236 = vmatprep.subr.bf16.mxu1 %v270_v0 }
  0x26   :  { %174 = vmatpush2.bf16.msra.mxu0 %v261_v12  ;;  %248 = vmatpush2.bf16.msra.mxu1 %v261_v12 }
  0x27   :  { %175 = vmatprep.subr.bf16.mxu0 %v270_v0  ;;  %237 = vmatprep.subr.bf16.mxu1 %v270_v0 }
  0x2a   :  { %176 = vmatpush2.bf16.msra.mxu0 %v262_v13  ;;  %249 = vmatpush2.bf16.msra.mxu1 %v262_v13 }
  0x2b   :  { %177 = vmatprep.subr.bf16.mxu0 %v270_v0  ;;  %238 = vmatprep.subr.bf16.mxu1 %v270_v0 }
  0x2e   :  { %178 = vmatpush2.bf16.msra.mxu0 %v263_v14  ;;  %250 = vmatpush2.bf16.msra.mxu1 %v263_v14 }
  0x31   :  { %180 = vmatmul.mubr.bf16.vlgmr.msra.gmra.mxu0 %v264_v15  ;;  %188 = vmatmul.mubr.bf16.vlgmr.msra.gmra.mxu1 %v267_v16 }
  0xf1   :  { %v181_v18 = vpop.f32.mrf.mxu0  ;;  %v189_v19 = vpop.f32.mrf.mxu1 }
  0xf2   :  { %v182_v20 = vadd.f32 %v208_v17, %v181_v18  ;;  %v190_v21 = vadd.f32 %v208_v17, %v189_v19 }
  0xf3   :  { %v183_v22 = vpop.f32.mrf.mxu0  ;;  %v191_v23 = vpop.f32.mrf.mxu1 }
  0xf4   :  { %v196_v24 = vmax.f32 %v182_v20, 0.0  ;;  %v198_v25 = vmax.f32 %v190_v21, 0.0 }
  0xf5   :  { %v184_v26 = vpop.f32.mrf.mxu0  ;;  %v192_v27 = vpop.f32.mrf.mxu1 }
  0xf6   :  { %200 = vst.msk [vmem:[%s387_s3] sm:$0xff] %vm140_vm0, %v196_v24  ;;  %202 = vst.msk [vmem:[%s387_s3 + $0x10] sm:$0xff] %vm140_vm0, %v198_v25  ;;  %v185_v28 = vadd.f32 %v208_v17, %v184_v26  ;;  %v193_v29 = vadd.f32 %v208_v17, %v192_v27 }
  0xf7   :  { %v186_v30 = vpop.f32.mrf.mxu0  ;;  %v194_v31 = vpop.f32.mrf.mxu1 }
  0xf8   :  { %v197_v32 = vmax.f32 %v185_v28, 0.0  ;;  %v199_v33 = vmax.f32 %v193_v29, 0.0 }
  0xfa   :  { %201 = vst.msk [vmem:[%s387_s3 + $0x8] sm:$0xff] %vm140_vm0, %v197_v32  ;;  %203 = vst.msk [vmem:[%s387_s3 + $0x18] sm:$0xff] %vm140_vm0, %v199_v33 }

// kernel: _lambda_.93
= control target key start
LH: loop header
LB: loop body
LE: loop exit
PB: predicated region body
PF: predicated region fallthrough
CT: control target
= control target key end

     0   :  { %v281_v0 = vmov 0   ;;  %vm143_vm0 = vcmask 523264   ;;  %s412_s1 = inlined_call_operand.vmem [shape: bf16[192,64], index: 1, kind: input, shape index: {}]   ;;  %s413_s0 = inlined_call_operand.vmem [shape: bf16[32,192], index: 0, kind: input, shape index: {}]   ;;  %s414_s2 = inlined_call_operand.vmem [shape: f32[1,64], index: 2, kind: input, shape index: {}]   ;;  %s415_s3 = inlined_call_operand.vmem [shape: f32[32,64], index: 3, kind: input, shape index: {}]   ;;  %s416_s4 = inlined_call_operand.vmem [shape: f32[32,64], index: 4, kind: output, shape index: {}]  }
   0x1   :  { %150 = vmatprep.subr.bf16.mxu0 %v281_v0  ;;  %238 = vmatprep.subr.bf16.mxu1 %v281_v0  ;;  %v263_v1 = vld [vmem:[%s412_s1 + $0x38] sm:$0xff]   ;;  %v264_v2 = vld [vmem:[%s412_s1 + $0x30] sm:$0xff]   ;;  %v265_v3 = vld [vmem:[%s412_s1 + $0x28] sm:$0xff]  }
   0x2   :  { %151 = vmatpush1.bf16.msra.mxu0 %v263_v1  ;;  %250 = vmatpush1.bf16.msra.mxu1 %v263_v1  ;;  %v266_v4 = vld [vmem:[%s412_s1 + $0x20] sm:$0xff]   ;;  %v267_v6 = vld [vmem:[%s412_s1 + $0x18] sm:$0xff]   ;;  %v268_v8 = vld [vmem:[%s412_s1 + $0x10] sm:$0xff]  }
   0x3   :  { %152 = vmatprep.subr.bf16.mxu0 %v281_v0  ;;  %239 = vmatprep.subr.bf16.mxu1 %v281_v0  ;;  %v277_v5 = vld [vmem:[%s413_s0 + $0x4] ss:$8 sps:$4 sm:$0xff]   ;;  %v280_v7 = vld [vmem:[%s413_s0 + $0x14] ss:$8 sps:$4 sm:$0xff]   ;;  %v275_v15 = vld [vmem:[%s413_s0] ss:$8 sps:$4 sm:$0xff]  }
   0x4   :  { %236 = vmatprep.mubr.msk.bf16.mxu0 %vm143_vm0, %v277_v5  ;;  %237 = vmatprep.mubr.msk.bf16.mxu1 %vm143_vm0, %v280_v7  ;;  %v269_v9 = vld [vmem:[%s412_s1 + $0x8] sm:$0xff]   ;;  %v270_v10 = vld [vmem:[%s412_s1] sm:$0xff]   ;;  %v271_v11 = vld [vmem:[%s412_s1 + $0x58] sm:$0xff]  }
   0x5   :  { %v272_v12 = vld [vmem:[%s412_s1 + $0x50] sm:$0xff]   ;;  %v273_v13 = vld [vmem:[%s412_s1 + $0x48] sm:$0xff]   ;;  %v274_v14 = vld [vmem:[%s412_s1 + $0x40] sm:$0xff]  }
   0x6   :  { %153 = vmatpush1.bf16.msra.mxu0 %v264_v2  ;;  %251 = vmatpush1.bf16.msra.mxu1 %v264_v2  ;;  %v278_v16 = vld [vmem:[%s413_s0 + $0x10] ss:$8 sps:$4 sm:$0xff]   ;;  %v219_v17 = vld [vmem:[%s414_s2] ss:$0 sm:$0xff]  ;;  %v200_v29 = vld [vmem:[%s415_s3 + $0x8] sm:$0xff] }
   0x7   :  { %154 = vmatprep.subr.bf16.mxu0 %v281_v0  ;;  %240 = vmatprep.subr.bf16.mxu1 %v281_v0  ;;  %v199_v19 = vld [vmem:[%s415_s3] sm:$0xff]  ;;  %v201_v21 = vld [vmem:[%s415_s3 + $0x10] sm:$0xff]  ;;  %v202_v31 = vld [vmem:[%s415_s3 + $0x18] sm:$0xff] }
   0xa   :  { %155 = vmatpush1.bf16.msra.mxu0 %v265_v3  ;;  %252 = vmatpush1.bf16.msra.mxu1 %v265_v3 }
   0xb   :  { %156 = vmatprep.subr.bf16.mxu0 %v281_v0  ;;  %241 = vmatprep.subr.bf16.mxu1 %v281_v0 }
   0xe   :  { %157 = vmatpush1.bf16.msra.mxu0 %v266_v4  ;;  %253 = vmatpush1.bf16.msra.mxu1 %v266_v4 }
   0xf   :  { %158 = vmatprep.subr.bf16.mxu0 %v281_v0  ;;  %242 = vmatprep.subr.bf16.mxu1 %v281_v0 }
  0x12   :  { %159 = vmatpush1.bf16.msra.mxu0 %v267_v6  ;;  %254 = vmatpush1.bf16.msra.mxu1 %v267_v6 }
  0x13   :  { %160 = vmatprep.subr.bf16.mxu0 %v281_v0  ;;  %243 = vmatprep.subr.bf16.mxu1 %v281_v0 }
  0x16   :  { %161 = vmatpush1.bf16.msra.mxu0 %v268_v8  ;;  %255 = vmatpush1.bf16.msra.mxu1 %v268_v8 }
  0x17   :  { %162 = vmatprep.subr.bf16.mxu0 %v281_v0  ;;  %244 = vmatprep.subr.bf16.mxu1 %v281_v0 }
  0x1a   :  { %163 = vmatpush1.bf16.msra.mxu0 %v269_v9  ;;  %256 = vmatpush1.bf16.msra.mxu1 %v269_v9 }
  0x1b   :  { %164 = vmatprep.subr.bf16.mxu0 %v281_v0  ;;  %245 = vmatprep.subr.bf16.mxu1 %v281_v0 }
  0x1e   :  { %165 = vmatpush1.bf16.msra.mxu0 %v270_v10  ;;  %257 = vmatpush1.bf16.msra.mxu1 %v270_v10 }
  0x1f   :  { %174 = vmatprep.subr.bf16.mxu0 %v281_v0  ;;  %246 = vmatprep.subr.bf16.mxu1 %v281_v0 }
  0x22   :  { %175 = vmatpush2.bf16.msra.mxu0 %v271_v11  ;;  %258 = vmatpush2.bf16.msra.mxu1 %v271_v11 }
  0x23   :  { %176 = vmatprep.subr.bf16.mxu0 %v281_v0  ;;  %247 = vmatprep.subr.bf16.mxu1 %v281_v0 }
  0x26   :  { %177 = vmatpush2.bf16.msra.mxu0 %v272_v12  ;;  %259 = vmatpush2.bf16.msra.mxu1 %v272_v12 }
  0x27   :  { %178 = vmatprep.subr.bf16.mxu0 %v281_v0  ;;  %248 = vmatprep.subr.bf16.mxu1 %v281_v0 }
  0x2a   :  { %179 = vmatpush2.bf16.msra.mxu0 %v273_v13  ;;  %260 = vmatpush2.bf16.msra.mxu1 %v273_v13 }
  0x2b   :  { %180 = vmatprep.subr.bf16.mxu0 %v281_v0  ;;  %249 = vmatprep.subr.bf16.mxu1 %v281_v0 }
  0x2e   :  { %181 = vmatpush2.bf16.msra.mxu0 %v274_v14  ;;  %261 = vmatpush2.bf16.msra.mxu1 %v274_v14 }
  0x31   :  { %183 = vmatmul.mubr.bf16.vlgmr.msra.gmra.mxu0 %v275_v15  ;;  %191 = vmatmul.mubr.bf16.vlgmr.msra.gmra.mxu1 %v278_v16 }
  0xf1   :  { %v184_v18 = vpop.f32.mrf.mxu0  ;;  %v192_v20 = vpop.f32.mrf.mxu1 }
  0xf2   :  { %v185_v22 = vadd.f32 %v219_v17, %v184_v18  ;;  %v193_v23 = vadd.f32 %v219_v17, %v192_v20 }
  0xf3   :  { %v186_v24 = vpop.f32.mrf.mxu0  ;;  %v194_v25 = vpop.f32.mrf.mxu1 }
  0xf4   :  { %v203_v26 = vadd.f32 %v199_v19, %v185_v22  ;;  %v205_v27 = vadd.f32 %v201_v21, %v193_v23 }
  0xf5   :  { %v187_v28 = vpop.f32.mrf.mxu0  ;;  %v195_v30 = vpop.f32.mrf.mxu1 }
  0xf6   :  { %v207_v32 = vmax.f32 %v203_v26, 0.0  ;;  %v209_v33 = vmax.f32 %v205_v27, 0.0  ;;  %v188_v34 = vadd.f32 %v219_v17, %v187_v28  ;;  %v196_v35 = vadd.f32 %v219_v17, %v195_v30 }
  0xf7   :  { %v189_v36 = vpop.f32.mrf.mxu0  ;;  %v197_v37 = vpop.f32.mrf.mxu1 }
  0xf8   :  { %211 = vst.msk [vmem:[%s416_s4] sm:$0xff] %vm143_vm0, %v207_v32  ;;  %213 = vst.msk [vmem:[%s416_s4 + $0x10] sm:$0xff] %vm143_vm0, %v209_v33  ;;  %v204_v38 = vadd.f32 %v200_v29, %v188_v34  ;;  %v206_v39 = vadd.f32 %v202_v31, %v196_v35 }
  0xfa   :  { %v208_v40 = vmax.f32 %v204_v38, 0.0  ;;  %v210_v41 = vmax.f32 %v206_v39, 0.0 }
  0xfc   :  { %212 = vst.msk [vmem:[%s416_s4 + $0x8] sm:$0xff] %vm143_vm0, %v208_v40  ;;  %214 = vst.msk [vmem:[%s416_s4 + $0x18] sm:$0xff] %vm143_vm0, %v210_v41 }

// kernel: _lambda_.111
= control target key start
LH: loop header
LB: loop body
LE: loop exit
PB: predicated region body
PF: predicated region fallthrough
CT: control target
= control target key end

     0   :  { %vm47_vm0 = vcmask 523264   ;;  %s111_s0 = inlined_call_operand.vmem [shape: f32[8,64], index: 0, kind: input, shape index: {}]   ;;  %s112_s1 = inlined_call_operand.vmem [shape: f32[8,64], index: 1, kind: input, shape index: {}]   ;;  %s113_s2 = inlined_call_operand.vmem [shape: f32[8,64], index: 2, kind: input, shape index: {}]   ;;  %s114_s3 = inlined_call_operand.vmem [shape: f32[8,64], index: 3, kind: input, shape index: {}]   ;;  %s115_s4 = inlined_call_operand.vmem [shape: f32[1,64], index: 4, kind: input, shape index: {}]   ;;  %s116_s5 = inlined_call_operand.vmem [shape: f32[1,64], index: 5, kind: input, shape index: {}]   ;;  %s117_s6 = inlined_call_operand.vmem [shape: f32[8,64], index: 6, kind: output, shape index: {}]  }
   0x1   :  { %v23_v0 = vld [vmem:[%s111_s0] sm:$0xff] }
   0x2   :  { %v24_v1 = vld [vmem:[%s112_s1] sm:$0xff] }
   0x3   :  { %v26_v2 = vld [vmem:[%s113_s2] sm:$0xff]  ;;  %v25_v3 = vmax.f32 %v23_v0, %v24_v1 }
   0x4   :  { %v27_v4 = vld [vmem:[%s114_s3] sm:$0xff] }
   0x5   :  { %v28_v5 = vmax.f32 %v26_v2, %v27_v4  ;;  %v53_v6 = vld [vmem:[%s115_s4] ss:$0 sm:$0xff] }
   0x6   :  { %v54_v8 = vld [vmem:[%s116_s5] ss:$0 sm:$0xff] }
   0x7   :  { %v29_v7 = vmax.f32 %v25_v3, %v28_v5 }
   0x9   :  { %v37_v9 = vmul.f32 %v53_v6, %v29_v7 }
   0xb   :  { %v45_v10 = vadd.f32 %v54_v8, %v37_v9 }
   0xd   :  { %v46_v11 = vmax.f32 %v45_v10, 0.0 }
   0xf   :  { %48 = vst.msk [vmem:[%s117_s6] sm:$0xff] %vm47_vm0, %v46_v11 }

// kernel: _lambda_.110
= control target key start
LH: loop header
LB: loop body
LE: loop exit
PB: predicated region body
PF: predicated region fallthrough
CT: control target
= control target key end

     0   :  { %v607_v35 = vmov 0.0   ;;  %vm608_vm0 = vmmov 0   ;;  %vm330_vm1 = vcmask 523264   ;;  %s754_s1 = inlined_call_operand.vmem [shape: bf16[576,64], index: 1, kind: input, shape index: {}]   ;;  %s755_s0 = inlined_call_operand.vmem [shape: bf16[8,576], index: 0, kind: input, shape index: {}]   ;;  %s756_s2 = inlined_call_operand.vmem [shape: f32[1,64], index: 2, kind: input, shape index: {}]   ;;  %s757_s3 = inlined_call_operand.vmem [shape: f32[8,64], index: 3, kind: output, shape index: {}]  }
   0x1   :  { %v566_v0 = vld [vmem:[%s754_s1 + $0x78] sm:$0xff]   ;;  %v570_v4 = vld [vmem:[%s754_s1 + $0x70] sm:$0xff]   ;;  %v574_v8 = vld [vmem:[%s754_s1 + $0x68] sm:$0xff]  }
   0x2   :  { %v567_v1 = vld [vmem:[%s754_s1 + $0x38] sm:$0xff]   ;;  %503 = vmatprep.subr.bf16.mxu0 %v566_v0  ;;  %v571_v5 = vld [vmem:[%s754_s1 + $0x30] sm:$0xff]   ;;  %v575_v9 = vld [vmem:[%s754_s1 + $0x28] sm:$0xff]  }
   0x3   :  { %v568_v2 = vld [vmem:[%s754_s1 + $0xf8] sm:$0xff]   ;;  %504 = vmatpush3.bf16.msra.mxu0 %v567_v1  ;;  %v572_v6 = vld [vmem:[%s754_s1 + $0xf0] sm:$0xff]   ;;  %v576_v10 = vld [vmem:[%s754_s1 + $0xe8] sm:$0xff]  }
   0x4   :  { %v569_v3 = vld [vmem:[%s754_s1 + $0xb8] sm:$0xff]   ;;  %525 = vmatprep.subr.bf16.mxu1 %v568_v2  ;;  %505 = vmatprep.subr.bf16.mxu0 %v570_v4  ;;  %v573_v7 = vld [vmem:[%s754_s1 + $0xb0] sm:$0xff]   ;;  %v577_v11 = vld [vmem:[%s754_s1 + $0xa8] sm:$0xff]  }
   0x5   :  { %526 = vmatpush3.bf16.msra.mxu1 %v569_v3  ;;  %v578_v12 = vld [vmem:[%s754_s1 + $0x60] sm:$0xff]   ;;  %v582_v16 = vld [vmem:[%s754_s1 + $0x58] sm:$0xff]   ;;  %v586_v20 = vld [vmem:[%s754_s1 + $0x50] sm:$0xff]  }
   0x6   :  { %527 = vmatprep.subr.bf16.mxu1 %v572_v6  ;;  %v579_v13 = vld [vmem:[%s754_s1 + $0x20] sm:$0xff]   ;;  %v583_v17 = vld [vmem:[%s754_s1 + $0x18] sm:$0xff]   ;;  %v587_v21 = vld [vmem:[%s754_s1 + $0x10] sm:$0xff]  }
   0x7   :  { %506 = vmatpush3.bf16.msra.mxu0 %v571_v5  ;;  %v580_v14 = vld [vmem:[%s754_s1 + $0xe0] sm:$0xff]   ;;  %v584_v18 = vld [vmem:[%s754_s1 + $0xd8] sm:$0xff]   ;;  %v588_v22 = vld [vmem:[%s754_s1 + $0xd0] sm:$0xff]  }
   0x8   :  { %507 = vmatprep.subr.bf16.mxu0 %v574_v8  ;;  %v581_v15 = vld [vmem:[%s754_s1 + $0xa0] sm:$0xff]   ;;  %v585_v19 = vld [vmem:[%s754_s1 + $0x98] sm:$0xff]   ;;  %v589_v23 = vld [vmem:[%s754_s1 + $0x90] sm:$0xff]  }
   0x9   :  { %528 = vmatpush3.bf16.msra.mxu1 %v573_v7  ;;  %v590_v24 = vld [vmem:[%s754_s1 + $0x48] sm:$0xff]   ;;  %v594_v28 = vld [vmem:[%s754_s1 + $0x40] sm:$0xff]   ;;  %v603_v39 = vld [vmem:[%s754_s1 + $0x118] sm:$0xff]  }
   0xa   :  { %529 = vmatprep.subr.bf16.mxu1 %v576_v10  ;;  %v591_v25 = vld [vmem:[%s754_s1 + $0x8] sm:$0xff]   ;;  %v595_v29 = vld [vmem:[%s754_s1] sm:$0xff]   ;;  %v604_v40 = vld [vmem:[%s754_s1 + $0x110] sm:$0xff]  }
   0xb   :  { %508 = vmatpush3.bf16.msra.mxu0 %v575_v9  ;;  %v592_v26 = vld [vmem:[%s754_s1 + $0xc8] sm:$0xff]   ;;  %v596_v30 = vld [vmem:[%s754_s1 + $0xc0] sm:$0xff]   ;;  %v599_v43 = vld [vmem:[%s755_s0 + $0x10] ss:$0 sps:$4 sm:$0xff]  }
   0xc   :  { %509 = vmatprep.subr.bf16.mxu0 %v578_v12  ;;  %v593_v27 = vld [vmem:[%s754_s1 + $0x88] sm:$0xff]   ;;  %v15_v31 = vld [vmem:[%s755_s0] sm:$0xff] }
   0xd   :  { %530 = vmatpush3.bf16.msra.mxu1 %v577_v11  ;;  %v461_v32 = vcombine.low %v15_v31, %v15_v31  ;;  %v462_v33 = vcombine.high %v15_v31, %v15_v31  ;;  %v600_v34 = vld [vmem:[%s754_s1 + $0x80] sm:$0xff]   ;;  %v16_v36 = vld [vmem:[%s755_s0 + $0x8] sm:$0xff] }
   0xe   :  { %531 = vmatprep.subr.bf16.mxu1 %v580_v14  ;;  %v463_v37 = vcombine.low %v16_v36, %v16_v36  ;;  %v464_v38 = vcombine.high %v16_v36, %v16_v36  ;;  %v605_v41 = vld [vmem:[%s754_s1 + $0x108] sm:$0xff]   ;;  %v606_v42 = vld [vmem:[%s754_s1 + $0x100] sm:$0xff]  }
   0xf   :  { %510 = vmatpush3.bf16.msra.mxu0 %v579_v13  ;;  %366 = vmatprep.mubr.bf16.mxu0 %v462_v33  ;;  %v460_v52 = vld [vmem:[%s756_s2] ss:$0 sm:$0xff] }
  0x10   :  { %511 = vmatprep.subr.bf16.mxu0 %v582_v16  ;;  %406 = vmatprep.mubr.bf16.mxu1 %v464_v38 }
  0x11   :  { %532 = vmatpush3.bf16.msra.mxu1 %v581_v15 }
  0x12   :  { %533 = vmatprep.subr.bf16.mxu1 %v584_v18 }
  0x13   :  { %512 = vmatpush3.bf16.msra.mxu0 %v583_v17 }
  0x14   :  { %513 = vmatprep.subr.bf16.mxu0 %v586_v20 }
  0x15   :  { %534 = vmatpush3.bf16.msra.mxu1 %v585_v19 }
  0x16   :  { %535 = vmatprep.subr.bf16.mxu1 %v588_v22 }
  0x17   :  { %514 = vmatpush3.bf16.msra.mxu0 %v587_v21 }
  0x18   :  { %515 = vmatprep.subr.bf16.mxu0 %v590_v24 }
  0x19   :  { %536 = vmatpush3.bf16.msra.mxu1 %v589_v23 }
  0x1a   :  { %537 = vmatprep.subr.bf16.mxu1 %v592_v26 }
  0x1b   :  { %516 = vmatpush3.bf16.msra.mxu0 %v591_v25 }
  0x1c   :  { %517 = vmatprep.subr.bf16.mxu0 %v594_v28 }
  0x1d   :  { %538 = vmatpush3.bf16.msra.mxu1 %v593_v27 }
  0x1e   :  { %539 = vmatprep.subr.bf16.mxu1 %v596_v30 }
  0x1f   :  { %518 = vmatpush3.bf16.msra.mxu0 %v595_v29 }
  0x20   :  { %552 = vmatprep.subr.bf16.mxu0 %v607_v35 }
  0x21   :  { %540 = vmatpush3.bf16.msra.mxu1 %v600_v34 }
  0x22   :  { %367 = vmatmul.mubr.bf16.vlgmr.msra.gmra.mxu0 %v461_v32 }
  0x23   :  { %553 = vmatpush3.bf16.msra.mxu0 %v603_v39  ;;  %560 = vmatprep.mubr.msk.bf16.mxu0 %vm608_vm0, %v607_v35 }
  0x24   :  { %407 = vmatmul.mubr.bf16.vlgmr.msra.gmra.mxu1 %v463_v37  ;;  %554 = vmatprep.subr.bf16.mxu0 %v607_v35 }
  0x27   :  { %555 = vmatpush3.bf16.msra.mxu0 %v604_v40 }
  0x28   :  { %556 = vmatprep.subr.bf16.mxu0 %v607_v35 }
  0x2b   :  { %557 = vmatpush3.bf16.msra.mxu0 %v605_v41 }
  0x2c   :  { %558 = vmatprep.subr.bf16.mxu0 %v607_v35 }
  0x2f   :  { %559 = vmatpush3.bf16.msra.mxu0 %v606_v42 }
  0x32   :  { %561 = vmatmul.mubr.msk.bf16.vlgmr.msra.gmra.mxu0 %vm330_vm1, %v599_v43 }
  0xe2   :  { %v519_v44 = vpop.f32.mrf.mxu0 }
  0xe4   :  { %v520_v45 = vpop.f32.mrf.mxu0  ;;  %v541_v46 = vpop.f32.mrf.mxu1 }
  0xe5   :  { %v521_v51 = vadd.f32 %v520_v45, %v519_v44 }
  0xe6   :  { %v522_v47 = vpop.f32.mrf.mxu0  ;;  %v542_v48 = vpop.f32.mrf.mxu1 }
  0xe7   :  { %v369_v54 = vadd.f32 %v521_v51, %v460_v52  ;;  %v543_v55 = vadd.f32 %v542_v48, %v541_v46 }
  0xe8   :  { %v523_v49 = vpop.f32.mrf.mxu0  ;;  %v544_v50 = vpop.f32.mrf.mxu1 }
  0xe9   :  { %v409_v56 = vadd.f32 %v543_v55, %v369_v54 }
  0xea   :  { %v545_v53 = vpop.f32.mrf.mxu1 }
  0xf2   :  { %v448_v57 = vpop.f32.mrf.mxu0 }
  0xf3   :  { %v449_v58 = vadd.f32 %v448_v57, %v409_v56 }
  0xf4   :  { %v562_v59 = vpop.f32.mrf.mxu0 }
  0xf5   :  { %v454_v60 = vmax.f32 %v449_v58, 0.0 }
  0xf6   :  { %v451_v61 = vpop.f32.mrf.mxu0 }
  0xf7   :  { %455 = vst.msk [vmem:[%s757_s3] sm:$0xff] %vm330_vm1, %v454_v60 }
  0xf8   :  { %v563_v62 = vpop.f32.mrf.mxu0 }

// kernel: _lambda_.112
= control target key start
LH: loop header
LB: loop body
LE: loop exit
PB: predicated region body
PF: predicated region fallthrough
CT: control target
= control target key end

     0   :  { %v421_v0 = vmov 0.0   ;;  %vm422_vm0 = vmmov 0   ;;  %s527_s1 = inlined_call_operand.vmem [shape: bf16[384,128], index: 1, kind: input, shape index: {}]   ;;  %s528_s0 = inlined_call_operand.vmem [shape: bf16[8,384], index: 0, kind: input, shape index: {}]   ;;  %s529_s2 = inlined_call_operand.vmem [shape: f32[1,128], index: 2, kind: input, shape index: {}]   ;;  %s530_s3 = inlined_call_operand.vmem [shape: f32[8,128], index: 3, kind: output, shape index: {}]  }
   0x1   :  { %372 = vmatprep.subr.bf16.mxu1 %v421_v0  ;;  %v394_v1 = vld [vmem:[%s527_s1 + $0x78] sm:$0xff]   ;;  %388 = vmatprep.mubr.msk.bf16.mxu1 %vm422_vm0, %v421_v0  ;;  %v397_v4 = vld [vmem:[%s527_s1 + $0x70] sm:$0xff]   ;;  %v400_v7 = vld [vmem:[%s527_s1 + $0x68] sm:$0xff]  }
   0x2   :  { %v395_v2 = vld [vmem:[%s527_s1 + $0xb8] sm:$0xff]   ;;  %341 = vmatprep.subr.bf16.mxu0 %v394_v1  ;;  %v398_v5 = vld [vmem:[%s527_s1 + $0xb0] sm:$0xff]   ;;  %v401_v8 = vld [vmem:[%s527_s1 + $0xa8] sm:$0xff]  }
   0x3   :  { %v396_v3 = vld [vmem:[%s527_s1 + $0x38] sm:$0xff]   ;;  %373 = vmatpush3.bf16.msra.mxu1 %v395_v2  ;;  %v399_v6 = vld [vmem:[%s527_s1 + $0x30] sm:$0xff]   ;;  %v402_v9 = vld [vmem:[%s527_s1 + $0x28] sm:$0xff]  }
   0x4   :  { %342 = vmatpush3.bf16.msra.mxu0 %v396_v3  ;;  %374 = vmatprep.subr.bf16.mxu1 %v421_v0  ;;  %v403_v10 = vld [vmem:[%s527_s1 + $0x60] sm:$0xff]   ;;  %v406_v13 = vld [vmem:[%s527_s1 + $0x58] sm:$0xff]   ;;  %v409_v16 = vld [vmem:[%s527_s1 + $0x50] sm:$0xff]  }
   0x5   :  { %343 = vmatprep.subr.bf16.mxu0 %v397_v4  ;;  %v404_v11 = vld [vmem:[%s527_s1 + $0xa0] sm:$0xff]   ;;  %v407_v14 = vld [vmem:[%s527_s1 + $0x98] sm:$0xff]   ;;  %v410_v17 = vld [vmem:[%s527_s1 + $0x90] sm:$0xff]  }
   0x6   :  { %v405_v12 = vld [vmem:[%s527_s1 + $0x20] sm:$0xff]   ;;  %v408_v15 = vld [vmem:[%s527_s1 + $0x18] sm:$0xff]   ;;  %v411_v18 = vld [vmem:[%s527_s1 + $0x10] sm:$0xff]  }
   0x7   :  { %375 = vmatpush3.bf16.msra.mxu1 %v398_v5  ;;  %v412_v19 = vld [vmem:[%s527_s1 + $0x48] sm:$0xff]   ;;  %v15_v22 = vld [vmem:[%s528_s0] sm:$0xff] }
   0x8   :  { %344 = vmatpush3.bf16.msra.mxu0 %v399_v6  ;;  %376 = vmatprep.subr.bf16.mxu1 %v421_v0  ;;  %v413_v20 = vld [vmem:[%s527_s1 + $0x88] sm:$0xff]   ;;  %v415_v23 = vld [vmem:[%s527_s1 + $0x40] sm:$0xff]   ;;  %v315_v24 = vcombine.high %v15_v22, %v15_v22  ;;  %v314_v28 = vcombine.low %v15_v22, %v15_v22 }
   0x9   :  { %345 = vmatprep.subr.bf16.mxu0 %v400_v7  ;;  %v414_v21 = vld [vmem:[%s527_s1 + $0x8] sm:$0xff]   ;;  %v416_v25 = vld [vmem:[%s527_s1 + $0x80] sm:$0xff]  }
   0xa   :  { %259 = vmatprep.mubr.bf16.mxu0 %v315_v24  ;;  %v417_v26 = vld [vmem:[%s527_s1] sm:$0xff]   ;;  %v420_v27 = vld [vmem:[%s528_s0 + $0x8] ss:$0 sps:$4 sm:$0xff]  }
   0xb   :  { %377 = vmatpush3.bf16.msra.mxu1 %v401_v8  ;;  %v313_v32 = vld [vmem:[%s529_s2] ss:$0 sm:$0xff] }
   0xc   :  { %346 = vmatpush3.bf16.msra.mxu0 %v402_v9  ;;  %378 = vmatprep.subr.bf16.mxu1 %v421_v0 }
   0xd   :  { %347 = vmatprep.subr.bf16.mxu0 %v403_v10 }
   0xf   :  { %379 = vmatpush3.bf16.msra.mxu1 %v404_v11 }
  0x10   :  { %348 = vmatpush3.bf16.msra.mxu0 %v405_v12  ;;  %380 = vmatprep.subr.bf16.mxu1 %v421_v0 }
  0x11   :  { %349 = vmatprep.subr.bf16.mxu0 %v406_v13 }
  0x13   :  { %381 = vmatpush3.bf16.msra.mxu1 %v407_v14 }
  0x14   :  { %350 = vmatpush3.bf16.msra.mxu0 %v408_v15  ;;  %382 = vmatprep.subr.bf16.mxu1 %v421_v0 }
  0x15   :  { %351 = vmatprep.subr.bf16.mxu0 %v409_v16 }
  0x17   :  { %383 = vmatpush3.bf16.msra.mxu1 %v410_v17 }
  0x18   :  { %352 = vmatpush3.bf16.msra.mxu0 %v411_v18  ;;  %384 = vmatprep.subr.bf16.mxu1 %v421_v0 }
  0x19   :  { %353 = vmatprep.subr.bf16.mxu0 %v412_v19 }
  0x1b   :  { %385 = vmatpush3.bf16.msra.mxu1 %v413_v20 }
  0x1c   :  { %354 = vmatpush3.bf16.msra.mxu0 %v414_v21  ;;  %386 = vmatprep.subr.bf16.mxu1 %v421_v0 }
  0x1d   :  { %355 = vmatprep.subr.bf16.mxu0 %v415_v23 }
  0x1f   :  { %387 = vmatpush3.bf16.msra.mxu1 %v416_v25 }
  0x20   :  { %356 = vmatpush3.bf16.msra.mxu0 %v417_v26 }
  0x22   :  { %389 = vmatmul.mubr.bf16.vlgmr.msra.gmra.mxu1 %v420_v27 }
  0x23   :  { %260 = vmatmul.mubr.bf16.vlgmr.msra.gmra.mxu0 %v314_v28 }
  0xe2   :  { %v301_v29 = vpop.f32.mrf.mxu1 }
  0xe3   :  { %v357_v30 = vpop.f32.mrf.mxu0 }
  0xe4   :  { %v390_v31 = vpop.f32.mrf.mxu1 }
  0xe5   :  { %v358_v33 = vpop.f32.mrf.mxu0 }
  0xe6   :  { %v359_v34 = vadd.f32 %v358_v33, %v357_v30  ;;  %v304_v35 = vpop.f32.mrf.mxu1 }
  0xe7   :  { %v360_v36 = vpop.f32.mrf.mxu0 }
  0xe8   :  { %v262_v37 = vadd.f32 %v359_v34, %v313_v32  ;;  %v391_v38 = vpop.f32.mrf.mxu1 }
  0xe9   :  { %v361_v39 = vpop.f32.mrf.mxu0 }
  0xea   :  { %v302_v40 = vadd.f32 %v301_v29, %v262_v37 }
  0xec   :  { %v307_v41 = vmax.f32 %v302_v40, 0.0 }
  0xee   :  { %308 = vst [vmem:[%s530_s3] sm:$0xff] %v307_v41 }

// kernel: _lambda_.144
= control target key start
LH: loop header
LB: loop body
LE: loop exit
PB: predicated region body
PF: predicated region fallthrough
CT: control target
= control target key end

     0   :  { %v182_v0 = vmov 0.0   ;;  %vm183_vm0 = vmmov 0   ;;  %vm128_vm1 = vcmask 523264   ;;  %s237_s1 = inlined_call_operand.vmem [shape: bf16[128,64], index: 1, kind: input, shape index: {}]   ;;  %s238_s0 = inlined_call_operand.vmem [shape: bf16[8,128], index: 0, kind: input, shape index: {}]   ;;  %s239_s2 = inlined_call_operand.vmem [shape: f32[1,64], index: 2, kind: input, shape index: {}]   ;;  %s240_s3 = inlined_call_operand.vmem [shape: f32[8,64], index: 3, kind: output, shape index: {}]  }
   0x1   :  { %152 = vmatprep.subr.bf16.mxu0 %v182_v0  ;;  %v174_v1 = vld [vmem:[%s237_s1 + $0x38] sm:$0xff]   ;;  %168 = vmatprep.mubr.msk.bf16.mxu0 %vm183_vm0, %v182_v0  ;;  %v175_v2 = vld [vmem:[%s237_s1 + $0x30] sm:$0xff]   ;;  %v176_v3 = vld [vmem:[%s237_s1 + $0x28] sm:$0xff]  }
   0x2   :  { %153 = vmatpush3.bf16.msra.mxu0 %v174_v1  ;;  %v177_v4 = vld [vmem:[%s237_s1 + $0x20] sm:$0xff]   ;;  %v178_v5 = vld [vmem:[%s237_s1 + $0x18] sm:$0xff]   ;;  %v179_v6 = vld [vmem:[%s237_s1 + $0x10] sm:$0xff]  }
   0x3   :  { %154 = vmatprep.subr.bf16.mxu0 %v182_v0  ;;  %v180_v7 = vld [vmem:[%s237_s1 + $0x8] sm:$0xff]   ;;  %v181_v8 = vld [vmem:[%s237_s1] sm:$0xff]  }
   0x4   :  { %v15_v9 = vld [vmem:[%s238_s0] sm:$0xf] }
   0x5   :  { %v134_v10 = vld [vmem:[%s239_s2] ss:$0 sm:$0xff] }
   0x6   :  { %155 = vmatpush3.bf16.msra.mxu0 %v175_v2 }
   0x7   :  { %156 = vmatprep.subr.bf16.mxu0 %v182_v0 }
   0xa   :  { %157 = vmatpush3.bf16.msra.mxu0 %v176_v3 }
   0xb   :  { %158 = vmatprep.subr.bf16.mxu0 %v182_v0 }
   0xe   :  { %159 = vmatpush3.bf16.msra.mxu0 %v177_v4 }
   0xf   :  { %160 = vmatprep.subr.bf16.mxu0 %v182_v0 }
  0x12   :  { %161 = vmatpush3.bf16.msra.mxu0 %v178_v5 }
  0x13   :  { %162 = vmatprep.subr.bf16.mxu0 %v182_v0 }
  0x16   :  { %163 = vmatpush3.bf16.msra.mxu0 %v179_v6 }
  0x17   :  { %164 = vmatprep.subr.bf16.mxu0 %v182_v0 }
  0x1a   :  { %165 = vmatpush3.bf16.msra.mxu0 %v180_v7 }
  0x1b   :  { %166 = vmatprep.subr.bf16.mxu0 %v182_v0 }
  0x1e   :  { %167 = vmatpush3.bf16.msra.mxu0 %v181_v8 }
  0x21   :  { %169 = vmatmul.mubr.bf16.vlgmr.msra.gmra.mxu0 %v15_v9 }
  0xe1   :  { %v121_v11 = vpop.f32.mrf.mxu0 }
  0xe2   :  { %v122_v12 = vadd.f32 %v134_v10, %v121_v11 }
  0xe3   :  { %v170_v13 = vpop.f32.mrf.mxu0 }
  0xe4   :  { %v127_v14 = vmax.f32 %v122_v12, 0.0 }
  0xe5   :  { %v124_v15 = vpop.f32.mrf.mxu0 }
  0xe6   :  { %129 = vst.msk [vmem:[%s240_s3] sm:$0xff] %vm128_vm1, %v127_v14 }
  0xe7   :  { %v171_v16 = vpop.f32.mrf.mxu0 }

// kernel: _lambda_.115
= control target key start
LH: loop header
LB: loop body
LE: loop exit
PB: predicated region body
PF: predicated region fallthrough
CT: control target
= control target key end

     0   :  { %v426_v1 = vmov 0.0   ;;  %vm427_vm0 = vmmov 0   ;;  %s540_s1 = inlined_call_operand.vmem [shape: bf16[384,128], index: 1, kind: input, shape index: {}]   ;;  %s541_s0 = inlined_call_operand.vmem [shape: bf16[8,384], index: 0, kind: input, shape index: {}]   ;;  %s542_s2 = inlined_call_operand.vmem [shape: f32[1,128], index: 2, kind: input, shape index: {}]   ;;  %s543_s3 = inlined_call_operand.vmem [shape: f32[8,128], index: 3, kind: input, shape index: {}]   ;;  %s544_s4 = inlined_call_operand.vmem [shape: f32[8,128], index: 4, kind: output, shape index: {}]  }
   0x1   :  { %v399_v0 = vld [vmem:[%s540_s1 + $0x78] sm:$0xff]   ;;  %377 = vmatprep.subr.bf16.mxu1 %v426_v1  ;;  %393 = vmatprep.mubr.msk.bf16.mxu1 %vm427_vm0, %v426_v1  ;;  %v402_v4 = vld [vmem:[%s540_s1 + $0x70] sm:$0xff]   ;;  %v405_v7 = vld [vmem:[%s540_s1 + $0x68] sm:$0xff]  }
   0x2   :  { %v400_v2 = vld [vmem:[%s540_s1 + $0x38] sm:$0xff]   ;;  %346 = vmatprep.subr.bf16.mxu0 %v399_v0  ;;  %v403_v5 = vld [vmem:[%s540_s1 + $0x30] sm:$0xff]   ;;  %v406_v8 = vld [vmem:[%s540_s1 + $0x28] sm:$0xff]  }
   0x3   :  { %v401_v3 = vld [vmem:[%s540_s1 + $0xb8] sm:$0xff]   ;;  %347 = vmatpush3.bf16.msra.mxu0 %v400_v2  ;;  %v404_v6 = vld [vmem:[%s540_s1 + $0xb0] sm:$0xff]   ;;  %v407_v9 = vld [vmem:[%s540_s1 + $0xa8] sm:$0xff]  }
   0x4   :  { %378 = vmatpush3.bf16.msra.mxu1 %v401_v3  ;;  %348 = vmatprep.subr.bf16.mxu0 %v402_v4  ;;  %v408_v10 = vld [vmem:[%s540_s1 + $0x60] sm:$0xff]   ;;  %v411_v13 = vld [vmem:[%s540_s1 + $0x58] sm:$0xff]   ;;  %v414_v16 = vld [vmem:[%s540_s1 + $0x50] sm:$0xff]  }
   0x5   :  { %379 = vmatprep.subr.bf16.mxu1 %v426_v1  ;;  %v409_v11 = vld [vmem:[%s540_s1 + $0x20] sm:$0xff]   ;;  %v412_v14 = vld [vmem:[%s540_s1 + $0x18] sm:$0xff]   ;;  %v415_v17 = vld [vmem:[%s540_s1 + $0x10] sm:$0xff]  }
   0x6   :  { %v410_v12 = vld [vmem:[%s540_s1 + $0xa0] sm:$0xff]   ;;  %v413_v15 = vld [vmem:[%s540_s1 + $0x98] sm:$0xff]   ;;  %v416_v18 = vld [vmem:[%s540_s1 + $0x90] sm:$0xff]  }
   0x7   :  { %349 = vmatpush3.bf16.msra.mxu0 %v403_v5  ;;  %v417_v19 = vld [vmem:[%s540_s1 + $0x48] sm:$0xff]   ;;  %v420_v22 = vld [vmem:[%s540_s1 + $0x40] sm:$0xff]  }
   0x8   :  { %380 = vmatpush3.bf16.msra.mxu1 %v404_v6  ;;  %350 = vmatprep.subr.bf16.mxu0 %v405_v7  ;;  %v418_v20 = vld [vmem:[%s540_s1 + $0x8] sm:$0xff]   ;;  %v18_v23 = vld [vmem:[%s541_s0] sm:$0xff] }
   0x9   :  { %381 = vmatprep.subr.bf16.mxu1 %v426_v1  ;;  %v419_v21 = vld [vmem:[%s540_s1 + $0x88] sm:$0xff]   ;;  %v320_v24 = vcombine.high %v18_v23, %v18_v23  ;;  %v421_v25 = vld [vmem:[%s540_s1] sm:$0xff]   ;;  %v319_v27 = vcombine.low %v18_v23, %v18_v23 }
   0xa   :  { %v422_v26 = vld [vmem:[%s540_s1 + $0x80] sm:$0xff]   ;;  %v425_v28 = vld [vmem:[%s541_s0 + $0x8] ss:$0 sps:$4 sm:$0xff]  }
   0xb   :  { %351 = vmatpush3.bf16.msra.mxu0 %v406_v8  ;;  %262 = vmatprep.mubr.bf16.mxu0 %v320_v24  ;;  %v318_v31 = vld [vmem:[%s542_s2] ss:$0 sm:$0xff] }
   0xc   :  { %382 = vmatpush3.bf16.msra.mxu1 %v407_v9  ;;  %352 = vmatprep.subr.bf16.mxu0 %v408_v10  ;;  %v310_v38 = vld [vmem:[%s543_s3] sm:$0xff] }
   0xd   :  { %383 = vmatprep.subr.bf16.mxu1 %v426_v1 }
   0xf   :  { %353 = vmatpush3.bf16.msra.mxu0 %v409_v11 }
  0x10   :  { %384 = vmatpush3.bf16.msra.mxu1 %v410_v12  ;;  %354 = vmatprep.subr.bf16.mxu0 %v411_v13 }
  0x11   :  { %385 = vmatprep.subr.bf16.mxu1 %v426_v1 }
  0x13   :  { %355 = vmatpush3.bf16.msra.mxu0 %v412_v14 }
  0x14   :  { %386 = vmatpush3.bf16.msra.mxu1 %v413_v15  ;;  %356 = vmatprep.subr.bf16.mxu0 %v414_v16 }
  0x15   :  { %387 = vmatprep.subr.bf16.mxu1 %v426_v1 }
  0x17   :  { %357 = vmatpush3.bf16.msra.mxu0 %v415_v17 }
  0x18   :  { %388 = vmatpush3.bf16.msra.mxu1 %v416_v18  ;;  %358 = vmatprep.subr.bf16.mxu0 %v417_v19 }
  0x19   :  { %389 = vmatprep.subr.bf16.mxu1 %v426_v1 }
  0x1b   :  { %359 = vmatpush3.bf16.msra.mxu0 %v418_v20 }
  0x1c   :  { %390 = vmatpush3.bf16.msra.mxu1 %v419_v21  ;;  %360 = vmatprep.subr.bf16.mxu0 %v420_v22 }
  0x1d   :  { %391 = vmatprep.subr.bf16.mxu1 %v426_v1 }
  0x1f   :  { %361 = vmatpush3.bf16.msra.mxu0 %v421_v25 }
  0x20   :  { %392 = vmatpush3.bf16.msra.mxu1 %v422_v26 }
  0x22   :  { %263 = vmatmul.mubr.bf16.vlgmr.msra.gmra.mxu0 %v319_v27 }
  0x23   :  { %394 = vmatmul.mubr.bf16.vlgmr.msra.gmra.mxu1 %v425_v28 }
  0xe2   :  { %v362_v29 = vpop.f32.mrf.mxu0 }
  0xe3   :  { %v304_v30 = vpop.f32.mrf.mxu1 }
  0xe4   :  { %v363_v32 = vpop.f32.mrf.mxu0 }
  0xe5   :  { %v364_v33 = vadd.f32 %v363_v32, %v362_v29  ;;  %v395_v34 = vpop.f32.mrf.mxu1 }
  0xe6   :  { %v365_v35 = vpop.f32.mrf.mxu0 }
  0xe7   :  { %v265_v36 = vadd.f32 %v364_v33, %v318_v31  ;;  %v307_v37 = vpop.f32.mrf.mxu1 }
  0xe8   :  { %v366_v39 = vpop.f32.mrf.mxu0 }
  0xe9   :  { %v305_v40 = vadd.f32 %v304_v30, %v265_v36  ;;  %v396_v41 = vpop.f32.mrf.mxu1 }
  0xeb   :  { %v311_v42 = vadd.f32 %v310_v38, %v305_v40 }
  0xed   :  { %v312_v43 = vmax.f32 %v311_v42, 0.0 }
  0xef   :  { %313 = vst [vmem:[%s544_s4] sm:$0xff] %v312_v43 }

// kernel: _lambda_.147
= control target key start
LH: loop header
LB: loop body
LE: loop exit
PB: predicated region body
PF: predicated region fallthrough
CT: control target
= control target key end

     0   :  { %vm375_vm0 = vcmask 523264   ;;  %s626_s1 = inlined_call_operand.vmem [shape: bf16[512,64], index: 1, kind: input, shape index: {}]   ;;  %s627_s0 = inlined_call_operand.vmem [shape: bf16[8,512], index: 0, kind: input, shape index: {}]   ;;  %s628_s2 = inlined_call_operand.vmem [shape: f32[1,64], index: 2, kind: input, shape index: {}]   ;;  %s629_s3 = inlined_call_operand.vmem [shape: f32[8,64], index: 3, kind: output, shape index: {}]  }
   0x1   :  { %v462_v0 = vld [vmem:[%s626_s1 + $0x78] sm:$0xff]   ;;  %v466_v4 = vld [vmem:[%s626_s1 + $0x70] sm:$0xff]   ;;  %v470_v8 = vld [vmem:[%s626_s1 + $0x68] sm:$0xff]  }
   0x2   :  { %v463_v1 = vld [vmem:[%s626_s1 + $0xf8] sm:$0xff]   ;;  %418 = vmatprep.subr.bf16.mxu0 %v462_v0  ;;  %v467_v5 = vld [vmem:[%s626_s1 + $0xf0] sm:$0xff]   ;;  %v471_v9 = vld [vmem:[%s626_s1 + $0xe8] sm:$0xff]  }
   0x3   :  { %v464_v2 = vld [vmem:[%s626_s1 + $0x38] sm:$0xff]   ;;  %440 = vmatprep.subr.bf16.mxu1 %v463_v1  ;;  %v468_v6 = vld [vmem:[%s626_s1 + $0x30] sm:$0xff]   ;;  %v472_v10 = vld [vmem:[%s626_s1 + $0x28] sm:$0xff]  }
   0x4   :  { %v465_v3 = vld [vmem:[%s626_s1 + $0xb8] sm:$0xff]   ;;  %419 = vmatpush3.bf16.msra.mxu0 %v464_v2  ;;  %v469_v7 = vld [vmem:[%s626_s1 + $0xb0] sm:$0xff]   ;;  %v473_v11 = vld [vmem:[%s626_s1 + $0xa8] sm:$0xff]  }
   0x5   :  { %441 = vmatpush3.bf16.msra.mxu1 %v465_v3  ;;  %420 = vmatprep.subr.bf16.mxu0 %v466_v4  ;;  %v474_v12 = vld [vmem:[%s626_s1 + $0x60] sm:$0xff]   ;;  %v478_v16 = vld [vmem:[%s626_s1 + $0x58] sm:$0xff]   ;;  %v482_v20 = vld [vmem:[%s626_s1 + $0x50] sm:$0xff]  }
   0x6   :  { %442 = vmatprep.subr.bf16.mxu1 %v467_v5  ;;  %v475_v13 = vld [vmem:[%s626_s1 + $0xe0] sm:$0xff]   ;;  %v479_v17 = vld [vmem:[%s626_s1 + $0xd8] sm:$0xff]   ;;  %v483_v21 = vld [vmem:[%s626_s1 + $0xd0] sm:$0xff]  }
   0x7   :  { %v476_v14 = vld [vmem:[%s626_s1 + $0x20] sm:$0xff]   ;;  %v480_v18 = vld [vmem:[%s626_s1 + $0x18] sm:$0xff]   ;;  %v484_v22 = vld [vmem:[%s626_s1 + $0x10] sm:$0xff]  }
   0x8   :  { %421 = vmatpush3.bf16.msra.mxu0 %v468_v6  ;;  %v477_v15 = vld [vmem:[%s626_s1 + $0xa0] sm:$0xff]   ;;  %v481_v19 = vld [vmem:[%s626_s1 + $0x98] sm:$0xff]   ;;  %v485_v23 = vld [vmem:[%s626_s1 + $0x90] sm:$0xff]  }
   0x9   :  { %443 = vmatpush3.bf16.msra.mxu1 %v469_v7  ;;  %422 = vmatprep.subr.bf16.mxu0 %v470_v8  ;;  %v486_v24 = vld [vmem:[%s626_s1 + $0x48] sm:$0xff]   ;;  %v490_v28 = vld [vmem:[%s626_s1 + $0x40] sm:$0xff]  }
   0xa   :  { %444 = vmatprep.subr.bf16.mxu1 %v471_v9  ;;  %v487_v25 = vld [vmem:[%s626_s1 + $0xc8] sm:$0xff]   ;;  %v491_v29 = vld [vmem:[%s626_s1 + $0xc0] sm:$0xff]  }
   0xb   :  { %v488_v26 = vld [vmem:[%s626_s1 + $0x8] sm:$0xff]   ;;  %v492_v30 = vld [vmem:[%s626_s1] sm:$0xff]  }
   0xc   :  { %423 = vmatpush3.bf16.msra.mxu0 %v472_v10  ;;  %v489_v27 = vld [vmem:[%s626_s1 + $0x88] sm:$0xff]   ;;  %v493_v31 = vld [vmem:[%s626_s1 + $0x80] sm:$0xff]  }
   0xd   :  { %445 = vmatpush3.bf16.msra.mxu1 %v473_v11  ;;  %424 = vmatprep.subr.bf16.mxu0 %v474_v12  ;;  %v15_v32 = vld [vmem:[%s627_s0] sm:$0xff]  ;;  %v16_v33 = vld [vmem:[%s627_s0 + $0x8] sm:$0xff] }
   0xe   :  { %446 = vmatprep.subr.bf16.mxu1 %v475_v13  ;;  %v382_v34 = vcombine.low %v15_v32, %v15_v32  ;;  %v383_v35 = vcombine.high %v15_v32, %v15_v32  ;;  %v384_v36 = vcombine.low %v16_v33, %v16_v33  ;;  %v385_v37 = vcombine.high %v16_v33, %v16_v33  ;;  %v381_v40 = vld [vmem:[%s628_s2] ss:$0 sm:$0xff] }
  0x10   :  { %425 = vmatpush3.bf16.msra.mxu0 %v476_v14  ;;  %326 = vmatprep.mubr.bf16.mxu0 %v383_v35 }
  0x11   :  { %447 = vmatpush3.bf16.msra.mxu1 %v477_v15  ;;  %426 = vmatprep.subr.bf16.mxu0 %v478_v16 }
  0x12   :  { %448 = vmatprep.subr.bf16.mxu1 %v479_v17  ;;  %366 = vmatprep.mubr.bf16.mxu1 %v385_v37 }
  0x14   :  { %427 = vmatpush3.bf16.msra.mxu0 %v480_v18 }
  0x15   :  { %449 = vmatpush3.bf16.msra.mxu1 %v481_v19  ;;  %428 = vmatprep.subr.bf16.mxu0 %v482_v20 }
  0x16   :  { %450 = vmatprep.subr.bf16.mxu1 %v483_v21 }
  0x18   :  { %429 = vmatpush3.bf16.msra.mxu0 %v484_v22 }
  0x19   :  { %451 = vmatpush3.bf16.msra.mxu1 %v485_v23  ;;  %430 = vmatprep.subr.bf16.mxu0 %v486_v24 }
  0x1a   :  { %452 = vmatprep.subr.bf16.mxu1 %v487_v25 }
  0x1c   :  { %431 = vmatpush3.bf16.msra.mxu0 %v488_v26 }
  0x1d   :  { %453 = vmatpush3.bf16.msra.mxu1 %v489_v27  ;;  %432 = vmatprep.subr.bf16.mxu0 %v490_v28 }
  0x1e   :  { %454 = vmatprep.subr.bf16.mxu1 %v491_v29 }
  0x20   :  { %433 = vmatpush3.bf16.msra.mxu0 %v492_v30 }
  0x21   :  { %455 = vmatpush3.bf16.msra.mxu1 %v493_v31 }
  0x23   :  { %327 = vmatmul.mubr.bf16.vlgmr.msra.gmra.mxu0 %v382_v34 }
  0x24   :  { %367 = vmatmul.mubr.bf16.vlgmr.msra.gmra.mxu1 %v384_v36 }
  0xe3   :  { %v434_v38 = vpop.f32.mrf.mxu0 }
  0xe4   :  { %v456_v39 = vpop.f32.mrf.mxu1 }
  0xe5   :  { %v435_v41 = vpop.f32.mrf.mxu0 }
  0xe6   :  { %v457_v42 = vpop.f32.mrf.mxu1  ;;  %v436_v43 = vadd.f32 %v435_v41, %v434_v38 }
  0xe7   :  { %v437_v44 = vpop.f32.mrf.mxu0  ;;  %v458_v47 = vadd.f32 %v457_v42, %v456_v39 }
  0xe8   :  { %v459_v45 = vpop.f32.mrf.mxu1  ;;  %v329_v46 = vadd.f32 %v436_v43, %v381_v40 }
  0xe9   :  { %v438_v48 = vpop.f32.mrf.mxu0 }
  0xea   :  { %v460_v49 = vpop.f32.mrf.mxu1  ;;  %v369_v50 = vadd.f32 %v458_v47, %v329_v46 }
  0xec   :  { %v374_v51 = vmax.f32 %v369_v50, 0.0 }
  0xee   :  { %376 = vst.msk [vmem:[%s629_s3] sm:$0xff] %vm375_vm0, %v374_v51 }

// kernel: _lambda_.156
= control target key start
LH: loop header
LB: loop body
LE: loop exit
PB: predicated region body
PF: predicated region fallthrough
CT: control target
= control target key end

     0   :  { %vm68_vm0 = vcmask 523264   ;;  %vm128_vm1 = vcmask 130048   ;;  %s223_s1 = inlined_call_operand.vmem [shape: bf16[64,16], index: 1, kind: input, shape index: {}]   ;;  %s224_s0 = inlined_call_operand.vmem [shape: bf16[32,64], index: 0, kind: input, shape index: {}]   ;;  %s225_s2 = inlined_call_operand.vmem [shape: f32[1,16], index: 2, kind: input, shape index: {}]   ;;  %s226_s3 = inlined_call_operand.vmem [shape: f32[32,16], index: 3, kind: output, shape index: {}]  }
   0x1   :  { %v164_v0 = vld [vmem:[%s223_s1 + $0x18] sm:$0xff]   ;;  %v165_v1 = vld [vmem:[%s223_s1 + $0x10] sm:$0xff]   ;;  %v166_v2 = vld [vmem:[%s223_s1 + $0x8] sm:$0xff]  }
   0x2   :  { %152 = vmatprep.subr.bf16.mxu0 %v164_v0  ;;  %v168_v3 = vld [vmem:[%s224_s0] sm:$0xff]   ;;  %v169_v5 = vld [vmem:[%s224_s0 + $0x8] sm:$0xff]  }
   0x3   :  { %153 = vmatpush3.bf16.msra.mxu0 %v164_v0  ;;  %160 = vmatprep.mubr.msk.bf16.mxu0 %vm68_vm0, %v168_v3  ;;  %v167_v4 = vld [vmem:[%s223_s1] sm:$0xff]  }
   0x4   :  { %154 = vmatprep.subr.bf16.mxu0 %v165_v1  ;;  %v137_v6 = vld [vmem:[%s225_s2] ss:$0 sm:$0xff] }
   0x7   :  { %155 = vmatpush3.bf16.msra.mxu0 %v165_v1 }
   0x8   :  { %156 = vmatprep.subr.bf16.mxu0 %v166_v2 }
   0xb   :  { %157 = vmatpush3.bf16.msra.mxu0 %v166_v2 }
   0xc   :  { %158 = vmatprep.subr.bf16.mxu0 %v167_v4 }
   0xf   :  { %159 = vmatpush3.bf16.msra.mxu0 %v167_v4 }
  0x12   :  { %161 = vmatmul.mubr.msk.bf16.vlgmr.msra.gmra.mxu0 %vm68_vm0, %v169_v5 }
  0xd2   :  { %v162_v7 = vpop.f32.mrf.mxu0 }
  0xd3   :  { %v118_v8 = vadd.f32 %v162_v7, %v137_v6 }
  0xd4   :  { %v109_v9 = vpop.f32.mrf.mxu0 }
  0xd5   :  { %v126_v10 = vmax.f32 %v118_v8, 0.0  ;;  %v110_v11 = vadd.f32 %v137_v6, %v109_v9 }
  0xd6   :  { %v163_v12 = vpop.f32.mrf.mxu0 }
  0xd7   :  { %131 = vst.msk [vmem:[%s226_s3 + $0x10] sm:$0xff] %vm128_vm1, %v126_v10  ;;  %v124_v13 = vmax.f32 %v110_v11, 0.0  ;;  %v121_v14 = vadd.f32 %v163_v12, %v137_v6 }
  0xd8   :  { %v112_v15 = vpop.f32.mrf.mxu0 }
  0xd9   :  { %129 = vst.msk [vmem:[%s226_s3] sm:$0xff] %vm128_vm1, %v124_v13  ;;  %v127_v16 = vmax.f32 %v121_v14, 0.0  ;;  %v113_v17 = vadd.f32 %v137_v6, %v112_v15 }
  0xdb   :  { %132 = vst.msk [vmem:[%s226_s3 + $0x18] sm:$0xff] %vm128_vm1, %v127_v16  ;;  %v125_v18 = vmax.f32 %v113_v17, 0.0 }
  0xdd   :  { %130 = vst.msk [vmem:[%s226_s3 + $0x8] sm:$0xff] %vm128_vm1, %v125_v18 }

// kernel: _lambda_.145
= control target key start
LH: loop header
LB: loop body
LE: loop exit
PB: predicated region body
PF: predicated region fallthrough
CT: control target
= control target key end

     0   :  { %vm199_vm0 = vcmask 523264   ;;  %s341_s1 = inlined_call_operand.vmem [shape: bf16[256,64], index: 1, kind: input, shape index: {}]   ;;  %s342_s0 = inlined_call_operand.vmem [shape: bf16[8,256], index: 0, kind: input, shape index: {}]   ;;  %s343_s2 = inlined_call_operand.vmem [shape: f32[1,64], index: 2, kind: input, shape index: {}]   ;;  %s344_s3 = inlined_call_operand.vmem [shape: f32[8,64], index: 3, kind: output, shape index: {}]  }
   0x1   :  { %v246_v0 = vld [vmem:[%s341_s1 + $0x78] sm:$0xff]   ;;  %v248_v2 = vld [vmem:[%s341_s1 + $0x70] sm:$0xff]   ;;  %v250_v4 = vld [vmem:[%s341_s1 + $0x68] sm:$0xff]  }
   0x2   :  { %v247_v1 = vld [vmem:[%s341_s1 + $0x38] sm:$0xff]   ;;  %224 = vmatprep.subr.bf16.mxu0 %v246_v0  ;;  %v249_v3 = vld [vmem:[%s341_s1 + $0x30] sm:$0xff]   ;;  %v251_v5 = vld [vmem:[%s341_s1 + $0x28] sm:$0xff]  }
   0x3   :  { %225 = vmatpush3.bf16.msra.mxu0 %v247_v1  ;;  %v252_v6 = vld [vmem:[%s341_s1 + $0x60] sm:$0xff]   ;;  %v254_v8 = vld [vmem:[%s341_s1 + $0x58] sm:$0xff]   ;;  %v256_v10 = vld [vmem:[%s341_s1 + $0x50] sm:$0xff]  }
   0x4   :  { %226 = vmatprep.subr.bf16.mxu0 %v248_v2  ;;  %v253_v7 = vld [vmem:[%s341_s1 + $0x20] sm:$0xff]   ;;  %v255_v9 = vld [vmem:[%s341_s1 + $0x18] sm:$0xff]   ;;  %v257_v13 = vld [vmem:[%s341_s1 + $0x10] sm:$0xff]  }
   0x5   :  { %v15_v11 = vld [vmem:[%s342_s0] sm:$0xff]  ;;  %v258_v14 = vld [vmem:[%s341_s1 + $0x48] sm:$0xff]  }
   0x6   :  { %v207_v12 = vcombine.high %v15_v11, %v15_v11  ;;  %v259_v15 = vld [vmem:[%s341_s1 + $0x8] sm:$0xff]   ;;  %v260_v16 = vld [vmem:[%s341_s1 + $0x40] sm:$0xff]   ;;  %v206_v18 = vcombine.low %v15_v11, %v15_v11 }
   0x7   :  { %227 = vmatpush3.bf16.msra.mxu0 %v249_v3  ;;  %v261_v17 = vld [vmem:[%s341_s1] sm:$0xff]  }
   0x8   :  { %228 = vmatprep.subr.bf16.mxu0 %v250_v4  ;;  %190 = vmatprep.mubr.bf16.mxu0 %v207_v12  ;;  %v205_v20 = vld [vmem:[%s343_s2] ss:$0 sm:$0xff] }
   0xb   :  { %229 = vmatpush3.bf16.msra.mxu0 %v251_v5 }
   0xc   :  { %230 = vmatprep.subr.bf16.mxu0 %v252_v6 }
   0xf   :  { %231 = vmatpush3.bf16.msra.mxu0 %v253_v7 }
  0x10   :  { %232 = vmatprep.subr.bf16.mxu0 %v254_v8 }
  0x13   :  { %233 = vmatpush3.bf16.msra.mxu0 %v255_v9 }
  0x14   :  { %234 = vmatprep.subr.bf16.mxu0 %v256_v10 }
  0x17   :  { %235 = vmatpush3.bf16.msra.mxu0 %v257_v13 }
  0x18   :  { %236 = vmatprep.subr.bf16.mxu0 %v258_v14 }
  0x1b   :  { %237 = vmatpush3.bf16.msra.mxu0 %v259_v15 }
  0x1c   :  { %238 = vmatprep.subr.bf16.mxu0 %v260_v16 }
  0x1f   :  { %239 = vmatpush3.bf16.msra.mxu0 %v261_v17 }
  0x22   :  { %191 = vmatmul.mubr.bf16.vlgmr.msra.gmra.mxu0 %v206_v18 }
  0xe2   :  { %v240_v19 = vpop.f32.mrf.mxu0 }
  0xe4   :  { %v241_v21 = vpop.f32.mrf.mxu0 }
  0xe5   :  { %v242_v22 = vadd.f32 %v241_v21, %v240_v19 }
  0xe6   :  { %v243_v23 = vpop.f32.mrf.mxu0 }
  0xe7   :  { %v193_v24 = vadd.f32 %v242_v22, %v205_v20 }
  0xe8   :  { %v244_v25 = vpop.f32.mrf.mxu0 }
  0xe9   :  { %v198_v26 = vmax.f32 %v193_v24, 0.0 }
  0xeb   :  { %200 = vst.msk [vmem:[%s344_s3] sm:$0xff] %vm199_vm0, %v198_v26 }

// kernel: _lambda_.158
= control target key start
LH: loop header
LB: loop body
LE: loop exit
PB: predicated region body
PF: predicated region fallthrough
CT: control target
= control target key end

     0   :  { %vm155_vm0 = vcmask 130048   ;;  %s280_s1 = inlined_call_operand.vmem [shape: bf16[128,16], index: 1, kind: input, shape index: {}]   ;;  %s281_s0 = inlined_call_operand.vmem [shape: bf16[32,128], index: 0, kind: input, shape index: {}]   ;;  %s282_s2 = inlined_call_operand.vmem [shape: f32[1,16], index: 2, kind: input, shape index: {}]   ;;  %s283_s3 = inlined_call_operand.vmem [shape: f32[32,16], index: 3, kind: output, shape index: {}]  }
   0x1   :  { %v205_v0 = vld [vmem:[%s280_s1 + $0x38] sm:$0xff]   ;;  %v206_v1 = vld [vmem:[%s280_s1 + $0x30] sm:$0xff]   ;;  %v207_v2 = vld [vmem:[%s280_s1 + $0x28] sm:$0xff]  }
   0x2   :  { %185 = vmatprep.subr.bf16.mxu0 %v205_v0  ;;  %v208_v3 = vld [vmem:[%s280_s1 + $0x20] sm:$0xff]   ;;  %v209_v5 = vld [vmem:[%s280_s1 + $0x18] sm:$0xff]   ;;  %v210_v6 = vld [vmem:[%s280_s1 + $0x10] sm:$0xff]  }
   0x3   :  { %186 = vmatpush3.bf16.msra.mxu0 %v205_v0  ;;  %v213_v4 = vld [vmem:[%s281_s0] sm:$0xff]   ;;  %v211_v7 = vld [vmem:[%s280_s1 + $0x8] sm:$0xff]  }
   0x4   :  { %187 = vmatprep.subr.bf16.mxu0 %v206_v1  ;;  %201 = vmatprep.mubr.bf16.mxu0 %v213_v4  ;;  %v212_v8 = vld [vmem:[%s280_s1] sm:$0xff]   ;;  %v214_v9 = vld [vmem:[%s281_s0 + $0x8] sm:$0xff]  }
   0x5   :  { %v164_v10 = vld [vmem:[%s282_s2] ss:$0 sm:$0xff] }
   0x7   :  { %188 = vmatpush3.bf16.msra.mxu0 %v206_v1 }
   0x8   :  { %189 = vmatprep.subr.bf16.mxu0 %v207_v2 }
   0xb   :  { %190 = vmatpush3.bf16.msra.mxu0 %v207_v2 }
   0xc   :  { %191 = vmatprep.subr.bf16.mxu0 %v208_v3 }
   0xf   :  { %192 = vmatpush3.bf16.msra.mxu0 %v208_v3 }
  0x10   :  { %193 = vmatprep.subr.bf16.mxu0 %v209_v5 }
  0x13   :  { %194 = vmatpush3.bf16.msra.mxu0 %v209_v5 }
  0x14   :  { %195 = vmatprep.subr.bf16.mxu0 %v210_v6 }
  0x17   :  { %196 = vmatpush3.bf16.msra.mxu0 %v210_v6 }
  0x18   :  { %197 = vmatprep.subr.bf16.mxu0 %v211_v7 }
  0x1b   :  { %198 = vmatpush3.bf16.msra.mxu0 %v211_v7 }
  0x1c   :  { %199 = vmatprep.subr.bf16.mxu0 %v212_v8 }
  0x1f   :  { %200 = vmatpush3.bf16.msra.mxu0 %v212_v8 }
  0x22   :  { %202 = vmatmul.mubr.bf16.vlgmr.msra.gmra.mxu0 %v214_v9 }
  0xe2   :  { %v203_v11 = vpop.f32.mrf.mxu0 }
  0xe3   :  { %v145_v12 = vadd.f32 %v203_v11, %v164_v10 }
  0xe4   :  { %v136_v13 = vpop.f32.mrf.mxu0 }
  0xe5   :  { %v153_v14 = vmax.f32 %v145_v12, 0.0  ;;  %v137_v15 = vadd.f32 %v164_v10, %v136_v13 }
  0xe6   :  { %v204_v16 = vpop.f32.mrf.mxu0 }
  0xe7   :  { %158 = vst.msk [vmem:[%s283_s3 + $0x10] sm:$0xff] %vm155_vm0, %v153_v14  ;;  %v151_v17 = vmax.f32 %v137_v15, 0.0  ;;  %v148_v18 = vadd.f32 %v204_v16, %v164_v10 }
  0xe8   :  { %v139_v19 = vpop.f32.mrf.mxu0 }
  0xe9   :  { %156 = vst.msk [vmem:[%s283_s3] sm:$0xff] %vm155_vm0, %v151_v17  ;;  %v154_v20 = vmax.f32 %v148_v18, 0.0  ;;  %v140_v21 = vadd.f32 %v164_v10, %v139_v19 }
  0xeb   :  { %159 = vst.msk [vmem:[%s283_s3 + $0x18] sm:$0xff] %vm155_vm0, %v154_v20  ;;  %v152_v22 = vmax.f32 %v140_v21, 0.0 }
  0xed   :  { %157 = vst.msk [vmem:[%s283_s3 + $0x8] sm:$0xff] %vm155_vm0, %v152_v22 }

// kernel: _lambda_.159
= control target key start
LH: loop header
LB: loop body
LE: loop exit
PB: predicated region body
PF: predicated region fallthrough
CT: control target
= control target key end

     0   :  { %vm227_vm0 = vcmask 130048   ;;  %s418_s1 = inlined_call_operand.vmem [shape: bf16[256,16], index: 1, kind: input, shape index: {}]   ;;  %s419_s0 = inlined_call_operand.vmem [shape: bf16[32,256], index: 0, kind: input, shape index: {}]   ;;  %s420_s2 = inlined_call_operand.vmem [shape: f32[1,16], index: 2, kind: input, shape index: {}]   ;;  %s421_s3 = inlined_call_operand.vmem [shape: f32[32,16], index: 3, kind: output, shape index: {}]  }
   0x1   :  { %v301_v0 = vld [vmem:[%s418_s1 + $0x78] sm:$0xff]   ;;  %v303_v2 = vld [vmem:[%s418_s1 + $0x70] sm:$0xff]   ;;  %v305_v4 = vld [vmem:[%s418_s1 + $0x68] sm:$0xff]  }
   0x2   :  { %v302_v1 = vld [vmem:[%s418_s1 + $0x38] sm:$0xff]   ;;  %257 = vmatprep.subr.bf16.mxu0 %v301_v0  ;;  %285 = vmatprep.subr.bf16.mxu1 %v301_v0  ;;  %v304_v3 = vld [vmem:[%s418_s1 + $0x30] sm:$0xff]   ;;  %v306_v5 = vld [vmem:[%s418_s1 + $0x28] sm:$0xff]  }
   0x3   :  { %258 = vmatpush3.bf16.msra.mxu0 %v302_v1  ;;  %293 = vmatpush3.bf16.msra.mxu1 %v302_v1  ;;  %v307_v6 = vld [vmem:[%s418_s1 + $0x60] sm:$0xff]   ;;  %v309_v8 = vld [vmem:[%s418_s1 + $0x58] sm:$0xff]   ;;  %v311_v10 = vld [vmem:[%s418_s1 + $0x50] sm:$0xff]  }
   0x4   :  { %259 = vmatprep.subr.bf16.mxu0 %v303_v2  ;;  %286 = vmatprep.subr.bf16.mxu1 %v303_v2  ;;  %v308_v7 = vld [vmem:[%s418_s1 + $0x20] sm:$0xff]   ;;  %v310_v9 = vld [vmem:[%s418_s1 + $0x18] sm:$0xff]   ;;  %v312_v13 = vld [vmem:[%s418_s1 + $0x10] sm:$0xff]  }
   0x5   :  { %v319_v11 = vld [vmem:[%s419_s0 + $0x4] ss:$8 sps:$4 sm:$0xff]   ;;  %v322_v12 = vld [vmem:[%s419_s0 + $0x14] ss:$8 sps:$4 sm:$0xff]   ;;  %v317_v18 = vld [vmem:[%s419_s0] ss:$8 sps:$4 sm:$0xff]  }
   0x6   :  { %v313_v14 = vld [vmem:[%s418_s1 + $0x48] sm:$0xff]   ;;  %206 = vmatprep.mubr.bf16.mxu0 %v319_v11  ;;  %214 = vmatprep.mubr.bf16.mxu1 %v322_v12  ;;  %v315_v16 = vld [vmem:[%s418_s1 + $0x40] sm:$0xff]   ;;  %v320_v19 = vld [vmem:[%s419_s0 + $0x10] ss:$8 sps:$4 sm:$0xff]  }
   0x7   :  { %260 = vmatpush3.bf16.msra.mxu0 %v304_v3  ;;  %294 = vmatpush3.bf16.msra.mxu1 %v304_v3  ;;  %v314_v15 = vld [vmem:[%s418_s1 + $0x8] sm:$0xff]   ;;  %v316_v17 = vld [vmem:[%s418_s1] sm:$0xff]  }
   0x8   :  { %261 = vmatprep.subr.bf16.mxu0 %v305_v4  ;;  %287 = vmatprep.subr.bf16.mxu1 %v305_v4  ;;  %v236_v22 = vld [vmem:[%s420_s2] ss:$0 sm:$0xff] }
   0xb   :  { %262 = vmatpush3.bf16.msra.mxu0 %v306_v5  ;;  %295 = vmatpush3.bf16.msra.mxu1 %v306_v5 }
   0xc   :  { %263 = vmatprep.subr.bf16.mxu0 %v307_v6  ;;  %288 = vmatprep.subr.bf16.mxu1 %v307_v6 }
   0xf   :  { %264 = vmatpush3.bf16.msra.mxu0 %v308_v7  ;;  %296 = vmatpush3.bf16.msra.mxu1 %v308_v7 }
  0x10   :  { %265 = vmatprep.subr.bf16.mxu0 %v309_v8  ;;  %289 = vmatprep.subr.bf16.mxu1 %v309_v8 }
  0x13   :  { %266 = vmatpush3.bf16.msra.mxu0 %v310_v9  ;;  %297 = vmatpush3.bf16.msra.mxu1 %v310_v9 }
  0x14   :  { %267 = vmatprep.subr.bf16.mxu0 %v311_v10  ;;  %290 = vmatprep.subr.bf16.mxu1 %v311_v10 }
  0x17   :  { %268 = vmatpush3.bf16.msra.mxu0 %v312_v13  ;;  %298 = vmatpush3.bf16.msra.mxu1 %v312_v13 }
  0x18   :  { %269 = vmatprep.subr.bf16.mxu0 %v313_v14  ;;  %291 = vmatprep.subr.bf16.mxu1 %v313_v14 }
  0x1b   :  { %270 = vmatpush3.bf16.msra.mxu0 %v314_v15  ;;  %299 = vmatpush3.bf16.msra.mxu1 %v314_v15 }
  0x1c   :  { %271 = vmatprep.subr.bf16.mxu0 %v315_v16  ;;  %292 = vmatprep.subr.bf16.mxu1 %v315_v16 }
  0x1f   :  { %272 = vmatpush3.bf16.msra.mxu0 %v316_v17  ;;  %300 = vmatpush3.bf16.msra.mxu1 %v316_v17 }
  0x22   :  { %207 = vmatmul.mubr.bf16.vlgmr.msra.gmra.mxu0 %v317_v18  ;;  %215 = vmatmul.mubr.bf16.vlgmr.msra.gmra.mxu1 %v320_v19 }
  0xe2   :  { %v273_v20 = vpop.f32.mrf.mxu0  ;;  %v279_v21 = vpop.f32.mrf.mxu1 }
  0xe4   :  { %v274_v23 = vpop.f32.mrf.mxu0  ;;  %v280_v24 = vpop.f32.mrf.mxu1 }
  0xe5   :  { %v275_v25 = vadd.f32 %v274_v23, %v273_v20  ;;  %v281_v26 = vadd.f32 %v280_v24, %v279_v21 }
  0xe6   :  { %v276_v27 = vpop.f32.mrf.mxu0  ;;  %v282_v28 = vpop.f32.mrf.mxu1 }
  0xe7   :  { %v209_v29 = vadd.f32 %v275_v25, %v236_v22  ;;  %v217_v30 = vadd.f32 %v281_v26, %v236_v22 }
  0xe8   :  { %v277_v31 = vpop.f32.mrf.mxu0  ;;  %v283_v32 = vpop.f32.mrf.mxu1 }
  0xe9   :  { %v223_v33 = vmax.f32 %v209_v29, 0.0  ;;  %v225_v34 = vmax.f32 %v217_v30, 0.0  ;;  %v278_v35 = vadd.f32 %v277_v31, %v276_v27  ;;  %v284_v36 = vadd.f32 %v283_v32, %v282_v28 }
  0xeb   :  { %228 = vst.msk [vmem:[%s421_s3] sm:$0xff] %vm227_vm0, %v223_v33  ;;  %230 = vst.msk [vmem:[%s421_s3 + $0x10] sm:$0xff] %vm227_vm0, %v225_v34  ;;  %v212_v37 = vadd.f32 %v278_v35, %v236_v22  ;;  %v220_v38 = vadd.f32 %v284_v36, %v236_v22 }
  0xed   :  { %v224_v39 = vmax.f32 %v212_v37, 0.0  ;;  %v226_v40 = vmax.f32 %v220_v38, 0.0 }
  0xef   :  { %229 = vst.msk [vmem:[%s421_s3 + $0x8] sm:$0xff] %vm227_vm0, %v224_v39  ;;  %231 = vst.msk [vmem:[%s421_s3 + $0x18] sm:$0xff] %vm227_vm0, %v226_v40 }

// kernel: _lambda_.160
= control target key start
LH: loop header
LB: loop body
LE: loop exit
PB: predicated region body
PF: predicated region fallthrough
CT: control target
= control target key end

     0   :  { %vm102_vm0 = vcmask 392192   ;;  %vm240_vm1 = vcmask 130048   ;;  %s459_s1 = inlined_call_operand.vmem [shape: bf16[48,16], index: 1, kind: input, shape index: {}]   ;;  %s460_s0 = inlined_call_operand.vmem [shape: bf16[128,48], index: 0, kind: input, shape index: {}]   ;;  %s461_s2 = inlined_call_operand.vmem [shape: f32[1,16], index: 2, kind: input, shape index: {}]   ;;  %s462_s3 = inlined_call_operand.vmem [shape: f32[128,16], index: 3, kind: output, shape index: {}]  }
   0x1   :  { %v320_v0 = vld [vmem:[%s459_s1 + $0x10] sm:$0xff]   ;;  %v321_v1 = vld [vmem:[%s459_s1 + $0x8] sm:$0xff]   ;;  %v322_v2 = vld [vmem:[%s459_s1] sm:$0xff]  }
   0x2   :  { %292 = vmatprep.subr.bf16.mxu0 %v320_v0  ;;  %314 = vmatprep.subr.bf16.mxu1 %v320_v0  ;;  %v323_v3 = vld [vmem:[%s460_s0] sm:$0xff]   ;;  %v325_v5 = vld [vmem:[%s460_s0 + $0x8] sm:$0xff]   ;;  %v327_v7 = vld [vmem:[%s460_s0 + $0x10] sm:$0xff]  }
   0x3   :  { %293 = vmatpush3.bf16.msra.mxu0 %v320_v0  ;;  %317 = vmatpush3.bf16.msra.mxu1 %v320_v0  ;;  %v324_v4 = vld [vmem:[%s460_s0 + $0x20] sm:$0xff]   ;;  %v326_v6 = vld [vmem:[%s460_s0 + $0x28] sm:$0xff]   ;;  %v328_v8 = vld [vmem:[%s460_s0 + $0x30] sm:$0xff]  }
   0x4   :  { %294 = vmatprep.subr.bf16.mxu0 %v321_v1  ;;  %315 = vmatprep.subr.bf16.mxu1 %v321_v1  ;;  %v329_v9 = vld [vmem:[%s460_s0 + $0x18] sm:$0xff]   ;;  %v261_v11 = vld [vmem:[%s461_s2] ss:$0 sm:$0xff] }
   0x5   :  { %298 = vmatprep.mubr.msk.bf16.mxu0 %vm102_vm0, %v323_v3  ;;  %306 = vmatprep.mubr.msk.bf16.mxu1 %vm102_vm0, %v324_v4  ;;  %v330_v10 = vld [vmem:[%s460_s0 + $0x38] sm:$0xff]  }
   0x7   :  { %295 = vmatpush3.bf16.msra.mxu0 %v321_v1  ;;  %318 = vmatpush3.bf16.msra.mxu1 %v321_v1 }
   0x8   :  { %296 = vmatprep.subr.bf16.mxu0 %v322_v2  ;;  %316 = vmatprep.subr.bf16.mxu1 %v322_v2 }
   0xb   :  { %297 = vmatpush3.bf16.msra.mxu0 %v322_v2  ;;  %319 = vmatpush3.bf16.msra.mxu1 %v322_v2 }
   0xe   :  { %299 = vmatmul.mubr.msk.bf16.vlgmr.msra.gmra.mxu0 %vm102_vm0, %v325_v5  ;;  %307 = vmatmul.mubr.msk.bf16.vlgmr.msra.gmra.mxu1 %vm102_vm0, %v326_v6 }
   0xf   :  { %302 = vmatprep.mubr.msk.bf16.mxu0 %vm102_vm0, %v327_v7  ;;  %310 = vmatprep.mubr.msk.bf16.mxu1 %vm102_vm0, %v328_v8 }
  0x16   :  { %303 = vmatmul.mubr.msk.bf16.gmra.mxu0 %vm102_vm0, %v329_v9  ;;  %311 = vmatmul.mubr.msk.bf16.gmra.mxu1 %vm102_vm0, %v330_v10 }
  0xce   :  { %v300_v12 = vpop.f32.mrf.mxu0  ;;  %v308_v13 = vpop.f32.mrf.mxu1 }
  0xcf   :  { %v170_v14 = vadd.f32 %v300_v12, %v261_v11  ;;  %v202_v15 = vadd.f32 %v308_v13, %v261_v11 }
  0xd0   :  { %v161_v16 = vpop.f32.mrf.mxu0  ;;  %v193_v17 = vpop.f32.mrf.mxu1 }
  0xd1   :  { %v226_v18 = vmax.f32 %v170_v14, 0.0  ;;  %v234_v19 = vmax.f32 %v202_v15, 0.0  ;;  %v162_v20 = vadd.f32 %v261_v11, %v161_v16  ;;  %v194_v21 = vadd.f32 %v261_v11, %v193_v17 }
  0xd2   :  { %v301_v22 = vpop.f32.mrf.mxu0  ;;  %v309_v23 = vpop.f32.mrf.mxu1 }
  0xd3   :  { %243 = vst.msk [vmem:[%s462_s3 + $0x10] sm:$0xff] %vm240_vm1, %v226_v18  ;;  %251 = vst.msk [vmem:[%s462_s3 + $0x50] sm:$0xff] %vm240_vm1, %v234_v19  ;;  %v224_v24 = vmax.f32 %v162_v20, 0.0  ;;  %v232_v25 = vmax.f32 %v194_v21, 0.0  ;;  %v173_v26 = vadd.f32 %v301_v22, %v261_v11  ;;  %v205_v27 = vadd.f32 %v309_v23, %v261_v11 }
  0xd4   :  { %v164_v28 = vpop.f32.mrf.mxu0  ;;  %v196_v29 = vpop.f32.mrf.mxu1 }
  0xd5   :  { %241 = vst.msk [vmem:[%s462_s3] sm:$0xff] %vm240_vm1, %v224_v24  ;;  %249 = vst.msk [vmem:[%s462_s3 + $0x40] sm:$0xff] %vm240_vm1, %v232_v25  ;;  %v227_v30 = vmax.f32 %v173_v26, 0.0  ;;  %v235_v31 = vmax.f32 %v205_v27, 0.0  ;;  %v165_v32 = vadd.f32 %v261_v11, %v164_v28  ;;  %v197_v33 = vadd.f32 %v261_v11, %v196_v29 }
  0xd6   :  { %v304_v34 = vpop.f32.mrf.mxu0  ;;  %v312_v35 = vpop.f32.mrf.mxu1 }
  0xd7   :  { %244 = vst.msk [vmem:[%s462_s3 + $0x18] sm:$0xff] %vm240_vm1, %v227_v30  ;;  %252 = vst.msk [vmem:[%s462_s3 + $0x58] sm:$0xff] %vm240_vm1, %v235_v31  ;;  %v225_v36 = vmax.f32 %v165_v32, 0.0  ;;  %v233_v37 = vmax.f32 %v197_v33, 0.0  ;;  %v186_v38 = vadd.f32 %v304_v34, %v261_v11  ;;  %v218_v39 = vadd.f32 %v312_v35, %v261_v11 }
  0xd8   :  { %v177_v40 = vpop.f32.mrf.mxu0  ;;  %v209_v41 = vpop.f32.mrf.mxu1 }
  0xd9   :  { %242 = vst.msk [vmem:[%s462_s3 + $0x8] sm:$0xff] %vm240_vm1, %v225_v36  ;;  %250 = vst.msk [vmem:[%s462_s3 + $0x48] sm:$0xff] %vm240_vm1, %v233_v37  ;;  %v230_v42 = vmax.f32 %v186_v38, 0.0  ;;  %v238_v43 = vmax.f32 %v218_v39, 0.0  ;;  %v178_v44 = vadd.f32 %v261_v11, %v177_v40  ;;  %v210_v45 = vadd.f32 %v261_v11, %v209_v41 }
  0xda   :  { %v305_v46 = vpop.f32.mrf.mxu0  ;;  %v313_v47 = vpop.f32.mrf.mxu1 }
  0xdb   :  { %247 = vst.msk [vmem:[%s462_s3 + $0x30] sm:$0xff] %vm240_vm1, %v230_v42  ;;  %255 = vst.msk [vmem:[%s462_s3 + $0x70] sm:$0xff] %vm240_vm1, %v238_v43  ;;  %v228_v48 = vmax.f32 %v178_v44, 0.0  ;;  %v236_v49 = vmax.f32 %v210_v45, 0.0  ;;  %v189_v50 = vadd.f32 %v305_v46, %v261_v11  ;;  %v221_v51 = vadd.f32 %v313_v47, %v261_v11 }
  0xdc   :  { %v180_v52 = vpop.f32.mrf.mxu0  ;;  %v212_v53 = vpop.f32.mrf.mxu1 }
  0xdd   :  { %245 = vst.msk [vmem:[%s462_s3 + $0x20] sm:$0xff] %vm240_vm1, %v228_v48  ;;  %253 = vst.msk [vmem:[%s462_s3 + $0x60] sm:$0xff] %vm240_vm1, %v236_v49  ;;  %v231_v54 = vmax.f32 %v189_v50, 0.0  ;;  %v239_v55 = vmax.f32 %v221_v51, 0.0  ;;  %v181_v56 = vadd.f32 %v261_v11, %v180_v52  ;;  %v213_v57 = vadd.f32 %v261_v11, %v212_v53 }
  0xdf   :  { %248 = vst.msk [vmem:[%s462_s3 + $0x38] sm:$0xff] %vm240_vm1, %v231_v54  ;;  %256 = vst.msk [vmem:[%s462_s3 + $0x78] sm:$0xff] %vm240_vm1, %v239_v55  ;;  %v229_v58 = vmax.f32 %v181_v56, 0.0  ;;  %v237_v59 = vmax.f32 %v213_v57, 0.0 }
  0xe1   :  { %246 = vst.msk [vmem:[%s462_s3 + $0x28] sm:$0xff] %vm240_vm1, %v229_v58  ;;  %254 = vst.msk [vmem:[%s462_s3 + $0x68] sm:$0xff] %vm240_vm1, %v237_v59 }

// kernel: _lambda_.171
= control target key start
LH: loop header
LB: loop body
LE: loop exit
PB: predicated region body
PF: predicated region fallthrough
CT: control target
= control target key end

     0   :  { %vm86_vm0 = vcmask 130048   ;;  %vm208_vm1 = vcmask 39936   ;;  %s407_s1 = inlined_call_operand.vmem [shape: bf16[16,5], index: 1, kind: input, shape index: {}]   ;;  %s408_s0 = inlined_call_operand.vmem [shape: bf16[128,16], index: 0, kind: input, shape index: {}]   ;;  %s409_s2 = inlined_call_operand.vmem [shape: f32[1,5], index: 2, kind: input, shape index: {}]   ;;  %s410_s3 = inlined_call_operand.vmem [shape: f32[128,5], index: 3, kind: output, shape index: {}]  }
   0x1   :  { %v276_v0 = vld [vmem:[%s407_s1] sm:$0xff]   ;;  %v279_v3 = vld [vmem:[%s408_s0 + $0x8] sm:$0xff]   ;;  %v281_v5 = vld [vmem:[%s408_s0 + $0x10] sm:$0xff]  }
   0x2   :  { %v277_v1 = vld [vmem:[%s408_s0] sm:$0xff]   ;;  %256 = vmatprep.subr.bf16.mxu0 %v276_v0  ;;  %274 = vmatprep.subr.bf16.mxu1 %v276_v0  ;;  %v280_v4 = vld [vmem:[%s408_s0 + $0x28] sm:$0xff]   ;;  %v282_v6 = vld [vmem:[%s408_s0 + $0x30] sm:$0xff]  }
   0x3   :  { %v278_v2 = vld [vmem:[%s408_s0 + $0x20] sm:$0xff]   ;;  %257 = vmatpush3.bf16.msra.mxu0 %v276_v0  ;;  %275 = vmatpush3.bf16.msra.mxu1 %v276_v0  ;;  %v283_v7 = vld [vmem:[%s408_s0 + $0x18] sm:$0xff]  }
   0x4   :  { %258 = vmatprep.mubr.msk.bf16.mxu0 %vm86_vm0, %v277_v1  ;;  %266 = vmatprep.mubr.msk.bf16.mxu1 %vm86_vm0, %v278_v2  ;;  %v284_v8 = vld [vmem:[%s408_s0 + $0x38] sm:$0xff]   ;;  %v229_v9 = vld [vmem:[%s409_s2] ss:$0 sm:$0xff] }
   0x6   :  { %259 = vmatmul.mubr.msk.bf16.vlgmr.msra.gmra.mxu0 %vm86_vm0, %v279_v3  ;;  %267 = vmatmul.mubr.msk.bf16.vlgmr.msra.gmra.mxu1 %vm86_vm0, %v280_v4 }
   0x7   :  { %262 = vmatprep.mubr.msk.bf16.mxu0 %vm86_vm0, %v281_v5  ;;  %270 = vmatprep.mubr.msk.bf16.mxu1 %vm86_vm0, %v282_v6 }
   0xe   :  { %263 = vmatmul.mubr.msk.bf16.gmra.mxu0 %vm86_vm0, %v283_v7  ;;  %271 = vmatmul.mubr.msk.bf16.gmra.mxu1 %vm86_vm0, %v284_v8 }
  0xc6   :  { %v260_v10 = vpop.f32.mrf.mxu0  ;;  %v268_v11 = vpop.f32.mrf.mxu1 }
  0xc7   :  { %v154_v12 = vadd.f32 %v260_v10, %v229_v9  ;;  %v186_v13 = vadd.f32 %v268_v11, %v229_v9 }
  0xc8   :  { %v145_v14 = vpop.f32.mrf.mxu0  ;;  %v177_v15 = vpop.f32.mrf.mxu1 }
  0xc9   :  { %211 = vst.msk [vmem:[%s410_s3 + $0x10] sm:$0xff] %vm208_vm1, %v154_v12  ;;  %219 = vst.msk [vmem:[%s410_s3 + $0x50] sm:$0xff] %vm208_vm1, %v186_v13  ;;  %v146_v16 = vadd.f32 %v229_v9, %v145_v14  ;;  %v178_v17 = vadd.f32 %v229_v9, %v177_v15 }
  0xca   :  { %v261_v18 = vpop.f32.mrf.mxu0  ;;  %v269_v19 = vpop.f32.mrf.mxu1 }
  0xcb   :  { %209 = vst.msk [vmem:[%s410_s3] sm:$0xff] %vm208_vm1, %v146_v16  ;;  %217 = vst.msk [vmem:[%s410_s3 + $0x40] sm:$0xff] %vm208_vm1, %v178_v17  ;;  %v157_v20 = vadd.f32 %v261_v18, %v229_v9  ;;  %v189_v21 = vadd.f32 %v269_v19, %v229_v9 }
  0xcc   :  { %v148_v22 = vpop.f32.mrf.mxu0  ;;  %v180_v23 = vpop.f32.mrf.mxu1 }
  0xcd   :  { %212 = vst.msk [vmem:[%s410_s3 + $0x18] sm:$0xff] %vm208_vm1, %v157_v20  ;;  %220 = vst.msk [vmem:[%s410_s3 + $0x58] sm:$0xff] %vm208_vm1, %v189_v21  ;;  %v149_v24 = vadd.f32 %v229_v9, %v148_v22  ;;  %v181_v25 = vadd.f32 %v229_v9, %v180_v23 }
  0xce   :  { %v264_v26 = vpop.f32.mrf.mxu0  ;;  %v272_v27 = vpop.f32.mrf.mxu1 }
  0xcf   :  { %210 = vst.msk [vmem:[%s410_s3 + $0x8] sm:$0xff] %vm208_vm1, %v149_v24  ;;  %218 = vst.msk [vmem:[%s410_s3 + $0x48] sm:$0xff] %vm208_vm1, %v181_v25  ;;  %v170_v28 = vadd.f32 %v264_v26, %v229_v9  ;;  %v202_v29 = vadd.f32 %v272_v27, %v229_v9 }
  0xd0   :  { %v161_v30 = vpop.f32.mrf.mxu0  ;;  %v193_v31 = vpop.f32.mrf.mxu1 }
  0xd1   :  { %215 = vst.msk [vmem:[%s410_s3 + $0x30] sm:$0xff] %vm208_vm1, %v170_v28  ;;  %223 = vst.msk [vmem:[%s410_s3 + $0x70] sm:$0xff] %vm208_vm1, %v202_v29  ;;  %v162_v32 = vadd.f32 %v229_v9, %v161_v30  ;;  %v194_v33 = vadd.f32 %v229_v9, %v193_v31 }
  0xd2   :  { %v265_v34 = vpop.f32.mrf.mxu0  ;;  %v273_v35 = vpop.f32.mrf.mxu1 }
  0xd3   :  { %213 = vst.msk [vmem:[%s410_s3 + $0x20] sm:$0xff] %vm208_vm1, %v162_v32  ;;  %221 = vst.msk [vmem:[%s410_s3 + $0x60] sm:$0xff] %vm208_vm1, %v194_v33  ;;  %v173_v36 = vadd.f32 %v265_v34, %v229_v9  ;;  %v205_v37 = vadd.f32 %v273_v35, %v229_v9 }
  0xd4   :  { %v164_v38 = vpop.f32.mrf.mxu0  ;;  %v196_v39 = vpop.f32.mrf.mxu1 }
  0xd5   :  { %216 = vst.msk [vmem:[%s410_s3 + $0x38] sm:$0xff] %vm208_vm1, %v173_v36  ;;  %224 = vst.msk [vmem:[%s410_s3 + $0x78] sm:$0xff] %vm208_vm1, %v205_v37  ;;  %v165_v40 = vadd.f32 %v229_v9, %v164_v38  ;;  %v197_v41 = vadd.f32 %v229_v9, %v196_v39 }
  0xd7   :  { %214 = vst.msk [vmem:[%s410_s3 + $0x28] sm:$0xff] %vm208_vm1, %v165_v40  ;;  %222 = vst.msk [vmem:[%s410_s3 + $0x68] sm:$0xff] %vm208_vm1, %v197_v41 }

// kernel: _lambda_.163
= control target key start
LH: loop header
LB: loop body
LE: loop exit
PB: predicated region body
PF: predicated region fallthrough
CT: control target
= control target key end

     0   :  { %vm105_vm0 = vcmask 392192   ;;  %vm275_vm1 = vcmask 130048   ;;  %s565_s1 = inlined_call_operand.vmem [shape: bf16[48,16], index: 1, kind: input, shape index: {}]   ;;  %s566_s0 = inlined_call_operand.vmem [shape: bf16[128,48], index: 0, kind: input, shape index: {}]   ;;  %s567_s2 = inlined_call_operand.vmem [shape: f32[1,16], index: 2, kind: input, shape index: {}]   ;;  %s568_s3 = inlined_call_operand.vmem [shape: f32[128,16], index: 3, kind: input, shape index: {}]   ;;  %s569_s4 = inlined_call_operand.vmem [shape: f32[128,16], index: 4, kind: output, shape index: {}]  }
   0x1   :  { %v355_v0 = vld [vmem:[%s565_s1 + $0x10] sm:$0xff]   ;;  %v356_v1 = vld [vmem:[%s565_s1 + $0x8] sm:$0xff]   ;;  %v357_v2 = vld [vmem:[%s565_s1] sm:$0xff]  }
   0x2   :  { %327 = vmatprep.subr.bf16.mxu0 %v355_v0  ;;  %349 = vmatprep.subr.bf16.mxu1 %v355_v0  ;;  %v358_v3 = vld [vmem:[%s566_s0] sm:$0xff]   ;;  %v360_v5 = vld [vmem:[%s566_s0 + $0x8] sm:$0xff]   ;;  %v362_v7 = vld [vmem:[%s566_s0 + $0x10] sm:$0xff]  }
   0x3   :  { %328 = vmatpush3.bf16.msra.mxu0 %v355_v0  ;;  %352 = vmatpush3.bf16.msra.mxu1 %v355_v0  ;;  %v359_v4 = vld [vmem:[%s566_s0 + $0x20] sm:$0xff]   ;;  %v361_v6 = vld [vmem:[%s566_s0 + $0x28] sm:$0xff]   ;;  %v363_v8 = vld [vmem:[%s566_s0 + $0x30] sm:$0xff]  }
   0x4   :  { %329 = vmatprep.subr.bf16.mxu0 %v356_v1  ;;  %350 = vmatprep.subr.bf16.mxu1 %v356_v1  ;;  %v364_v9 = vld [vmem:[%s566_s0 + $0x18] sm:$0xff]   ;;  %v435_v11 = vld [vmem:[%s567_s2] ss:$0 sm:$0xff]  ;;  %v229_v13 = vld [vmem:[%s568_s3 + $0x10] sm:$0xff] }
   0x5   :  { %333 = vmatprep.mubr.msk.bf16.mxu0 %vm105_vm0, %v358_v3  ;;  %341 = vmatprep.mubr.msk.bf16.mxu1 %vm105_vm0, %v359_v4  ;;  %v365_v10 = vld [vmem:[%s566_s0 + $0x38] sm:$0xff]   ;;  %v237_v15 = vld [vmem:[%s568_s3 + $0x50] sm:$0xff]  ;;  %v227_v19 = vld [vmem:[%s568_s3] sm:$0xff] }
   0x6   :  { %v235_v21 = vld [vmem:[%s568_s3 + $0x40] sm:$0xff]  ;;  %v230_v32 = vld [vmem:[%s568_s3 + $0x18] sm:$0xff]  ;;  %v228_v37 = vld [vmem:[%s568_s3 + $0x8] sm:$0xff] }
   0x7   :  { %330 = vmatpush3.bf16.msra.mxu0 %v356_v1  ;;  %353 = vmatpush3.bf16.msra.mxu1 %v356_v1  ;;  %v238_v33 = vld [vmem:[%s568_s3 + $0x58] sm:$0xff]  ;;  %v236_v39 = vld [vmem:[%s568_s3 + $0x48] sm:$0xff]  ;;  %v233_v47 = vld [vmem:[%s568_s3 + $0x30] sm:$0xff] }
   0x8   :  { %331 = vmatprep.subr.bf16.mxu0 %v357_v2  ;;  %351 = vmatprep.subr.bf16.mxu1 %v357_v2  ;;  %v241_v49 = vld [vmem:[%s568_s3 + $0x70] sm:$0xff]  ;;  %v231_v62 = vld [vmem:[%s568_s3 + $0x20] sm:$0xff]  ;;  %v234_v3 = vld [vmem:[%s568_s3 + $0x38] sm:$0xff] }
   0x9   :  { %v239_v63 = vld [vmem:[%s568_s3 + $0x60] sm:$0xff] }
   0xb   :  { %332 = vmatpush3.bf16.msra.mxu0 %v357_v2  ;;  %354 = vmatpush3.bf16.msra.mxu1 %v357_v2 }
   0xe   :  { %334 = vmatmul.mubr.msk.bf16.vlgmr.msra.gmra.mxu0 %vm105_vm0, %v360_v5  ;;  %342 = vmatmul.mubr.msk.bf16.vlgmr.msra.gmra.mxu1 %vm105_vm0, %v361_v6  ;;  %v242_v5 = vld [vmem:[%s568_s3 + $0x78] sm:$0xff] }
   0xf   :  { %337 = vmatprep.mubr.msk.bf16.mxu0 %vm105_vm0, %v362_v7  ;;  %345 = vmatprep.mubr.msk.bf16.mxu1 %vm105_vm0, %v363_v8 }
  0x16   :  { %338 = vmatmul.mubr.msk.bf16.gmra.mxu0 %vm105_vm0, %v364_v9  ;;  %346 = vmatmul.mubr.msk.bf16.gmra.mxu1 %vm105_vm0, %v365_v10 }
  0xce   :  { %v335_v12 = vpop.f32.mrf.mxu0  ;;  %v343_v14 = vpop.f32.mrf.mxu1 }
  0xcf   :  { %v173_v16 = vadd.f32 %v335_v12, %v435_v11  ;;  %v205_v17 = vadd.f32 %v343_v14, %v435_v11  ;;  %v232_v14 = vld [vmem:[%s568_s3 + $0x28] sm:$0xff] }
  0xd0   :  { %v164_v18 = vpop.f32.mrf.mxu0  ;;  %v196_v20 = vpop.f32.mrf.mxu1 }
  0xd1   :  { %v245_v22 = vadd.f32 %v229_v13, %v173_v16  ;;  %v253_v23 = vadd.f32 %v237_v15, %v205_v17  ;;  %v165_v24 = vadd.f32 %v435_v11, %v164_v18  ;;  %v197_v25 = vadd.f32 %v435_v11, %v196_v20  ;;  %v240_v16 = vld [vmem:[%s568_s3 + $0x68] sm:$0xff] }
  0xd2   :  { %v336_v26 = vpop.f32.mrf.mxu0  ;;  %v344_v27 = vpop.f32.mrf.mxu1 }
  0xd3   :  { %v261_v28 = vmax.f32 %v245_v22, 0.0  ;;  %v269_v29 = vmax.f32 %v253_v23, 0.0  ;;  %v243_v30 = vadd.f32 %v227_v19, %v165_v24  ;;  %v251_v31 = vadd.f32 %v235_v21, %v197_v25 }
  0xd4   :  { %v176_v34 = vadd.f32 %v336_v26, %v435_v11  ;;  %v208_v35 = vadd.f32 %v344_v27, %v435_v11  ;;  %v167_v36 = vpop.f32.mrf.mxu0  ;;  %v199_v38 = vpop.f32.mrf.mxu1 }
  0xd5   :  { %278 = vst.msk [vmem:[%s569_s4 + $0x10] sm:$0xff] %vm275_vm1, %v261_v28  ;;  %286 = vst.msk [vmem:[%s569_s4 + $0x50] sm:$0xff] %vm275_vm1, %v269_v29  ;;  %v259_v40 = vmax.f32 %v243_v30, 0.0  ;;  %v267_v41 = vmax.f32 %v251_v31, 0.0  ;;  %v168_v42 = vadd.f32 %v435_v11, %v167_v36  ;;  %v200_v43 = vadd.f32 %v435_v11, %v199_v38 }
  0xd6   :  { %v246_v44 = vadd.f32 %v230_v32, %v176_v34  ;;  %v254_v45 = vadd.f32 %v238_v33, %v208_v35  ;;  %v339_v46 = vpop.f32.mrf.mxu0  ;;  %v347_v48 = vpop.f32.mrf.mxu1 }
  0xd7   :  { %276 = vst.msk [vmem:[%s569_s4] sm:$0xff] %vm275_vm1, %v259_v40  ;;  %284 = vst.msk [vmem:[%s569_s4 + $0x40] sm:$0xff] %vm275_vm1, %v267_v41  ;;  %v244_v50 = vadd.f32 %v228_v37, %v168_v42  ;;  %v252_v51 = vadd.f32 %v236_v39, %v200_v43  ;;  %v189_v52 = vadd.f32 %v339_v46, %v435_v11 }
  0xd8   :  { %v221_v53 = vadd.f32 %v347_v48, %v435_v11  ;;  %v262_v54 = vmax.f32 %v246_v44, 0.0  ;;  %v270_v55 = vmax.f32 %v254_v45, 0.0  ;;  %v180_v56 = vpop.f32.mrf.mxu0  ;;  %v212_v57 = vpop.f32.mrf.mxu1 }
  0xd9   :  { %v260_v58 = vmax.f32 %v244_v50, 0.0  ;;  %v268_v59 = vmax.f32 %v252_v51, 0.0  ;;  %v249_v60 = vadd.f32 %v233_v47, %v189_v52  ;;  %v181_v0 = vadd.f32 %v435_v11, %v180_v56 }
  0xda   :  { %v257_v61 = vadd.f32 %v241_v49, %v221_v53  ;;  %279 = vst.msk [vmem:[%s569_s4 + $0x18] sm:$0xff] %vm275_vm1, %v262_v54  ;;  %287 = vst.msk [vmem:[%s569_s4 + $0x58] sm:$0xff] %vm275_vm1, %v270_v55  ;;  %v213_v1 = vadd.f32 %v435_v11, %v212_v57  ;;  %v340_v2 = vpop.f32.mrf.mxu0  ;;  %v348_v4 = vpop.f32.mrf.mxu1 }
  0xdb   :  { %277 = vst.msk [vmem:[%s569_s4 + $0x8] sm:$0xff] %vm275_vm1, %v260_v58  ;;  %285 = vst.msk [vmem:[%s569_s4 + $0x48] sm:$0xff] %vm275_vm1, %v268_v59  ;;  %v265_v6 = vmax.f32 %v249_v60, 0.0  ;;  %v192_v8 = vadd.f32 %v340_v2, %v435_v11  ;;  %v224_v9 = vadd.f32 %v348_v4, %v435_v11  ;;  %v247_v10 = vadd.f32 %v231_v62, %v181_v0 }
  0xdc   :  { %v273_v7 = vmax.f32 %v257_v61, 0.0  ;;  %v255_v12 = vadd.f32 %v239_v63, %v213_v1  ;;  %v183_v13 = vpop.f32.mrf.mxu0  ;;  %v215_v15 = vpop.f32.mrf.mxu1 }
  0xdd   :  { %282 = vst.msk [vmem:[%s569_s4 + $0x30] sm:$0xff] %vm275_vm1, %v265_v6  ;;  %v250_v17 = vadd.f32 %v234_v3, %v192_v8  ;;  %v258_v18 = vadd.f32 %v242_v5, %v224_v9  ;;  %v184_v19 = vadd.f32 %v435_v11, %v183_v13  ;;  %v216_v20 = vadd.f32 %v435_v11, %v215_v15 }
  0xde   :  { %290 = vst.msk [vmem:[%s569_s4 + $0x70] sm:$0xff] %vm275_vm1, %v273_v7  ;;  %v263_v21 = vmax.f32 %v247_v10, 0.0  ;;  %v271_v22 = vmax.f32 %v255_v12, 0.0 }
  0xdf   :  { %v266_v23 = vmax.f32 %v250_v17, 0.0  ;;  %v274_v24 = vmax.f32 %v258_v18, 0.0  ;;  %v248_v25 = vadd.f32 %v232_v14, %v184_v19  ;;  %v256_v26 = vadd.f32 %v240_v16, %v216_v20 }
  0xe0   :  { %280 = vst.msk [vmem:[%s569_s4 + $0x20] sm:$0xff] %vm275_vm1, %v263_v21  ;;  %288 = vst.msk [vmem:[%s569_s4 + $0x60] sm:$0xff] %vm275_vm1, %v271_v22 }
  0xe1   :  { %283 = vst.msk [vmem:[%s569_s4 + $0x38] sm:$0xff] %vm275_vm1, %v266_v23  ;;  %291 = vst.msk [vmem:[%s569_s4 + $0x78] sm:$0xff] %vm275_vm1, %v274_v24  ;;  %v264_v11 = vmax.f32 %v248_v25, 0.0  ;;  %v272_v27 = vmax.f32 %v256_v26, 0.0 }
  0xe3   :  { %281 = vst.msk [vmem:[%s569_s4 + $0x28] sm:$0xff] %vm275_vm1, %v264_v11  ;;  %289 = vst.msk [vmem:[%s569_s4 + $0x68] sm:$0xff] %vm275_vm1, %v272_v27 }

</bundles_post_ra>
